<compile_context>
chip_gen: v5e
topology: v5e:2x2
jax: 0.10.0
libtpu: 0.0.40
codegen_flags: <defaults>
</compile_context>

<pallas_src>
import jax
import jax.numpy as jnp
import numpy as np
from jax.experimental import pallas as pl
from jax.experimental.pallas import tpu as pltpu

INPUT_DIM = 3995
HIDDEN_DIM = 128
LATENT_DIM = 64


def _round_up(x, m):
    return ((x + m - 1) // m) * m


def _device_defaults():
    """(default batch tile, vmem_limit_bytes) per TPU generation."""
    kind = ""
    try:
        kind = jax.devices()[0].device_kind.lower()
    except Exception:
        pass
    if ("v5" in kind) or ("v6" in kind):
        # 128 MiB VMEM parts: bigger streamed tiles get closer to the HBM roofline.
        return 1024, 100 << 20
    # v7x (64 MiB VMEM per TensorCore) and unknown parts: stay conservative.
    return 512, 52 << 20


def _autoencoder_kernel(x_ref,
                        w1_ref, b1_ref, w2_ref, b2_ref,
                        w3_ref, b3_ref, w4_ref, b4_ref,
                        rec_ref, lat_ref):
    # bf16 matmul inputs, f32 accumulation on the MXU.  If x is already bf16 the
    # astype is a no-op; if it is f32 this is a cheap in-VMEM VPU cast.
    x = x_ref[...].astype(jnp.bfloat16)                        # (tb, 3995)

    # encoder: Linear -> ReLU -> Linear
    h1 = jnp.dot(x, w1_ref[...], preferred_element_type=jnp.float32) + b1_ref[...]
    h1 = jnp.maximum(h1, 0.0)                                  # (tb, 128)
    lat = jnp.dot(h1.astype(jnp.bfloat16), w2_ref[...],
                  preferred_element_type=jnp.float32) + b2_ref[...]
    lat_ref[...] = lat.astype(lat_ref.dtype)                   # (tb, 64)

    # decoder: Linear -> ReLU -> Linear
    h2 = jnp.dot(lat.astype(jnp.bfloat16), w3_ref[...],
                 preferred_element_type=jnp.float32) + b3_ref[...]
    h2 = jnp.maximum(h2, 0.0)                                  # (tb, 128)
    rec = jnp.dot(h2.astype(jnp.bfloat16), w4_ref[...],
                  preferred_element_type=jnp.float32) + b4_ref[...]
    rec_ref[...] = rec.astype(rec_ref.dtype)                   # (tb, 3995) bf16


def pack_params(params):
    """Cast weights to bf16 for the kernel (do this once).
    `params` are (w, b) pairs with w laid out (in_features, out_features);
    transpose torch nn.Linear weights before calling this."""
    w1, b1, w2, b2, w3, b3, w4, b4 = params
    return (w1.astype(jnp.bfloat16), b1.astype(jnp.float32).reshape(1, HIDDEN_DIM),
            w2.astype(jnp.bfloat16), b2.astype(jnp.float32).reshape(1, LATENT_DIM),
            w3.astype(jnp.bfloat16), b3.astype(jnp.float32).reshape(1, HIDDEN_DIM),
            w4.astype(jnp.bfloat16), b4.astype(jnp.float32).reshape(1, INPUT_DIM))


def autoencoder_forward(x, packed_params, *, tb=None):
    """x: (B, 3995) float32 or bfloat16.  packed_params from pack_params().
    Returns (reconstruction (B, 3995) bf16, latent (B, 64) f32)."""
    B, D = x.shape
    assert D == INPUT_DIM
    w1, b1, w2, b2, w3, b3, w4, b4 = packed_params

    default_tb, vmem_limit = _device_defaults()
    if tb is None:
        tb = default_tb

    # Batch tile: as large as the chip's VMEM allows (fills the MXU M dim and
    # amortizes per-grid-step overhead), clamped for small batches.  Keep >= 2 grid
    # steps where possible so v7x's second TensorCore is not idle on the parallel axis.
    n_rows = _round_up(B, 8)
    tb = max(8, min(_round_up(tb, 8), n_rows))
    if n_rows > 8 and pl.cdiv(B, tb) < 2:
        tb = _round_up(pl.cdiv(n_rows, 2), 8)
    grid = (pl.cdiv(B, tb),)

    out_shapes = (
        jax.ShapeDtypeStruct((B, INPUT_DIM), jnp.bfloat16),   # reconstruction
        jax.ShapeDtypeStruct((B, LATENT_DIM), jnp.float32),   # latent
    )

    # Roofline hint (real traffic: x read, bf16 rec write, f32 lat write, bf16 weights).
    matmul_flops = 2 * B * (INPUT_DIM * HIDDEN_DIM + HIDDEN_DIM * LATENT_DIM
                            + LATENT_DIM * HIDDEN_DIM + HIDDEN_DIM * INPUT_DIM)
    weight_bytes = 2 * (INPUT_DIM * HIDDEN_DIM + HIDDEN_DIM * LATENT_DIM
                        + LATENT_DIM * HIDDEN_DIM + HIDDEN_DIM * INPUT_DIM) \
        + 4 * (2 * HIDDEN_DIM + LATENT_DIM + INPUT_DIM)
    io_bytes = B * INPUT_DIM * x.dtype.itemsize + B * INPUT_DIM * 2 + B * LATENT_DIM * 4
    cost = pl.CostEstimate(flops=int(matmul_flops), transcendentals=0,
                           bytes_accessed=int(io_bytes + weight_bytes))

    rec, lat = pl.pallas_call(
        _autoencoder_kernel,
        out_shape=out_shapes,
        grid_spec=pltpu.PrefetchScalarGridSpec(
            num_scalar_prefetch=0,
            grid=grid,
            in_specs=[
                # x batch tile: streamed per grid step.  Last dim == full array dim
                # (3995), so it is exempt from the 128-divisibility rule.
                pl.BlockSpec((tb, INPUT_DIM), lambda i: (i, 0)),
                # Weights / biases: constant block index -> fetched once, resident.
                pl.BlockSpec((INPUT_DIM, HIDDEN_DIM), lambda i: (0, 0)),
                pl.BlockSpec((1, HIDDEN_DIM), lambda i: (0, 0)),
                pl.BlockSpec((HIDDEN_DIM, LATENT_DIM), lambda i: (0, 0)),
                pl.BlockSpec((1, LATENT_DIM), lambda i: (0, 0)),
                pl.BlockSpec((LATENT_DIM, HIDDEN_DIM), lambda i: (0, 0)),
                pl.BlockSpec((1, HIDDEN_DIM), lambda i: (0, 0)),
                pl.BlockSpec((HIDDEN_DIM, INPUT_DIM), lambda i: (0, 0)),
                pl.BlockSpec((1, INPUT_DIM), lambda i: (0, 0)),
            ],
            out_specs=[
                # Written at final shape; the partial tail tile's store is masked.
                pl.BlockSpec((tb, INPUT_DIM), lambda i: (i, 0)),
                pl.BlockSpec((tb, LATENT_DIM), lambda i: (i, 0)),
            ],
        ),
        compiler_params=pltpu.CompilerParams(
            dimension_semantics=("parallel",),
            vmem_limit_bytes=vmem_limit,
        ),
        cost_estimate=cost,
    )(x, w1, b1, w2, b2, w3, b3, w4, b4)

    return rec, lat


def init_params(key):
    """Deterministic init mimicking nn.Linear's U(-1/sqrt(fan_in), 1/sqrt(fan_in));
    weights laid out (fan_in, fan_out)."""
    def linear(k, fan_in, fan_out):
        kw, kb = jax.random.split(k)
        bound = 1.0 / np.sqrt(fan_in)
        w = jax.random.uniform(kw, (fan_in, fan_out), jnp.float32, -bound, bound)
        b = jax.random.uniform(kb, (1, fan_out), jnp.float32, -bound, bound)
        return w, b

    k1, k2, k3, k4 = jax.random.split(key, 4)
    w1, b1 = linear(k1, INPUT_DIM, HIDDEN_DIM)
    w2, b2 = linear(k2, HIDDEN_DIM, LATENT_DIM)
    w3, b3 = linear(k3, LATENT_DIM, HIDDEN_DIM)
    w4, b4 = linear(k4, HIDDEN_DIM, INPUT_DIM)
    return (w1, b1, w2, b2, w3, b3, w4, b4)


def reference_forward(x, params):
    """Pure-JAX reference using the same bf16-input / f32-accumulate numerics."""
    w1, b1, w2, b2, w3, b3, w4, b4 = params
    f = lambda a: a.astype(jnp.bfloat16)
    h1 = jnp.maximum(jnp.dot(f(x), f(w1), preferred_element_type=jnp.float32) + b1, 0.0)
    lat = jnp.dot(f(h1), f(w2), preferred_element_type=jnp.float32) + b2
    h2 = jnp.maximum(jnp.dot(f(lat), f(w3), preferred_element_type=jnp.float32) + b3, 0.0)
    rec = jnp.dot(f(h2), f(w4), preferred_element_type=jnp.float32) + b4
    return rec, lat


if __name__ == "__main__":
    key = jax.random.PRNGKey(0)
    kx, kp = jax.random.split(key)

    params = init_params(kp)
    packed = pack_params(params)

    # B=32: exact 2-step grid.  B=37: exercises the masked partial (unpadded) tail tile.
    for B in (32, 37):
        x = jax.random.normal(jax.random.fold_in(kx, B), (B, INPUT_DIM), dtype=jnp.float32)
        rec, lat = jax.block_until_ready(autoencoder_forward(x, packed))
        assert rec.shape == (B, INPUT_DIM) and rec.dtype == jnp.bfloat16
        assert lat.shape == (B, LATENT_DIM) and lat.dtype == jnp.float32

        rec_ref, lat_ref = reference_forward(x, params)
        np.testing.assert_allclose(np.asarray(lat), np.asarray(lat_ref),
                                   rtol=2e-2, atol=2e-2)
        np.testing.assert_allclose(np.asarray(rec, dtype=np.float32), np.asarray(rec_ref),
                                   rtol=2e-2, atol=2e-2)

    print("KERNEL_OK")
</pallas_src>

<mosaic_0001>
module attributes {stable_mosaic.version = 11 : i64} {
  func.func @_autoencoder_kernel(%arg0: i32, %arg1: memref<16x3995xf32, #tpu.memory_space<vmem>>, %arg2: memref<3995x128xbf16, #tpu.memory_space<vmem>>, %arg3: memref<1x128xf32, #tpu.memory_space<vmem>>, %arg4: memref<128x64xbf16, #tpu.memory_space<vmem>>, %arg5: memref<1x64xf32, #tpu.memory_space<vmem>>, %arg6: memref<64x128xbf16, #tpu.memory_space<vmem>>, %arg7: memref<1x128xf32, #tpu.memory_space<vmem>>, %arg8: memref<128x3995xbf16, #tpu.memory_space<vmem>>, %arg9: memref<1x3995xf32, #tpu.memory_space<vmem>>, %arg10: memref<16x3995xbf16, #tpu.memory_space<vmem>>, %arg11: memref<16x64xf32, #tpu.memory_space<vmem>>) attributes {dimension_semantics = [#tpu.dimension_semantics<parallel>], iteration_bounds = array<i64: 2>, scalar_prefetch = 0 : i64, scratch_operands = 0 : i64, tpu.core_type = #tpu.core_type<tc>, window_params = [{transform_indices = @transform_0, window_bounds = array<i64: 16, 3995>}, {pipeline_mode = #tpu.pipeline_mode<synchronous>, transform_indices = @transform_1, window_bounds = array<i64: 3995, 128>}, {pipeline_mode = #tpu.pipeline_mode<synchronous>, transform_indices = @transform_2, window_bounds = array<i64: 1, 128>}, {pipeline_mode = #tpu.pipeline_mode<synchronous>, transform_indices = @transform_3, window_bounds = array<i64: 128, 64>}, {pipeline_mode = #tpu.pipeline_mode<synchronous>, transform_indices = @transform_4, window_bounds = array<i64: 1, 64>}, {pipeline_mode = #tpu.pipeline_mode<synchronous>, transform_indices = @transform_5, window_bounds = array<i64: 64, 128>}, {pipeline_mode = #tpu.pipeline_mode<synchronous>, transform_indices = @transform_6, window_bounds = array<i64: 1, 128>}, {pipeline_mode = #tpu.pipeline_mode<synchronous>, transform_indices = @transform_7, window_bounds = array<i64: 128, 3995>}, {pipeline_mode = #tpu.pipeline_mode<synchronous>, transform_indices = @transform_8, window_bounds = array<i64: 1, 3995>}, {transform_indices = @transform_9, window_bounds = array<i64: 16, 3995>}, {transform_indices = @transform_10, window_bounds = array<i64: 16, 64>}]} {
    %c0 = arith.constant 0 : index
    %c0_0 = arith.constant 0 : index
    %0 = vector.load %arg1[%c0, %c0_0] : memref<16x3995xf32, #tpu.memory_space<vmem>>, vector<16x3995xf32>
    %1 = arith.truncf %0 : vector<16x3995xf32> to vector<16x3995xbf16>
    %c0_1 = arith.constant 0 : index
    %c0_2 = arith.constant 0 : index
    %2 = vector.load %arg2[%c0_1, %c0_2] : memref<3995x128xbf16, #tpu.memory_space<vmem>>, vector<3995x128xbf16>
    %cst = arith.constant dense<0.000000e+00> : vector<16x128xf32>
    %3 = tpu.matmul %1, %2, %cst {dimension_numbers = #tpu.dot_dimension_numbers<[1], [0], [0], [1], [0, 0, 1, 1], [], []>} : vector<16x3995xbf16>, vector<3995x128xbf16>, vector<16x128xf32> -> vector<16x128xf32>
    %c0_3 = arith.constant 0 : index
    %c0_4 = arith.constant 0 : index
    %4 = vector.load %arg3[%c0_3, %c0_4] : memref<1x128xf32, #tpu.memory_space<vmem>>, vector<1x128xf32>
    %5 = vector.broadcast %4 : vector<1x128xf32> to vector<16x128xf32>
    %6 = arith.addf %3, %5 : vector<16x128xf32>
    %cst_5 = arith.constant 0.000000e+00 : f32
    %7 = vector.broadcast %cst_5 : f32 to vector<16x128xf32>
    %8 = arith.maximumf %6, %7 : vector<16x128xf32>
    %9 = arith.truncf %8 : vector<16x128xf32> to vector<16x128xbf16>
    %c0_6 = arith.constant 0 : index
    %c0_7 = arith.constant 0 : index
    %10 = vector.load %arg4[%c0_6, %c0_7] : memref<128x64xbf16, #tpu.memory_space<vmem>>, vector<128x64xbf16>
    %cst_8 = arith.constant dense<0.000000e+00> : vector<16x64xf32>
    %11 = tpu.matmul %9, %10, %cst_8 {dimension_numbers = #tpu.dot_dimension_numbers<[1], [0], [0], [1], [0, 0, 1, 1], [], []>} : vector<16x128xbf16>, vector<128x64xbf16>, vector<16x64xf32> -> vector<16x64xf32>
    %c0_9 = arith.constant 0 : index
    %c0_10 = arith.constant 0 : index
    %12 = vector.load %arg5[%c0_9, %c0_10] : memref<1x64xf32, #tpu.memory_space<vmem>>, vector<1x64xf32>
    %13 = vector.broadcast %12 : vector<1x64xf32> to vector<16x64xf32>
    %14 = arith.addf %11, %13 : vector<16x64xf32>
    %c0_11 = arith.constant 0 : index
    %c0_12 = arith.constant 0 : index
    %15 = vector.load %arg11[%c0_11, %c0_12] : memref<16x64xf32, #tpu.memory_space<vmem>>, vector<16x64xf32>
    tpu.vector_store %arg11[%c0_11, %c0_12], %14 {strides = array<i32>} : memref<16x64xf32, #tpu.memory_space<vmem>>, vector<16x64xf32>,
    %16 = arith.truncf %14 : vector<16x64xf32> to vector<16x64xbf16>
    %c0_13 = arith.constant 0 : index
    %c0_14 = arith.constant 0 : index
    %17 = vector.load %arg6[%c0_13, %c0_14] : memref<64x128xbf16, #tpu.memory_space<vmem>>, vector<64x128xbf16>
    %cst_15 = arith.constant dense<0.000000e+00> : vector<16x128xf32>
    %18 = tpu.matmul %16, %17, %cst_15 {dimension_numbers = #tpu.dot_dimension_numbers<[1], [0], [0], [1], [0, 0, 1, 1], [], []>} : vector<16x64xbf16>, vector<64x128xbf16>, vector<16x128xf32> -> vector<16x128xf32>
    %c0_16 = arith.constant 0 : index
    %c0_17 = arith.constant 0 : index
    %19 = vector.load %arg7[%c0_16, %c0_17] : memref<1x128xf32, #tpu.memory_space<vmem>>, vector<1x128xf32>
    %20 = vector.broadcast %19 : vector<1x128xf32> to vector<16x128xf32>
    %21 = arith.addf %18, %20 : vector<16x128xf32>
    %cst_18 = arith.constant 0.000000e+00 : f32
    %22 = vector.broadcast %cst_18 : f32 to vector<16x128xf32>
    %23 = arith.maximumf %21, %22 : vector<16x128xf32>
    %24 = arith.truncf %23 : vector<16x128xf32> to vector<16x128xbf16>
    %c0_19 = arith.constant 0 : index
    %c0_20 = arith.constant 0 : index
    %25 = vector.load %arg8[%c0_19, %c0_20] : memref<128x3995xbf16, #tpu.memory_space<vmem>>, vector<128x3995xbf16>
    %cst_21 = arith.constant dense<0.000000e+00> : vector<16x3995xf32>
    %26 = tpu.matmul %24, %25, %cst_21 {dimension_numbers = #tpu.dot_dimension_numbers<[1], [0], [0], [1], [0, 0, 1, 1], [], []>} : vector<16x128xbf16>, vector<128x3995xbf16>, vector<16x3995xf32> -> vector<16x3995xf32>
    %c0_22 = arith.constant 0 : index
    %c0_23 = arith.constant 0 : index
    %27 = vector.load %arg9[%c0_22, %c0_23] : memref<1x3995xf32, #tpu.memory_space<vmem>>, vector<1x3995xf32>
    %28 = vector.broadcast %27 : vector<1x3995xf32> to vector<16x3995xf32>
    %29 = arith.addf %26, %28 : vector<16x3995xf32>
    %30 = arith.truncf %29 : vector<16x3995xf32> to vector<16x3995xbf16>
    %c0_24 = arith.constant 0 : index
    %c0_25 = arith.constant 0 : index
    %31 = vector.load %arg10[%c0_24, %c0_25] : memref<16x3995xbf16, #tpu.memory_space<vmem>>, vector<16x3995xbf16>
    tpu.vector_store %arg10[%c0_24, %c0_25], %30 {strides = array<i32>} : memref<16x3995xbf16, #tpu.memory_space<vmem>>, vector<16x3995xbf16>,
    return
  }
  func.func @transform_0(%arg0: i32) -> (i32, i32) {
    %c0_i32 = arith.constant 0 : i32
    %c0_i32_0 = arith.constant 0 : i32
    return %arg0, %c0_i32 : i32, i32
  }
  func.func @transform_1(%arg0: i32) -> (i32, i32) {
    %c0_i32 = arith.constant 0 : i32
    %c0_i32_0 = arith.constant 0 : i32
    %c0_i32_1 = arith.constant 0 : i32
    return %c0_i32, %c0_i32_0 : i32, i32
  }
  func.func @transform_2(%arg0: i32) -> (i32, i32) {
    %c0_i32 = arith.constant 0 : i32
    %c0_i32_0 = arith.constant 0 : i32
    %c0_i32_1 = arith.constant 0 : i32
    return %c0_i32, %c0_i32_0 : i32, i32
  }
  func.func @transform_3(%arg0: i32) -> (i32, i32) {
    %c0_i32 = arith.constant 0 : i32
    %c0_i32_0 = arith.constant 0 : i32
    %c0_i32_1 = arith.constant 0 : i32
    return %c0_i32, %c0_i32_0 : i32, i32
  }
  func.func @transform_4(%arg0: i32) -> (i32, i32) {
    %c0_i32 = arith.constant 0 : i32
    %c0_i32_0 = arith.constant 0 : i32
    %c0_i32_1 = arith.constant 0 : i32
    return %c0_i32, %c0_i32_0 : i32, i32
  }
  func.func @transform_5(%arg0: i32) -> (i32, i32) {
    %c0_i32 = arith.constant 0 : i32
    %c0_i32_0 = arith.constant 0 : i32
    %c0_i32_1 = arith.constant 0 : i32
    return %c0_i32, %c0_i32_0 : i32, i32
  }
  func.func @transform_6(%arg0: i32) -> (i32, i32) {
    %c0_i32 = arith.constant 0 : i32
    %c0_i32_0 = arith.constant 0 : i32
    %c0_i32_1 = arith.constant 0 : i32
    return %c0_i32, %c0_i32_0 : i32, i32
  }
  func.func @transform_7(%arg0: i32) -> (i32, i32) {
    %c0_i32 = arith.constant 0 : i32
    %c0_i32_0 = arith.constant 0 : i32
    %c0_i32_1 = arith.constant 0 : i32
    return %c0_i32, %c0_i32_0 : i32, i32
  }
  func.func @transform_8(%arg0: i32) -> (i32, i32) {
    %c0_i32 = arith.constant 0 : i32
    %c0_i32_0 = arith.constant 0 : i32
    %c0_i32_1 = arith.constant 0 : i32
    return %c0_i32, %c0_i32_0 : i32, i32
  }
  func.func @transform_9(%arg0: i32) -> (i32, i32) {
    %c0_i32 = arith.constant 0 : i32
    %c0_i32_0 = arith.constant 0 : i32
    return %arg0, %c0_i32 : i32, i32
  }
  func.func @transform_10(%arg0: i32) -> (i32, i32) {
    %c0_i32 = arith.constant 0 : i32
    %c0_i32_0 = arith.constant 0 : i32
    return %arg0, %c0_i32 : i32, i32
  }
}

</mosaic_0001>

<bundles_post_ra>
// kernel: tpu_custom_call.1
= control target key start
LH: loop header
LB: loop body
LE: loop exit
PB: predicated region body
PF: predicated region fallthrough
CT: control target
= control target key end

     0   :  { %s10844_s0 = inlined_call_operand.vmem [shape: f32[32,3995], index: 0, kind: input, shape index: {}]   ;;  %s10845_s1 = inlined_call_operand.vmem [shape: bf16[3995,128], index: 1, kind: input, shape index: {}]   ;;  %s10846_s2 = inlined_call_operand.vmem [shape: f32[1,128], index: 2, kind: input, shape index: {}]   ;;  %s10847_s3 = inlined_call_operand.vmem [shape: bf16[128,64], index: 3, kind: input, shape index: {}]   ;;  %s10848_s4 = inlined_call_operand.vmem [shape: f32[1,64], index: 4, kind: input, shape index: {}]   ;;  %s10849_s5 = inlined_call_operand.vmem [shape: bf16[64,128], index: 5, kind: input, shape index: {}]   ;;  %s10850_s6 = inlined_call_operand.vmem [shape: f32[1,128], index: 6, kind: input, shape index: {}]   ;;  %s10851_s7 = inlined_call_operand.vmem [shape: bf16[128,3995], index: 7, kind: input, shape index: {}]   ;;  %s10852_s8 = inlined_call_operand.vmem [shape: f32[1,3995], index: 8, kind: input, shape index: {}]   ;;  %s10853_s9 = inlined_call_operand.hbm [shape: bf16[32,3995], index: 9, kind: output, shape index: {0}]   ;;  %s10854_s10 = inlined_call_operand.hbm [shape: f32[32,64], index: 10, kind: output, shape index: {1}]  }
   0x1   :  { %10855 = sst [smem:[#allocation9_spill]] %s10844_s0 }
   0x2   :  { %10856 = sst [smem:[#allocation10_spill]] %s10845_s1 }
   0x3   :  { %16 = vsyncpa [#allocation3], 0 }
   0x4   :  { %18 = vsyncpa [#allocation3 + $0x1], 0 }
   0x5   :  { %19 = vsyncpa [#allocation5], 0 }
   0x6   :  { %21 = vsyncpa [#allocation5 + $0x1], 0  ;;  %s8157_s13 = smov 0   ;;  %s8159_s14 = smov 0  }
   0x7   :  { %s8161_s15 = smov 0   ;;  %s8163_s16 = smov 0  }
   0x8 LB: > { %s8178_s17 = sadd.s32 4294967295, %s8096_s16   ;;  %s5337_s18 = sadd.s32 4294967294, %s8096_s16   ;;  %s8096_s16 = sphi %s8163_s16, %s10868_s16   ;;  %s8092_s15 = sphi %s8161_s15, %s10867_s15   ;;  %s8088_s14 = sphi %s8159_s14, %s10866_s14   ;;  %s8084_s13 = sphi %s8157_s13, %s10865_s13  }
   0x9   : > { %s8182_s19 = sadd.s32 1, %s8096_s16   ;;  %s228_s20 = sadd.s32 1, %s8092_s15 }
   0xa   : > { %s225_s21 = ssub.s32 %s8096_s16, %s8182_s19  ;;  %p238_p0 = scmp.ne.s32.totalorder %s8092_s15, %s8088_s14 }
   0xb   : > { %p226_p1 = scmp.eq.s32.totalorder %s225_s21, 0  ;;  %p239_p2 = scmp.eq.s32.totalorder %s8178_s17, 1 }
   0xc   : > { %p244_p3 = scmp.ne.s32.totalorder %s8088_s14, %s8084_s13  ;;  %p245_p4 = scmp.eq.s32.totalorder %s5337_s18, 1 }
   0xd   : > { %s8193_s22 = scalar_select %p226_p1, %s8092_s15, %s228_s20  }
   0xe   : > { %p8195_p5 = por %p239_p2, %p238_p0  ;;  %p8199_p6 = por %p245_p4, %p244_p3 }
   0xf   : > { %10857 = sst [smem:[#allocation8_spill]] %s8193_s22  ;;  %p5340_p7 = scmp.ge.s32.totalorder %s8096_s16, 1 }
  0x10   : > { %p323_p8 = scmp.lt.s32.totalorder %s8096_s16, 3 }
  0x12   : > { %p324_p9 = pnand %p5340_p7, %p323_p8 }
  0x13   : > { %s10860_s1 = sld [smem:[#allocation10_spill]] (!%p324_p9)  ;;  %s5343_s27 = sshll.u32 (!%p324_p9), %s8178_s17, 1 }
  0x14   : > { %327 = sbr.rel (%p324_p9) target bundleno = 1057 (0x421), region = 56  ;;  %p368_p10 = scmp.lt.s32.totalorder (!%p324_p9), %s5343_s27, 3 }
  0x15   : > { %s10861_s0 = sld [smem:[#allocation9_spill]] (!%p324_p9)  ;;  %s9172_s18 = sand.u32 (!%p324_p9), 1, %s8088_s14  }
  0x16   : > { %s5341_s11 = sshll.u32 (!%p324_p9), %s9172_s18, 8  ;;  %s8022_s30 = scalar_lea.hbm (!%p324_p9), %s10854_s10, 32 }
  0x17   : > { %s10431_s28 = scalar_lea.vmem (!%p324_p9), [#allocation2], %s5341_s11 }
  0x19   : > { %v7437_v0 = vld [vmem:[%s10860_s1 + $0x38] sm:$0xff]  ;;  %v7436_v4 = vld [vmem:[%s10860_s1 + $0x30] sm:$0xff]  ;;  %v7435_v8 = vld [vmem:[%s10860_s1 + $0x28] sm:$0xff]  ;;  %s10870_s27 = smov (!%p368_p10, %s5343_s27), 3  ;;  %vm2480_vm0 = vcmask 1044480   ;;  %vm2481_vm1 = vcmask 1045504  }
  0x1a   : > { %v7445_v1 = vld [vmem:[%s10860_s1 + $0x78] sm:$0xff]  ;;  %2487 = vmatpush.bf16.msra.mxu0 %v7437_v0  ;;  %v7444_v5 = vld [vmem:[%s10860_s1 + $0x70] sm:$0xff]  ;;  %v7443_v9 = vld [vmem:[%s10860_s1 + $0x68] sm:$0xff]  ;;  %s7429_s12 = sshll.u32 %s10870_s27, 8  ;;  %vm2476_vm2 = vcmask 220160   ;;  %vm3020_vm3 = vcmask 523264  }
  0x1b   : > { %v7453_v2 = vld [vmem:[%s10860_s1 + $0xb8] sm:$0xff]  ;;  %2501 = vmatpush.bf16.msra.mxu1 %v7445_v1  ;;  %v7452_v6 = vld [vmem:[%s10860_s1 + $0xb0] sm:$0xff]  ;;  %v7451_v10 = vld [vmem:[%s10860_s1 + $0xa8] sm:$0xff]  ;;  %s8293_s22 = scalar_lea.vmem %s10861_s0, %s7429_s12  ;;  %s5342_s12 = sshll.u32 %s9172_s18, 4 }
  0x1c   : > { %v7461_v3 = vld [vmem:[%s10860_s1 + $0xf8] sm:$0xff]  ;;  %2515 = vmatpush.bf16.msra.mxu2 %v7453_v2  ;;  %v7460_v7 = vld [vmem:[%s10860_s1 + $0xf0] sm:$0xff]  ;;  %v7459_v11 = vld [vmem:[%s10860_s1 + $0xe8] sm:$0xff]  ;;  %s9248_s0 = scalar_lea.vmem [#allocation4], %s5342_s12  ;;  %s7950_s12 = sshll.u32 %s8178_s17, 4 }
  0x1d   : > { %2529 = vmatpush.bf16.msra.mxu3 %v7461_v3  ;;  %v7434_v12 = vld [vmem:[%s10860_s1 + $0x20] sm:$0xff]  ;;  %v7433_v16 = vld [vmem:[%s10860_s1 + $0x18] sm:$0xff]  ;;  %v7432_v20 = vld [vmem:[%s10860_s1 + $0x10] sm:$0xff]  ;;  %s5238_s20 = scalar_lea.hbm %s10854_s10, %s7950_s12 }
  0x1e   : > { %2488 = vmatpush.bf16.msra.mxu0 %v7436_v4  ;;  %v7442_v13 = vld [vmem:[%s10860_s1 + $0x60] sm:$0xff]  ;;  %v7441_v17 = vld [vmem:[%s10860_s1 + $0x58] sm:$0xff]  ;;  %v7440_v21 = vld [vmem:[%s10860_s1 + $0x50] sm:$0xff]  ;;  %s5241_s21 = sshll.u32 %s5238_s20, 4  ;;  %s5242_s21 = int_to_ptr.hbm [resolvable:$true] %s5241_s21 }
  0x1f   : > { %2502 = vmatpush.bf16.msra.mxu1 %v7444_v5  ;;  %v7450_v14 = vld [vmem:[%s10860_s1 + $0xa0] sm:$0xff]  ;;  %v7449_v18 = vld [vmem:[%s10860_s1 + $0x98] sm:$0xff]  ;;  %v7448_v22 = vld [vmem:[%s10860_s1 + $0x90] sm:$0xff]  ;;  %s8016_s25 = sshra.s32 %s5242_s21, 4  ;;  %s8017_s25 = int_to_ptr.hbm [resolvable:$true] %s8016_s25 }
  0x20   : > { %2516 = vmatpush.bf16.msra.mxu2 %v7452_v6  ;;  %v7458_v15 = vld [vmem:[%s10860_s1 + $0xe0] sm:$0xff]  ;;  %v7457_v19 = vld [vmem:[%s10860_s1 + $0xd8] sm:$0xff]  ;;  %v7456_v23 = vld [vmem:[%s10860_s1 + $0xd0] sm:$0xff]  ;;  %s8018_s26 = scalar_lea.hbm %s8017_s25, 16  ;;  %p8023_p0 = scmp.lt.s32.totalorder %s8017_s25, %s10854_s10 }
  0x21   : > { %2530 = vmatpush.bf16.msra.mxu3 %v7460_v7  ;;  %v7431_v24 = vld [vmem:[%s10860_s1 + $0x8] sm:$0xff]  ;;  %v7430_v28 = vld [vmem:[%s10860_s1] sm:$0xff]  ;;  %v7469_v31 = vld [vmem:[%s10860_s1 + $0x138] sm:$0xff]  ;;  %p8019_p11 = scmp.ne.s32.totalorder %s8017_s25, %s8018_s26  ;;  %p8024_p1 = scmp.lt.s32.totalorder %s8022_s30, %s8018_s26 }
  0x22   : > { %2489 = vmatpush.bf16.msra.mxu0 %v7435_v8  ;;  %v7439_v25 = vld [vmem:[%s10860_s1 + $0x48] sm:$0xff]  ;;  %v7438_v29 = vld [vmem:[%s10860_s1 + $0x40] sm:$0xff]  ;;  %v7477_v34 = vld [vmem:[%s10860_s1 + $0x178] sm:$0xff] }
  0x23   : > { %2503 = vmatpush.bf16.msra.mxu1 %v7443_v9  ;;  %v7447_v26 = vld [vmem:[%s10860_s1 + $0x88] sm:$0xff]  ;;  %v7446_v30 = vld [vmem:[%s10860_s1 + $0x80] sm:$0xff]  ;;  %v379_v35 = vld [vmem:[%s8293_s22 + $0x10] sm:$0xff]  ;;  %p8020_p12 = pnand %p8019_p11, %p8195_p5  ;;  %p8025_p2 = por %p8024_p1, %p8023_p0 }
  0x24   : > { %2517 = vmatpush.bf16.msra.mxu2 %v7451_v10  ;;  %v7455_v27 = vld [vmem:[%s10860_s1 + $0xc8] sm:$0xff]  ;;  %v377_v32 = vld [vmem:[%s8293_s22] sm:$0xff]  ;;  %v411_v36 = vld [vmem:[%s8293_s22 + $0x110] sm:$0xff] }
  0x25   : > { %2531 = vmatpush.bf16.msra.mxu3 %v7459_v11  ;;  %v409_v33 = vld [vmem:[%s8293_s22 + $0x100] sm:$0xff]  ;;  %v7485_v37 = vld [vmem:[%s10860_s1 + $0x1b8] sm:$0xff]  ;;  %v378_v38 = vld [vmem:[%s8293_s22 + $0x8] sm:$0xff]  ;;  %v443_v43 = vpack.c.bf16 %v411_v36, %v379_v35  ;;  %p8021_p13 = pneg %p8020_p12 }
  0x26   : > { %2490 = vmatpush.bf16.msra.mxu0 %v7434_v12  ;;  %v410_v39 = vld [vmem:[%s8293_s22 + $0x108] sm:$0xff]  ;;  %v7454_v40 = vld [vmem:[%s10860_s1 + $0xc0] sm:$0xff]  ;;  %v441_v41 = vpack.c.bf16 %v409_v33, %v377_v32  ;;  %v7493_v42 = vld [vmem:[%s10860_s1 + $0x1f8] sm:$0xff] }
  0x27   : > { %2504 = vmatpush.bf16.msra.mxu1 %v7442_v13  ;;  %v380_v44 = vld [vmem:[%s8293_s22 + $0x18] sm:$0xff]  ;;  %v7468_v46 = vld [vmem:[%s10860_s1 + $0x130] sm:$0xff]  ;;  %v442_v47 = vpack.c.bf16 %v410_v39, %v378_v38  ;;  %v7467_v52 = vld [vmem:[%s10860_s1 + $0x128] sm:$0xff]  ;;  %p8026_p3 = pnand %p8025_p2, %p8021_p13 }
  0x28   : > { %2518 = vmatpush.bf16.msra.mxu2 %v7450_v14  ;;  %v412_v45 = vld [vmem:[%s8293_s22 + $0x118] sm:$0xff]  ;;  %v7476_v48 = vld [vmem:[%s10860_s1 + $0x170] sm:$0xff]  ;;  %v7475_v53 = vld [vmem:[%s10860_s1 + $0x168] sm:$0xff] }
  0x29   : > { %2532 = vmatpush.bf16.msra.mxu3 %v7458_v15  ;;  %v7484_v49 = vld [vmem:[%s10860_s1 + $0x1b0] sm:$0xff]  ;;  %v444_v50 = vpack.c.bf16 %v412_v45, %v380_v44  ;;  %v7483_v54 = vld [vmem:[%s10860_s1 + $0x1a8] sm:$0xff]  ;;  %v7466_v56 = vld [vmem:[%s10860_s1 + $0x120] sm:$0xff] }
  0x2a   : > { %2491 = vmatpush.bf16.msra.mxu0 %v7433_v16  ;;  %v7492_v51 = vld [vmem:[%s10860_s1 + $0x1f0] sm:$0xff]  ;;  %v7491_v55 = vld [vmem:[%s10860_s1 + $0x1e8] sm:$0xff]  ;;  %v7474_v57 = vld [vmem:[%s10860_s1 + $0x160] sm:$0xff] }
  0x2b   : > { %2505 = vmatpush.bf16.msra.mxu1 %v7441_v17  ;;  %v7482_v58 = vld [vmem:[%s10860_s1 + $0x1a0] sm:$0xff]  ;;  %v7465_v60 = vld [vmem:[%s10860_s1 + $0x118] sm:$0xff]  ;;  %v7464_v0 = vld [vmem:[%s10860_s1 + $0x110] sm:$0xff] }
  0x2c   : > { %2519 = vmatpush.bf16.msra.mxu2 %v7449_v18  ;;  %v7490_v59 = vld [vmem:[%s10860_s1 + $0x1e0] sm:$0xff]  ;;  %v7473_v61 = vld [vmem:[%s10860_s1 + $0x158] sm:$0xff]  ;;  %v7472_v1 = vld [vmem:[%s10860_s1 + $0x150] sm:$0xff] }
  0x2d   : > { %2533 = vmatpush.bf16.msra.mxu3 %v7457_v19  ;;  %v7481_v62 = vld [vmem:[%s10860_s1 + $0x198] sm:$0xff]  ;;  %v7480_v2 = vld [vmem:[%s10860_s1 + $0x190] sm:$0xff]  ;;  %v7463_v4 = vld [vmem:[%s10860_s1 + $0x108] sm:$0xff] }
  0x2e   : > { %2492 = vmatpush.bf16.msra.mxu0 %v7432_v20  ;;  %v7489_v63 = vld [vmem:[%s10860_s1 + $0x1d8] sm:$0xff]  ;;  %v7488_v3 = vld [vmem:[%s10860_s1 + $0x1d0] sm:$0xff]  ;;  %v7471_v5 = vld [vmem:[%s10860_s1 + $0x148] sm:$0xff] }
  0x2f   : > { %2506 = vmatpush.bf16.msra.mxu1 %v7440_v21  ;;  %v7479_v6 = vld [vmem:[%s10860_s1 + $0x188] sm:$0xff]  ;;  %v7462_v8 = vld [vmem:[%s10860_s1 + $0x100] sm:$0xff]  ;;  %v7501_v11 = vld [vmem:[%s10860_s1 + $0x238] sm:$0xff] }
  0x30   : > { %2520 = vmatpush.bf16.msra.mxu2 %v7448_v22  ;;  %v7487_v7 = vld [vmem:[%s10860_s1 + $0x1c8] sm:$0xff]  ;;  %v7470_v9 = vld [vmem:[%s10860_s1 + $0x140] sm:$0xff]  ;;  %v7509_v12 = vld [vmem:[%s10860_s1 + $0x278] sm:$0xff] }
  0x31   : > { %2534 = vmatpush.bf16.msra.mxu3 %v7456_v23  ;;  %v7478_v10 = vld [vmem:[%s10860_s1 + $0x180] sm:$0xff]  ;;  %v383_v15 = vld [vmem:[%s8293_s22 + $0x30] sm:$0xff]  ;;  %v7517_v17 = vld [vmem:[%s10860_s1 + $0x2b8] sm:$0xff] }
  0x32   : > { %2493 = vmatpush.bf16.msra.mxu0 %v7431_v24  ;;  %v381_v13 = vld [vmem:[%s8293_s22 + $0x20] sm:$0xff]  ;;  %v415_v16 = vld [vmem:[%s8293_s22 + $0x130] sm:$0xff]  ;;  %v382_v18 = vld [vmem:[%s8293_s22 + $0x28] sm:$0xff] }
  0x33   : > { %2507 = vmatpush.bf16.msra.mxu1 %v7439_v25  ;;  %v413_v14 = vld [vmem:[%s8293_s22 + $0x120] sm:$0xff]  ;;  %v414_v19 = vld [vmem:[%s8293_s22 + $0x128] sm:$0xff]  ;;  %v384_v21 = vld [vmem:[%s8293_s22 + $0x38] sm:$0xff]  ;;  %v447_v24 = vpack.c.bf16 %v415_v16, %v383_v15 }
  0x34   : > { %2521 = vmatpush.bf16.msra.mxu2 %v7447_v26  ;;  %v7486_v20 = vld [vmem:[%s10860_s1 + $0x1c0] sm:$0xff]  ;;  %v416_v22 = vld [vmem:[%s8293_s22 + $0x138] sm:$0xff]  ;;  %v445_v23 = vpack.c.bf16 %v413_v14, %v381_v13  ;;  %v446_v26 = vpack.c.bf16 %v414_v19, %v382_v18  ;;  %v7499_v32 = vld [vmem:[%s10860_s1 + $0x228] sm:$0xff] }
  0x35   : > { %2535 = vmatpush.bf16.msra.mxu3 %v7455_v27  ;;  %v7525_v25 = vld [vmem:[%s10860_s1 + $0x2f8] sm:$0xff]  ;;  %v448_v27 = vpack.c.bf16 %v416_v22, %v384_v21  ;;  %v7507_v33 = vld [vmem:[%s10860_s1 + $0x268] sm:$0xff]  ;;  %v7498_v36 = vld [vmem:[%s10860_s1 + $0x220] sm:$0xff] }
  0x36   : > { %2494 = vmatpush.bf16.msra.mxu0 %v7430_v28  ;;  %v7500_v28 = vld [vmem:[%s10860_s1 + $0x230] sm:$0xff]  ;;  %v7523_v35 = vld [vmem:[%s10860_s1 + $0x2e8] sm:$0xff]  ;;  %v7514_v38 = vld [vmem:[%s10860_s1 + $0x2a0] sm:$0xff] }
  0x37   : > { %2508 = vmatpush.bf16.msra.mxu1 %v7438_v29  ;;  %v7508_v29 = vld [vmem:[%s10860_s1 + $0x270] sm:$0xff]  ;;  %v7522_v39 = vld [vmem:[%s10860_s1 + $0x2e0] sm:$0xff]  ;;  %v7539_v13 = vld [vmem:[%s10860_s1 + $0x368] sm:$0xff] }
  0x38   : > { %2522 = vmatpush.bf16.msra.mxu2 %v7446_v30  ;;  %v7516_v30 = vld [vmem:[%s10860_s1 + $0x2b0] sm:$0xff]  ;;  %v7547_v14 = vld [vmem:[%s10860_s1 + $0x3a8] sm:$0xff]  ;;  %v7530_v16 = vld [vmem:[%s10860_s1 + $0x320] sm:$0xff] }
  0x39   : > { %2536 = vmatpush.bf16.msra.mxu3 %v7454_v40  ;;  %2495 = vmatmul.bf16.vlgmr.msra.gmra.mxu0 %v441_v41  ;;  %v7497_v40 = vld [vmem:[%s10860_s1 + $0x218] sm:$0xff]  ;;  %v7496_v44 = vld [vmem:[%s10860_s1 + $0x210] sm:$0xff]  ;;  %v7555_v15 = vld [vmem:[%s10860_s1 + $0x3e8] sm:$0xff] }
  0x3a   : > { %2543 = vmatpush.bf16.msrb.mxu0 %v7469_v31  ;;  %2509 = vmatmul.bf16.vlgmr.msra.gmra.mxu1 %v442_v47  ;;  %v7524_v31 = vld [vmem:[%s10860_s1 + $0x2f0] sm:$0xff]  ;;  %v7505_v41 = vld [vmem:[%s10860_s1 + $0x258] sm:$0xff]  ;;  %v7546_v18 = vld [vmem:[%s10860_s1 + $0x3a0] sm:$0xff] }
  0x3b   : > { %2557 = vmatpush.bf16.msrb.mxu1 %v7477_v34  ;;  %2523 = vmatmul.bf16.vlgmr.msra.gmra.mxu2 %v443_v43  ;;  %v7515_v34 = vld [vmem:[%s10860_s1 + $0x2a8] sm:$0xff]  ;;  %v7521_v43 = vld [vmem:[%s10860_s1 + $0x2d8] sm:$0xff]  ;;  %v7504_v45 = vld [vmem:[%s10860_s1 + $0x250] sm:$0xff] }
  0x3c   : > { %2571 = vmatpush.bf16.msrb.mxu2 %v7485_v37  ;;  %2537 = vmatmul.bf16.vlgmr.msra.gmra.mxu3 %v444_v50  ;;  %v7506_v37 = vld [vmem:[%s10860_s1 + $0x260] sm:$0xff]  ;;  %v7520_v47 = vld [vmem:[%s10860_s1 + $0x2d0] sm:$0xff]  ;;  %v7511_v50 = vld [vmem:[%s10860_s1 + $0x288] sm:$0xff] }
  0x3d   : > { %2585 = vmatpush.bf16.msrb.mxu3 %v7493_v42  ;;  %v7513_v42 = vld [vmem:[%s10860_s1 + $0x298] sm:$0xff]  ;;  %v7554_v19 = vld [vmem:[%s10860_s1 + $0x3e0] sm:$0xff] }
  0x3e   : > { %2544 = vmatpush.bf16.msrb.mxu0 %v7468_v46  ;;  %v7512_v46 = vld [vmem:[%s10860_s1 + $0x290] sm:$0xff]  ;;  %v7537_v21 = vld [vmem:[%s10860_s1 + $0x358] sm:$0xff] }
  0x3f   : > { %2558 = vmatpush.bf16.msrb.mxu1 %v7476_v48  ;;  %v7495_v48 = vld [vmem:[%s10860_s1 + $0x208] sm:$0xff]  ;;  %v7545_v22 = vld [vmem:[%s10860_s1 + $0x398] sm:$0xff] }
  0x40   : > { %2572 = vmatpush.bf16.msrb.mxu2 %v7484_v49  ;;  %v7503_v49 = vld [vmem:[%s10860_s1 + $0x248] sm:$0xff] }
  0x41   : > { %2586 = vmatpush.bf16.msrb.mxu3 %v7492_v51  ;;  %v7519_v51 = vld [vmem:[%s10860_s1 + $0x2c8] sm:$0xff] }
  0x42   : > { %2545 = vmatpush.bf16.msrb.mxu0 %v7467_v52  ;;  %v7494_v52 = vld [vmem:[%s10860_s1 + $0x200] sm:$0xff] }
  0x43   : > { %2559 = vmatpush.bf16.msrb.mxu1 %v7475_v53  ;;  %v7502_v53 = vld [vmem:[%s10860_s1 + $0x240] sm:$0xff] }
  0x44   : > { %2573 = vmatpush.bf16.msrb.mxu2 %v7483_v54  ;;  %v7510_v54 = vld [vmem:[%s10860_s1 + $0x280] sm:$0xff] }
  0x45   : > { %2587 = vmatpush.bf16.msrb.mxu3 %v7491_v55  ;;  %v7533_v55 = vld [vmem:[%s10860_s1 + $0x338] sm:$0xff] }
  0x46   : > { %2546 = vmatpush.bf16.msrb.mxu0 %v7466_v56  ;;  %v7541_v56 = vld [vmem:[%s10860_s1 + $0x378] sm:$0xff] }
  0x47   : > { %2560 = vmatpush.bf16.msrb.mxu1 %v7474_v57  ;;  %v385_v57 = vld [vmem:[%s8293_s22 + $0x40] sm:$0xff] }
  0x48   : > { %2574 = vmatpush.bf16.msrb.mxu2 %v7482_v58  ;;  %v417_v58 = vld [vmem:[%s8293_s22 + $0x140] sm:$0xff] }
  0x49   : > { %2588 = vmatpush.bf16.msrb.mxu3 %v7490_v59  ;;  %v387_v59 = vld [vmem:[%s8293_s22 + $0x50] sm:$0xff] }
  0x4a   : > { %2547 = vmatpush.bf16.msrb.mxu0 %v7465_v60  ;;  %v419_v60 = vld [vmem:[%s8293_s22 + $0x150] sm:$0xff] }
  0x4b   : > { %2561 = vmatpush.bf16.msrb.mxu1 %v7473_v61  ;;  %v7549_v61 = vld [vmem:[%s10860_s1 + $0x3b8] sm:$0xff] }
  0x4c   : > { %2575 = vmatpush.bf16.msrb.mxu2 %v7481_v62  ;;  %v386_v62 = vld [vmem:[%s8293_s22 + $0x48] sm:$0xff] }
  0x4d   : > { %2589 = vmatpush.bf16.msrb.mxu3 %v7489_v63  ;;  %v418_v63 = vld [vmem:[%s8293_s22 + $0x148] sm:$0xff] }
  0x4e   : > { %2548 = vmatpush.bf16.msrb.mxu0 %v7464_v0  ;;  %v7518_v0 = vld [vmem:[%s10860_s1 + $0x2c0] sm:$0xff] }
  0x4f   : > { %2562 = vmatpush.bf16.msrb.mxu1 %v7472_v1  ;;  %v388_v1 = vld [vmem:[%s8293_s22 + $0x58] sm:$0xff] }
  0x50   : > { %2576 = vmatpush.bf16.msrb.mxu2 %v7480_v2  ;;  %v420_v2 = vld [vmem:[%s8293_s22 + $0x158] sm:$0xff] }
  0x51   : > { %2590 = vmatpush.bf16.msrb.mxu3 %v7488_v3  ;;  %v449_v3 = vpack.c.bf16 %v417_v58, %v385_v57  ;;  %v7571_v57 = vld [vmem:[%s10860_s1 + $0x468] sm:$0xff] }
  0x52   : > { %2549 = vmatpush.bf16.msrb.mxu0 %v7463_v4  ;;  %v451_v4 = vpack.c.bf16 %v419_v60, %v387_v59  ;;  %v7579_v58 = vld [vmem:[%s10860_s1 + $0x4a8] sm:$0xff]  ;;  %v7562_v60 = vld [vmem:[%s10860_s1 + $0x420] sm:$0xff] }
  0x53   : > { %2563 = vmatpush.bf16.msrb.mxu1 %v7471_v5  ;;  %v7557_v5 = vld [vmem:[%s10860_s1 + $0x3f8] sm:$0xff]  ;;  %v7587_v59 = vld [vmem:[%s10860_s1 + $0x4e8] sm:$0xff] }
  0x54   : > { %2577 = vmatpush.bf16.msrb.mxu2 %v7479_v6  ;;  %v450_v6 = vpack.c.bf16 %v418_v63, %v386_v62  ;;  %v7578_v62 = vld [vmem:[%s10860_s1 + $0x4a0] sm:$0xff] }
  0x55   : > { %2591 = vmatpush.bf16.msrb.mxu3 %v7487_v7  ;;  %v452_v7 = vpack.c.bf16 %v420_v2, %v388_v1  ;;  %v7586_v63 = vld [vmem:[%s10860_s1 + $0x4e0] sm:$0xff]  ;;  %v7569_v1 = vld [vmem:[%s10860_s1 + $0x458] sm:$0xff] }
  0x56   : > { %2550 = vmatpush.bf16.msrb.mxu0 %v7462_v8  ;;  %v7532_v8 = vld [vmem:[%s10860_s1 + $0x330] sm:$0xff]  ;;  %v7577_v2 = vld [vmem:[%s10860_s1 + $0x498] sm:$0xff] }
  0x57   : > { %2564 = vmatpush.bf16.msrb.mxu1 %v7470_v9  ;;  %v7540_v9 = vld [vmem:[%s10860_s1 + $0x370] sm:$0xff] }
  0x58   : > { %2578 = vmatpush.bf16.msrb.mxu2 %v7478_v10  ;;  %v7548_v10 = vld [vmem:[%s10860_s1 + $0x3b0] sm:$0xff] }
  0x59   : > { %2592 = vmatpush.bf16.msrb.mxu3 %v7486_v20  ;;  %2551 = vmatmul.bf16.vlgmr.msrb.gmra.mxu0 %v445_v23  ;;  %v7529_v20 = vld [vmem:[%s10860_s1 + $0x318] sm:$0xff] }
  0x5a   : > { %2599 = vmatpush.bf16.msra.mxu0 %v7501_v11  ;;  %2565 = vmatmul.bf16.vlgmr.msrb.gmra.mxu1 %v446_v26  ;;  %v7556_v11 = vld [vmem:[%s10860_s1 + $0x3f0] sm:$0xff]  ;;  %v7553_v23 = vld [vmem:[%s10860_s1 + $0x3d8] sm:$0xff] }
  0x5b   : > { %2613 = vmatpush.bf16.msra.mxu1 %v7509_v12  ;;  %2579 = vmatmul.bf16.vlgmr.msrb.gmra.mxu2 %v447_v24  ;;  %v7531_v12 = vld [vmem:[%s10860_s1 + $0x328] sm:$0xff]  ;;  %v7528_v24 = vld [vmem:[%s10860_s1 + $0x310] sm:$0xff] }
  0x5c   : > { %2627 = vmatpush.bf16.msra.mxu2 %v7517_v17  ;;  %2593 = vmatmul.bf16.vlgmr.msrb.gmra.mxu3 %v448_v27  ;;  %v7538_v17 = vld [vmem:[%s10860_s1 + $0x360] sm:$0xff]  ;;  %v7544_v26 = vld [vmem:[%s10860_s1 + $0x390] sm:$0xff] }
  0x5d   : > { %2641 = vmatpush.bf16.msra.mxu3 %v7525_v25  ;;  %v7536_v25 = vld [vmem:[%s10860_s1 + $0x350] sm:$0xff] }
  0x5e   : > { %2600 = vmatpush.bf16.msra.mxu0 %v7500_v28  ;;  %v7552_v27 = vld [vmem:[%s10860_s1 + $0x3d0] sm:$0xff]  ;;  %v7527_v28 = vld [vmem:[%s10860_s1 + $0x308] sm:$0xff] }
  0x5f   : > { %2614 = vmatpush.bf16.msra.mxu1 %v7508_v29  ;;  %v7535_v29 = vld [vmem:[%s10860_s1 + $0x348] sm:$0xff] }
  0x60   : > { %2628 = vmatpush.bf16.msra.mxu2 %v7516_v30  ;;  %v7543_v30 = vld [vmem:[%s10860_s1 + $0x388] sm:$0xff] }
  0x61   : > { %2642 = vmatpush.bf16.msra.mxu3 %v7524_v31  ;;  %v7551_v31 = vld [vmem:[%s10860_s1 + $0x3c8] sm:$0xff] }
  0x62   : > { %2601 = vmatpush.bf16.msra.mxu0 %v7499_v32  ;;  %v7526_v32 = vld [vmem:[%s10860_s1 + $0x300] sm:$0xff] }
  0x63   : > { %2615 = vmatpush.bf16.msra.mxu1 %v7507_v33  ;;  %v7534_v33 = vld [vmem:[%s10860_s1 + $0x340] sm:$0xff] }
  0x64   : > { %2629 = vmatpush.bf16.msra.mxu2 %v7515_v34  ;;  %v7542_v34 = vld [vmem:[%s10860_s1 + $0x380] sm:$0xff] }
  0x65   : > { %2643 = vmatpush.bf16.msra.mxu3 %v7523_v35  ;;  %v7565_v35 = vld [vmem:[%s10860_s1 + $0x438] sm:$0xff] }
  0x66   : > { %2602 = vmatpush.bf16.msra.mxu0 %v7498_v36  ;;  %v7573_v36 = vld [vmem:[%s10860_s1 + $0x478] sm:$0xff] }
  0x67   : > { %2616 = vmatpush.bf16.msra.mxu1 %v7506_v37  ;;  %v389_v37 = vld [vmem:[%s8293_s22 + $0x60] sm:$0xff] }
  0x68   : > { %2630 = vmatpush.bf16.msra.mxu2 %v7514_v38  ;;  %v421_v38 = vld [vmem:[%s8293_s22 + $0x160] sm:$0xff] }
  0x69   : > { %2644 = vmatpush.bf16.msra.mxu3 %v7522_v39  ;;  %v391_v39 = vld [vmem:[%s8293_s22 + $0x70] sm:$0xff] }
  0x6a   : > { %2603 = vmatpush.bf16.msra.mxu0 %v7497_v40  ;;  %v423_v40 = vld [vmem:[%s8293_s22 + $0x170] sm:$0xff] }
  0x6b   : > { %2617 = vmatpush.bf16.msra.mxu1 %v7505_v41  ;;  %v7581_v41 = vld [vmem:[%s10860_s1 + $0x4b8] sm:$0xff] }
  0x6c   : > { %2631 = vmatpush.bf16.msra.mxu2 %v7513_v42  ;;  %v390_v42 = vld [vmem:[%s8293_s22 + $0x68] sm:$0xff] }
  0x6d   : > { %2645 = vmatpush.bf16.msra.mxu3 %v7521_v43  ;;  %v422_v43 = vld [vmem:[%s8293_s22 + $0x168] sm:$0xff] }
  0x6e   : > { %2604 = vmatpush.bf16.msra.mxu0 %v7496_v44  ;;  %v7550_v44 = vld [vmem:[%s10860_s1 + $0x3c0] sm:$0xff] }
  0x6f   : > { %2618 = vmatpush.bf16.msra.mxu1 %v7504_v45  ;;  %v392_v45 = vld [vmem:[%s8293_s22 + $0x78] sm:$0xff] }
  0x70   : > { %2632 = vmatpush.bf16.msra.mxu2 %v7512_v46  ;;  %v424_v46 = vld [vmem:[%s8293_s22 + $0x178] sm:$0xff] }
  0x71   : > { %2646 = vmatpush.bf16.msra.mxu3 %v7520_v47  ;;  %v453_v47 = vpack.c.bf16 %v421_v38, %v389_v37  ;;  %v8761_v37 = vld [vmem:[%s10846_s2] ss:$0 sm:$0xff]  ;;  %v7603_v38 = vld [vmem:[%s10860_s1 + $0x568] sm:$0xff] }
  0x72   : > { %2605 = vmatpush.bf16.msra.mxu0 %v7495_v48  ;;  %v455_v48 = vpack.c.bf16 %v423_v40, %v391_v39  ;;  %v7611_v39 = vld [vmem:[%s10860_s1 + $0x5a8] sm:$0xff] }
  0x73   : > { %2619 = vmatpush.bf16.msra.mxu1 %v7503_v49  ;;  %v7589_v49 = vld [vmem:[%s10860_s1 + $0x4f8] sm:$0xff]  ;;  %v7619_v40 = vld [vmem:[%s10860_s1 + $0x5e8] sm:$0xff] }
  0x74   : > { %2633 = vmatpush.bf16.msra.mxu2 %v7511_v50  ;;  %v454_v50 = vpack.c.bf16 %v422_v43, %v390_v42  ;;  %v7594_v42 = vld [vmem:[%s10860_s1 + $0x520] sm:$0xff] }
  0x75   : > { %2647 = vmatpush.bf16.msra.mxu3 %v7519_v51  ;;  %v456_v51 = vpack.c.bf16 %v424_v46, %v392_v45  ;;  %v7610_v45 = vld [vmem:[%s10860_s1 + $0x5a0] sm:$0xff] }
  0x76   : > { %2606 = vmatpush.bf16.msra.mxu0 %v7494_v52  ;;  %v7564_v52 = vld [vmem:[%s10860_s1 + $0x430] sm:$0xff] }
  0x77   : > { %2620 = vmatpush.bf16.msra.mxu1 %v7502_v53  ;;  %v7572_v53 = vld [vmem:[%s10860_s1 + $0x470] sm:$0xff] }
  0x78   : > { %2634 = vmatpush.bf16.msra.mxu2 %v7510_v54  ;;  %v7580_v54 = vld [vmem:[%s10860_s1 + $0x4b0] sm:$0xff] }
  0x79   : > { %2648 = vmatpush.bf16.msra.mxu3 %v7518_v0  ;;  %2607 = vmatmul.bf16.vlgmr.msra.gmra.mxu0 %v449_v3  ;;  %v7561_v0 = vld [vmem:[%s10860_s1 + $0x418] sm:$0xff] }
  0x7a   : > { %2655 = vmatpush.bf16.msrb.mxu0 %v7533_v55  ;;  %2621 = vmatmul.bf16.vlgmr.msra.gmra.mxu1 %v450_v6  ;;  %v7588_v55 = vld [vmem:[%s10860_s1 + $0x4f0] sm:$0xff]  ;;  %v7585_v3 = vld [vmem:[%s10860_s1 + $0x4d8] sm:$0xff] }
  0x7b   : > { %2669 = vmatpush.bf16.msrb.mxu1 %v7541_v56  ;;  %2635 = vmatmul.bf16.vlgmr.msra.gmra.mxu2 %v451_v4  ;;  %v7563_v56 = vld [vmem:[%s10860_s1 + $0x428] sm:$0xff]  ;;  %v7560_v4 = vld [vmem:[%s10860_s1 + $0x410] sm:$0xff] }
  0x7c   : > { %2683 = vmatpush.bf16.msrb.mxu2 %v7549_v61  ;;  %2649 = vmatmul.bf16.vlgmr.msra.gmra.mxu3 %v452_v7  ;;  %v7570_v61 = vld [vmem:[%s10860_s1 + $0x460] sm:$0xff]  ;;  %v7576_v6 = vld [vmem:[%s10860_s1 + $0x490] sm:$0xff] }
  0x7d   : > { %2697 = vmatpush.bf16.msrb.mxu3 %v7557_v5  ;;  %v7568_v5 = vld [vmem:[%s10860_s1 + $0x450] sm:$0xff] }
  0x7e   : > { %2656 = vmatpush.bf16.msrb.mxu0 %v7532_v8  ;;  %v7584_v7 = vld [vmem:[%s10860_s1 + $0x4d0] sm:$0xff]  ;;  %v7559_v8 = vld [vmem:[%s10860_s1 + $0x408] sm:$0xff] }
  0x7f   : > { %2670 = vmatpush.bf16.msrb.mxu1 %v7540_v9  ;;  %v7567_v9 = vld [vmem:[%s10860_s1 + $0x448] sm:$0xff] }
  0x80   : > { %2684 = vmatpush.bf16.msrb.mxu2 %v7548_v10  ;;  %v7575_v10 = vld [vmem:[%s10860_s1 + $0x488] sm:$0xff] }
  0x81   : > { %2698 = vmatpush.bf16.msrb.mxu3 %v7556_v11  ;;  %v7583_v11 = vld [vmem:[%s10860_s1 + $0x4c8] sm:$0xff] }
  0x82   : > { %2657 = vmatpush.bf16.msrb.mxu0 %v7531_v12  ;;  %v7558_v12 = vld [vmem:[%s10860_s1 + $0x400] sm:$0xff] }
  0x83   : > { %2671 = vmatpush.bf16.msrb.mxu1 %v7539_v13  ;;  %v7566_v13 = vld [vmem:[%s10860_s1 + $0x440] sm:$0xff] }
  0x84   : > { %2685 = vmatpush.bf16.msrb.mxu2 %v7547_v14  ;;  %v7574_v14 = vld [vmem:[%s10860_s1 + $0x480] sm:$0xff] }
  0x85   : > { %2699 = vmatpush.bf16.msrb.mxu3 %v7555_v15  ;;  %v7597_v15 = vld [vmem:[%s10860_s1 + $0x538] sm:$0xff] }
  0x86   : > { %2658 = vmatpush.bf16.msrb.mxu0 %v7530_v16  ;;  %v7605_v16 = vld [vmem:[%s10860_s1 + $0x578] sm:$0xff] }
  0x87   : > { %2672 = vmatpush.bf16.msrb.mxu1 %v7538_v17  ;;  %v393_v17 = vld [vmem:[%s8293_s22 + $0x80] sm:$0xff] }
  0x88   : > { %2686 = vmatpush.bf16.msrb.mxu2 %v7546_v18  ;;  %v425_v18 = vld [vmem:[%s8293_s22 + $0x180] sm:$0xff] }
  0x89   : > { %2700 = vmatpush.bf16.msrb.mxu3 %v7554_v19  ;;  %v395_v19 = vld [vmem:[%s8293_s22 + $0x90] sm:$0xff] }
  0x8a   : > { %2659 = vmatpush.bf16.msrb.mxu0 %v7529_v20  ;;  %v427_v20 = vld [vmem:[%s8293_s22 + $0x190] sm:$0xff] }
  0x8b   : > { %2673 = vmatpush.bf16.msrb.mxu1 %v7537_v21  ;;  %v7613_v21 = vld [vmem:[%s10860_s1 + $0x5b8] sm:$0xff] }
  0x8c   : > { %2687 = vmatpush.bf16.msrb.mxu2 %v7545_v22  ;;  %v394_v22 = vld [vmem:[%s8293_s22 + $0x88] sm:$0xff] }
  0x8d   : > { %2701 = vmatpush.bf16.msrb.mxu3 %v7553_v23  ;;  %v426_v23 = vld [vmem:[%s8293_s22 + $0x188] sm:$0xff] }
  0x8e   : > { %2660 = vmatpush.bf16.msrb.mxu0 %v7528_v24  ;;  %v7582_v24 = vld [vmem:[%s10860_s1 + $0x4c0] sm:$0xff] }
  0x8f   : > { %2674 = vmatpush.bf16.msrb.mxu1 %v7536_v25  ;;  %v396_v25 = vld [vmem:[%s8293_s22 + $0x98] sm:$0xff] }
  0x90   : > { %2688 = vmatpush.bf16.msrb.mxu2 %v7544_v26  ;;  %v428_v26 = vld [vmem:[%s8293_s22 + $0x198] sm:$0xff] }
  0x91   : > { %2702 = vmatpush.bf16.msrb.mxu3 %v7552_v27  ;;  %v457_v27 = vpack.c.bf16 %v425_v18, %v393_v17  ;;  %v7653_v18 = vld [vmem:[%s10860_s1 + $0x6f8] sm:$0xff] }
  0x92   : > { %2661 = vmatpush.bf16.msrb.mxu0 %v7527_v28  ;;  %v459_v28 = vpack.c.bf16 %v427_v20, %v395_v19 }
  0x93   : > { %2675 = vmatpush.bf16.msrb.mxu1 %v7535_v29  ;;  %v7621_v29 = vld [vmem:[%s10860_s1 + $0x5f8] sm:$0xff] }
  0x94   : > { %2689 = vmatpush.bf16.msrb.mxu2 %v7543_v30  ;;  %v458_v30 = vpack.c.bf16 %v426_v23, %v394_v22  ;;  %v7636_v22 = vld [vmem:[%s10860_s1 + $0x670] sm:$0xff] }
  0x95   : > { %2703 = vmatpush.bf16.msrb.mxu3 %v7551_v31  ;;  %v460_v31 = vpack.c.bf16 %v428_v26, %v396_v25  ;;  %v7644_v23 = vld [vmem:[%s10860_s1 + $0x6b0] sm:$0xff]  ;;  %v7627_v25 = vld [vmem:[%s10860_s1 + $0x628] sm:$0xff] }
  0x96   : > { %2662 = vmatpush.bf16.msrb.mxu0 %v7526_v32  ;;  %v7596_v32 = vld [vmem:[%s10860_s1 + $0x530] sm:$0xff]  ;;  %v7635_v26 = vld [vmem:[%s10860_s1 + $0x668] sm:$0xff] }
  0x97   : > { %2676 = vmatpush.bf16.msrb.mxu1 %v7534_v33  ;;  %v7604_v33 = vld [vmem:[%s10860_s1 + $0x570] sm:$0xff] }
  0x98   : > { %2690 = vmatpush.bf16.msrb.mxu2 %v7542_v34  ;;  %v7612_v34 = vld [vmem:[%s10860_s1 + $0x5b0] sm:$0xff] }
  0x99   : > { %2704 = vmatpush.bf16.msrb.mxu3 %v7550_v44  ;;  %2663 = vmatmul.bf16.vlgmr.msrb.gmra.mxu0 %v453_v47  ;;  %v7602_v44 = vld [vmem:[%s10860_s1 + $0x560] sm:$0xff] }
  0x9a   : > { %2711 = vmatpush.bf16.msra.mxu0 %v7565_v35  ;;  %2677 = vmatmul.bf16.vlgmr.msrb.gmra.mxu1 %v454_v50  ;;  %v7620_v35 = vld [vmem:[%s10860_s1 + $0x5f0] sm:$0xff]  ;;  %v7601_v50 = vld [vmem:[%s10860_s1 + $0x558] sm:$0xff] }
  0x9b   : > { %2725 = vmatpush.bf16.msra.mxu1 %v7573_v36  ;;  %2691 = vmatmul.bf16.vlgmr.msrb.gmra.mxu2 %v455_v48  ;;  %v7595_v36 = vld [vmem:[%s10860_s1 + $0x528] sm:$0xff]  ;;  %v7618_v48 = vld [vmem:[%s10860_s1 + $0x5e0] sm:$0xff] }
  0x9c   : > { %2739 = vmatpush.bf16.msra.mxu2 %v7581_v41  ;;  %2705 = vmatmul.bf16.vlgmr.msrb.gmra.mxu3 %v456_v51  ;;  %v7609_v51 = vld [vmem:[%s10860_s1 + $0x598] sm:$0xff] }
  0x9d   : > { %2753 = vmatpush.bf16.msra.mxu3 %v7589_v49  ;;  %v7593_v49 = vld [vmem:[%s10860_s1 + $0x518] sm:$0xff] }
  0x9e   : > { %2712 = vmatpush.bf16.msra.mxu0 %v7564_v52 }
  0x9f   : > { %2726 = vmatpush.bf16.msra.mxu1 %v7572_v53  ;;  %v7617_v53 = vld [vmem:[%s10860_s1 + $0x5d8] sm:$0xff] }
  0xa0   : > { %2740 = vmatpush.bf16.msra.mxu2 %v7580_v54 }
  0xa1   : > { %2754 = vmatpush.bf16.msra.mxu3 %v7588_v55  ;;  %v7592_v55 = vld [vmem:[%s10860_s1 + $0x510] sm:$0xff] }
  0xa2   : > { %2713 = vmatpush.bf16.msra.mxu0 %v7563_v56  ;;  %v7600_v56 = vld [vmem:[%s10860_s1 + $0x550] sm:$0xff] }
  0xa3   : > { %2727 = vmatpush.bf16.msra.mxu1 %v7571_v57  ;;  %v7608_v57 = vld [vmem:[%s10860_s1 + $0x590] sm:$0xff] }
  0xa4   : > { %2741 = vmatpush.bf16.msra.mxu2 %v7579_v58 }
  0xa5   : > { %2755 = vmatpush.bf16.msra.mxu3 %v7587_v59 }
  0xa6   : > { %2714 = vmatpush.bf16.msra.mxu0 %v7562_v60  ;;  %v7616_v60 = vld [vmem:[%s10860_s1 + $0x5d0] sm:$0xff] }
  0xa7   : > { %2728 = vmatpush.bf16.msra.mxu1 %v7570_v61  ;;  %v7591_v61 = vld [vmem:[%s10860_s1 + $0x508] sm:$0xff] }
  0xa8   : > { %2742 = vmatpush.bf16.msra.mxu2 %v7578_v62  ;;  %v7599_v62 = vld [vmem:[%s10860_s1 + $0x548] sm:$0xff] }
  0xa9   : > { %2756 = vmatpush.bf16.msra.mxu3 %v7586_v63  ;;  %v7607_v63 = vld [vmem:[%s10860_s1 + $0x588] sm:$0xff] }
  0xaa   : > { %2715 = vmatpush.bf16.msra.mxu0 %v7561_v0  ;;  %v7615_v0 = vld [vmem:[%s10860_s1 + $0x5c8] sm:$0xff] }
  0xab   : > { %2729 = vmatpush.bf16.msra.mxu1 %v7569_v1  ;;  %v7590_v1 = vld [vmem:[%s10860_s1 + $0x500] sm:$0xff] }
  0xac   : > { %2743 = vmatpush.bf16.msra.mxu2 %v7577_v2  ;;  %v7598_v2 = vld [vmem:[%s10860_s1 + $0x540] sm:$0xff] }
  0xad   : > { %2757 = vmatpush.bf16.msra.mxu3 %v7585_v3  ;;  %v7606_v3 = vld [vmem:[%s10860_s1 + $0x580] sm:$0xff] }
  0xae   : > { %2716 = vmatpush.bf16.msra.mxu0 %v7560_v4  ;;  %v7629_v4 = vld [vmem:[%s10860_s1 + $0x638] sm:$0xff] }
  0xaf   : > { %2730 = vmatpush.bf16.msra.mxu1 %v7568_v5  ;;  %v7637_v5 = vld [vmem:[%s10860_s1 + $0x678] sm:$0xff] }
  0xb0   : > { %2744 = vmatpush.bf16.msra.mxu2 %v7576_v6  ;;  %v397_v6 = vld [vmem:[%s8293_s22 + $0xa0] sm:$0xff] }
  0xb1   : > { %2758 = vmatpush.bf16.msra.mxu3 %v7584_v7  ;;  %v429_v7 = vld [vmem:[%s8293_s22 + $0x1a0] sm:$0xff] }
  0xb2   : > { %2717 = vmatpush.bf16.msra.mxu0 %v7559_v8  ;;  %v399_v8 = vld [vmem:[%s8293_s22 + $0xb0] sm:$0xff] }
  0xb3   : > { %2731 = vmatpush.bf16.msra.mxu1 %v7567_v9  ;;  %v431_v9 = vld [vmem:[%s8293_s22 + $0x1b0] sm:$0xff] }
  0xb4   : > { %2745 = vmatpush.bf16.msra.mxu2 %v7575_v10  ;;  %v7645_v10 = vld [vmem:[%s10860_s1 + $0x6b8] sm:$0xff]  ;;  %v463_v17 = vpack.c.bf16 %v431_v9, %v399_v8  ;;  %v7660_v9 = vld [vmem:[%s10860_s1 + $0x730] sm:$0xff] }
  0xb5   : > { %2759 = vmatpush.bf16.msra.mxu3 %v7583_v11  ;;  %v398_v11 = vld [vmem:[%s8293_s22 + $0xa8] sm:$0xff] }
  0xb6   : > { %2718 = vmatpush.bf16.msra.mxu0 %v7558_v12  ;;  %v2496_v41 = vpop.f32.mrf.mxu0  ;;  %v430_v12 = vld [vmem:[%s8293_s22 + $0x1a8] sm:$0xff] }
  0xb7   : > { %2732 = vmatpush.bf16.msra.mxu1 %v7566_v13  ;;  %v2497_v43 = vadd.f32 %v8761_v37, %v2496_v41  ;;  %v2510_v46 = vpop.f32.mrf.mxu1  ;;  %v7614_v13 = vld [vmem:[%s10860_s1 + $0x5c0] sm:$0xff]  ;;  %v462_v19 = vpack.c.bf16 %v430_v12, %v398_v11  ;;  %v7648_v41 = vld [vmem:[%s10860_s1 + $0x6d0] sm:$0xff] }
  0xb8   : > { %2746 = vmatpush.bf16.msra.mxu2 %v7574_v14  ;;  %v400_v14 = vld [vmem:[%s8293_s22 + $0xb8] sm:$0xff]  ;;  %v7676_v11 = vld [vmem:[%s10860_s1 + $0x7b0] sm:$0xff]  ;;  %v7678_v12 = vld [vmem:[%s10860_s1 + $0x7c0] sm:$0xff] }
  0xb9   : > { %2760 = vmatpush.bf16.msra.mxu3 %v7582_v24  ;;  %2719 = vmatmul.bf16.vlgmr.msra.gmra.mxu0 %v457_v27  ;;  %v2511_v47 = vadd.f32 %v2510_v46, %v2497_v43  ;;  %v7652_v24 = vld [vmem:[%s10860_s1 + $0x6f0] sm:$0xff]  ;;  %v7643_v27 = vld [vmem:[%s10860_s1 + $0x6a8] sm:$0xff] }
  0xba   : > { %2767 = vmatpush.bf16.msrb.mxu0 %v7597_v15  ;;  %2733 = vmatmul.bf16.vlgmr.msra.gmra.mxu1 %v458_v30  ;;  %v432_v15 = vld [vmem:[%s8293_s22 + $0x1b8] sm:$0xff]  ;;  %v7634_v30 = vld [vmem:[%s10860_s1 + $0x660] sm:$0xff]  ;;  %v7631_v43 = vld [vmem:[%s10860_s1 + $0x648] sm:$0xff] }
  0xbb   : > { %2781 = vmatpush.bf16.msrb.mxu1 %v7605_v16  ;;  %2747 = vmatmul.bf16.vlgmr.msra.gmra.mxu2 %v459_v28  ;;  %v461_v16 = vpack.c.bf16 %v429_v7, %v397_v6  ;;  %v464_v20 = vpack.c.bf16 %v432_v15, %v400_v14  ;;  %v7651_v28 = vld [vmem:[%s10860_s1 + $0x6e8] sm:$0xff] }
  0xbc   : > { %2795 = vmatpush.bf16.msrb.mxu2 %v7613_v21  ;;  %2761 = vmatmul.bf16.vlgmr.msra.gmra.mxu3 %v460_v31  ;;  %v7628_v21 = vld [vmem:[%s10860_s1 + $0x630] sm:$0xff]  ;;  %v7642_v31 = vld [vmem:[%s10860_s1 + $0x6a0] sm:$0xff]  ;;  %v6344_v46 = vld [vmem:[%s10860_s1 + $0x7c8] sm:$0xf] }
  0xbd   : > { %2809 = vmatpush.bf16.msrb.mxu3 %v7621_v29  ;;  %v7626_v29 = vld [vmem:[%s10860_s1 + $0x620] sm:$0xff]  ;;  %v7667_v14 = vld [vmem:[%s10860_s1 + $0x768] sm:$0xff] }
  0xbe   : > { %2768 = vmatpush.bf16.msrb.mxu0 %v7596_v32  ;;  %v2524_v52 = vpop.f32.mrf.mxu2  ;;  %v7650_v32 = vld [vmem:[%s10860_s1 + $0x6e0] sm:$0xff]  ;;  %v7675_v15 = vld [vmem:[%s10860_s1 + $0x7a8] sm:$0xff] }
  0xbf   : > { %2782 = vmatpush.bf16.msrb.mxu1 %v7604_v33  ;;  %v2525_v54 = vadd.f32 %v2524_v52, %v2511_v47  ;;  %v2538_v58 = vpop.f32.mrf.mxu3  ;;  %v7625_v33 = vld [vmem:[%s10860_s1 + $0x618] sm:$0xff]  ;;  %v7679_v47 = vld [vmem:[%s10860_s1 + $0x7c8] sm:$0x30] }
  0xc0   : > { %2796 = vmatpush.bf16.msrb.mxu2 %v7612_v34  ;;  %v7633_v34 = vld [vmem:[%s10860_s1 + $0x658] sm:$0xff] }
  0xc1   : > { %2810 = vmatpush.bf16.msrb.mxu3 %v7620_v35  ;;  %v8806_v59 = vadd.f32 %v2538_v58, %v2525_v54  ;;  %v7641_v35 = vld [vmem:[%s10860_s1 + $0x698] sm:$0xff]  ;;  %v435_v58 = vld [vmem:[%s8293_s22 + $0x1d0] sm:$0xff] }
  0xc2   : > { %2769 = vmatpush.bf16.msrb.mxu0 %v7595_v36  ;;  %v7649_v36 = vld [vmem:[%s10860_s1 + $0x6d8] sm:$0xff] }
  0xc3   : > { %2783 = vmatpush.bf16.msrb.mxu1 %v7603_v38  ;;  %v7624_v38 = vld [vmem:[%s10860_s1 + $0x610] sm:$0xff]  ;;  %v7669_v54 = vld [vmem:[%s10860_s1 + $0x778] sm:$0xff] }
  0xc4   : > { %2797 = vmatpush.bf16.msrb.mxu2 %v7611_v39  ;;  %v7632_v39 = vld [vmem:[%s10860_s1 + $0x650] sm:$0xff] }
  0xc5   : > { %2811 = vmatpush.bf16.msrb.mxu3 %v7619_v40  ;;  %v7640_v40 = vld [vmem:[%s10860_s1 + $0x690] sm:$0xff] }
  0xc6   : > { %2770 = vmatpush.bf16.msrb.mxu0 %v7594_v42  ;;  %v7623_v42 = vld [vmem:[%s10860_s1 + $0x608] sm:$0xff] }
  0xc7   : > { %2784 = vmatpush.bf16.msrb.mxu1 %v7602_v44  ;;  %v7639_v44 = vld [vmem:[%s10860_s1 + $0x688] sm:$0xff] }
  0xc8   : > { %2798 = vmatpush.bf16.msrb.mxu2 %v7610_v45  ;;  %v7647_v45 = vld [vmem:[%s10860_s1 + $0x6c8] sm:$0xff] }
  0xc9   : > { %2812 = vmatpush.bf16.msrb.mxu3 %v7618_v48  ;;  %v7622_v48 = vld [vmem:[%s10860_s1 + $0x600] sm:$0xff] }
  0xca   : > { %2771 = vmatpush.bf16.msrb.mxu0 %v7593_v49  ;;  %v7630_v49 = vld [vmem:[%s10860_s1 + $0x640] sm:$0xff] }
  0xcb   : > { %2785 = vmatpush.bf16.msrb.mxu1 %v7601_v50  ;;  %v7638_v50 = vld [vmem:[%s10860_s1 + $0x680] sm:$0xff] }
  0xcc   : > { %2799 = vmatpush.bf16.msrb.mxu2 %v7609_v51  ;;  %v8098_v51 = vmov 65535  }
  0xcd   : > { %2813 = vmatpush.bf16.msrb.mxu3 %v7617_v53  ;;  %v2482_v52 = vsel %vm2480_vm0, 4294967295, %v8098_v51  ;;  %v7661_v53 = vld [vmem:[%s10860_s1 + $0x738] sm:$0xff] }
  0xce   : > { %2772 = vmatpush.bf16.msrb.mxu0 %v7592_v55  ;;  %v401_v55 = vld [vmem:[%s8293_s22 + $0xc0] sm:$0xff] }
  0xcf   : > { %2786 = vmatpush.bf16.msrb.mxu1 %v7600_v56  ;;  %v433_v56 = vld [vmem:[%s8293_s22 + $0x1c0] sm:$0xff] }
  0xd0   : > { %2800 = vmatpush.bf16.msrb.mxu2 %v7608_v57  ;;  %v403_v57 = vld [vmem:[%s8293_s22 + $0xd0] sm:$0xff] }
  0xd1   : > { %2814 = vmatpush.bf16.msrb.mxu3 %v7616_v60  ;;  %v6345_v60 = vor.u32 %v7679_v47, %v6344_v46  ;;  %v2526_v46 = vpop.f32.mrf.mxu2  ;;  %v2540_v47 = vpop.f32.mrf.mxu3 }
  0xd2   : > { %2773 = vmatpush.bf16.msrb.mxu0 %v7591_v61  ;;  %v7677_v61 = vld [vmem:[%s10860_s1 + $0x7b8] sm:$0xff] }
  0xd3   : > { %2787 = vmatpush.bf16.msrb.mxu1 %v7599_v62  ;;  %v402_v62 = vld [vmem:[%s8293_s22 + $0xc8] sm:$0xff] }
  0xd4   : > { %2801 = vmatpush.bf16.msrb.mxu2 %v7607_v63  ;;  %v434_v63 = vld [vmem:[%s8293_s22 + $0x1c8] sm:$0xff] }
  0xd5   : > { %2815 = vmatpush.bf16.msrb.mxu3 %v7615_v0  ;;  %v2483_v0 = vsel %vm2481_vm1, %v2482_v52, 0  ;;  %v466_v6 = vpack.c.bf16 %v434_v63, %v402_v62 }
  0xd6   : > { %2774 = vmatpush.bf16.msrb.mxu0 %v7590_v1  ;;  %v7646_v1 = vld [vmem:[%s10860_s1 + $0x6c0] sm:$0xff]  ;;  %v2485_v7 = vand.u32 %v6345_v60, %v2483_v0 }
  0xd7   : > { %2788 = vmatpush.bf16.msrb.mxu1 %v7598_v2  ;;  %v404_v2 = vld [vmem:[%s8293_s22 + $0xd8] sm:$0xff] }
  0xd8   : > { %2802 = vmatpush.bf16.msrb.mxu2 %v7606_v3  ;;  %v436_v3 = vld [vmem:[%s8293_s22 + $0x1d8] sm:$0xff] }
  0xd9   : > { %2816 = vmatpush.bf16.msrb.mxu3 %v7614_v13  ;;  %2775 = vmatmul.bf16.vlgmr.msrb.gmra.mxu0 %v461_v16  ;;  %v468_v8 = vpack.c.bf16 %v436_v3, %v404_v2  ;;  %v7659_v13 = vld [vmem:[%s10860_s1 + $0x728] sm:$0xff]  ;;  %v7658_v16 = vld [vmem:[%s10860_s1 + $0x720] sm:$0xff] }
  0xda   : > { %2823 = vmatpush.bf16.msra.mxu0 %v7629_v4  ;;  %2789 = vmatmul.bf16.vlgmr.msrb.gmra.mxu1 %v462_v19  ;;  %v465_v4 = vpack.c.bf16 %v433_v56, %v401_v55  ;;  %v7657_v19 = vld [vmem:[%s10860_s1 + $0x718] sm:$0xff] }
  0xdb   : > { %2837 = vmatpush.bf16.msra.mxu1 %v7637_v5  ;;  %2803 = vmatmul.bf16.vlgmr.msrb.gmra.mxu2 %v463_v17  ;;  %v467_v5 = vpack.c.bf16 %v435_v58, %v403_v57  ;;  %v7666_v17 = vld [vmem:[%s10860_s1 + $0x760] sm:$0xff] }
  0xdc   : > { %2851 = vmatpush.bf16.msra.mxu2 %v7645_v10  ;;  %2817 = vmatmul.bf16.vlgmr.msrb.gmra.mxu3 %v464_v20  ;;  %v7668_v10 = vld [vmem:[%s10860_s1 + $0x770] sm:$0xff]  ;;  %v7665_v20 = vld [vmem:[%s10860_s1 + $0x758] sm:$0xff] }
  0xdd   : > { %2865 = vmatpush.bf16.msra.mxu3 %v7653_v18  ;;  %v7674_v18 = vld [vmem:[%s10860_s1 + $0x7a0] sm:$0xff] }
  0xde   : > { %2824 = vmatpush.bf16.msra.mxu0 %v7628_v21  ;;  %v7673_v21 = vld [vmem:[%s10860_s1 + $0x798] sm:$0xff] }
  0xdf   : > { %2838 = vmatpush.bf16.msra.mxu1 %v7636_v22  ;;  %v408_v22 = vld [vmem:[%s8293_s22 + $0xf8] sm:$0xff]  ;;  %v2594_v51 = vpop.f32.mrf.mxu3 }
  0xe0   : > { %2852 = vmatpush.bf16.msra.mxu2 %v7644_v23  ;;  %v440_v23 = vld [vmem:[%s8293_s22 + $0x1f8] sm:$0xff] }
  0xe1   : > { %2866 = vmatpush.bf16.msra.mxu3 %v7652_v24  ;;  %v7656_v24 = vld [vmem:[%s10860_s1 + $0x710] sm:$0xff] }
  0xe2   : > { %2825 = vmatpush.bf16.msra.mxu0 %v7627_v25  ;;  %v472_v25 = vpack.c.bf16 %v440_v23, %v408_v22 }
  0xe3   : > { %2839 = vmatpush.bf16.msra.mxu1 %v7635_v26  ;;  %v7664_v26 = vld [vmem:[%s10860_s1 + $0x750] sm:$0xff] }
  0xe4   : > { %2853 = vmatpush.bf16.msra.mxu2 %v7643_v27  ;;  %v7672_v27 = vld [vmem:[%s10860_s1 + $0x790] sm:$0xff] }
  0xe5   : > { %2867 = vmatpush.bf16.msra.mxu3 %v7651_v28  ;;  %v7655_v28 = vld [vmem:[%s10860_s1 + $0x708] sm:$0xff] }
  0xe6   : > { %2826 = vmatpush.bf16.msra.mxu0 %v7626_v29  ;;  %v7663_v29 = vld [vmem:[%s10860_s1 + $0x748] sm:$0xff] }
  0xe7   : > { %2840 = vmatpush.bf16.msra.mxu1 %v7634_v30  ;;  %v7671_v30 = vld [vmem:[%s10860_s1 + $0x788] sm:$0xff]  ;;  %v2596_v55 = vpop.f32.mrf.mxu3 }
  0xe8   : > { %2854 = vmatpush.bf16.msra.mxu2 %v7642_v31  ;;  %v7654_v31 = vld [vmem:[%s10860_s1 + $0x700] sm:$0xff] }
  0xe9   : > { %2868 = vmatpush.bf16.msra.mxu3 %v7650_v32  ;;  %v7662_v32 = vld [vmem:[%s10860_s1 + $0x740] sm:$0xff] }
  0xea   : > { %2827 = vmatpush.bf16.msra.mxu0 %v7625_v33  ;;  %v7670_v33 = vld [vmem:[%s10860_s1 + $0x780] sm:$0xff]  ;;  %s5239_s1 = sshll.u32 %s9248_s0, 4  ;;  %s10761_s1 = int_to_ptr.vmem [resolvable:$true] %s5239_s1 }
  0xeb   : > { %2841 = vmatpush.bf16.msra.mxu1 %v7633_v34  ;;  %v405_v34 = vld [vmem:[%s8293_s22 + $0xe0] sm:$0xff] }
  0xec   : > { %2855 = vmatpush.bf16.msra.mxu2 %v7641_v35  ;;  %v437_v35 = vld [vmem:[%s8293_s22 + $0x1e0] sm:$0xff] }
  0xed   : > { %2869 = vmatpush.bf16.msra.mxu3 %v7649_v36  ;;  %v406_v36 = vld [vmem:[%s8293_s22 + $0xe8] sm:$0xff] }
  0xee   : > { %2828 = vmatpush.bf16.msra.mxu0 %v7624_v38  ;;  %v438_v38 = vld [vmem:[%s8293_s22 + $0x1e8] sm:$0xff] }
  0xef   : > { %2842 = vmatpush.bf16.msra.mxu1 %v7632_v39  ;;  %v407_v39 = vld [vmem:[%s8293_s22 + $0xf0] sm:$0xff] }
  0xf0   : > { %2856 = vmatpush.bf16.msra.mxu2 %v7640_v40  ;;  %v439_v40 = vld [vmem:[%s8293_s22 + $0x1f0] sm:$0xff] }
  0xf1   : > { %2870 = vmatpush.bf16.msra.mxu3 %v7648_v41  ;;  %v469_v41 = vpack.c.bf16 %v437_v35, %v405_v34 }
  0xf2   : > { %2829 = vmatpush.bf16.msra.mxu0 %v7623_v42  ;;  %v470_v42 = vpack.c.bf16 %v438_v38, %v406_v36 }
  0xf3   : > { %2843 = vmatpush.bf16.msra.mxu1 %v7631_v43  ;;  %v471_v43 = vpack.c.bf16 %v439_v40, %v407_v39 }
  0xf4   : > { %2857 = vmatpush.bf16.msra.mxu2 %v7639_v44  ;;  %v2498_v44 = vpop.f32.mrf.mxu0 }
  0xf5   : > { %2871 = vmatpush.bf16.msra.mxu3 %v7647_v45  ;;  %v2512_v45 = vpop.f32.mrf.mxu1  ;;  %v2499_v62 = vadd.f32 %v8761_v37, %v2498_v44 }
  0xf6   : > { %2830 = vmatpush.bf16.msra.mxu0 %v7622_v48 }
  0xf7   : > { %2844 = vmatpush.bf16.msra.mxu1 %v7630_v49  ;;  %v2513_v0 = vadd.f32 %v2512_v45, %v2499_v62  ;;  %v7685_v45 = vld [vmem:[%s10847_s3 + $0x28] sm:$0xff] }
  0xf8   : > { %2858 = vmatpush.bf16.msra.mxu2 %v7638_v50  ;;  %v2580_v50 = vpop.f32.mrf.mxu2 }
  0xf9   : > { %2872 = vmatpush.bf16.msra.mxu3 %v7646_v1  ;;  %2831 = vmatmul.bf16.vlgmr.msra.gmra.mxu0 %v465_v4  ;;  %v2527_v4 = vadd.f32 %v2526_v46, %v2513_v0 }
  0xfa   : > { %2879 = vmatpush.bf16.msrb.mxu0 %v7661_v53  ;;  %2845 = vmatmul.bf16.vlgmr.msra.gmra.mxu1 %v466_v6 }
  0xfb   : > { %2893 = vmatpush.bf16.msrb.mxu1 %v7669_v54  ;;  %2859 = vmatmul.bf16.vlgmr.msra.gmra.mxu2 %v467_v5 }
  0xfc   : > { %2907 = vmatpush.bf16.msrb.mxu2 %v7677_v61  ;;  %2873 = vmatmul.bf16.vlgmr.msra.gmra.mxu3 %v468_v8  ;;  %v2552_v48 = vpop.f32.mrf.mxu0 }
  0xfd   : > { %2927 = vmatpush.bf16.msrb.mxu3 %v2485_v7  ;;  %v2566_v49 = vpop.f32.mrf.mxu1  ;;  %v2553_v6 = vadd.f32 %v2552_v48, %v8806_v59  ;;  %v2541_v7 = vadd.f32 %v2540_v47, %v2527_v4  ;;  %v7681_v4 = vld [vmem:[%s10847_s3 + $0x8] sm:$0xff] }
  0xfe   : > { %2880 = vmatpush.bf16.msrb.mxu0 %v7660_v9 }
  0xff   : > { %2894 = vmatpush.bf16.msrb.mxu1 %v7668_v10  ;;  %v2650_v60 = vpop.f32.mrf.mxu3  ;;  %v2567_v10 = vadd.f32 %v2566_v49, %v2553_v6 }
 0x100   : > { %2908 = vmatpush.bf16.msrb.mxu2 %v7676_v11  ;;  %v2582_v54 = vpop.f32.mrf.mxu2 }
 0x101   : > { %2928 = vmatpush.bf16.msrb.mxu3 %v7678_v12 }
 0x102   : > { %2881 = vmatpush.bf16.msrb.mxu0 %v7659_v13  ;;  %v2581_v13 = vadd.f32 %v2580_v50, %v2567_v10 }
 0x103   : > { %2895 = vmatpush.bf16.msrb.mxu1 %v7667_v14 }
 0x104   : > { %2909 = vmatpush.bf16.msrb.mxu2 %v7675_v15  ;;  %v2554_v52 = vpop.f32.mrf.mxu0 }
 0x105   : > { %v2568_v53 = vpop.f32.mrf.mxu1  ;;  %v2555_v11 = vadd.f32 %v2554_v52, %v2541_v7 }
 0x106   : > { %2882 = vmatpush.bf16.msrb.mxu0 %v7658_v16  ;;  %v2595_v16 = vadd.f32 %v2594_v51, %v2581_v13  ;;  %v7684_v51 = vld [vmem:[%s10847_s3 + $0x20] sm:$0xff] }
 0x107   : > { %2896 = vmatpush.bf16.msrb.mxu1 %v7666_v17  ;;  %v2652_v2 = vpop.f32.mrf.mxu3  ;;  %v2569_v15 = vadd.f32 %v2568_v53, %v2555_v11 }
 0x108   : > { %2910 = vmatpush.bf16.msrb.mxu2 %v7674_v18  ;;  %v2636_v58 = vpop.f32.mrf.mxu2 }
 0x109   : > { %v2583_v37 = vadd.f32 %v2582_v54, %v2569_v15 }
 0x10a   : > { %2883 = vmatpush.bf16.msrb.mxu0 %v7657_v19 }
 0x10b   : > { %2897 = vmatpush.bf16.msrb.mxu1 %v7665_v20 }
 0x10c   : > { %2911 = vmatpush.bf16.msrb.mxu2 %v7673_v21  ;;  %6346 = vmatmul.msk.bf16.vlgmr.msrb.gmra.mxu3 %vm2476_vm2, %v472_v25  ;;  %v2608_v56 = vpop.f32.mrf.mxu0  ;;  %v2597_v21 = vadd.f32 %v2596_v55, %v2583_v37  ;;  %v7691_v37 = vld [vmem:[%s10849_s5 + $0x18] sm:$0xff] }
 0x10d   : > { %v2622_v57 = vpop.f32.mrf.mxu1  ;;  %v2609_v19 = vadd.f32 %v2608_v56, %v2595_v16  ;;  %v7683_v56 = vld [vmem:[%s10847_s3 + $0x18] sm:$0xff] }
 0x10e   : > { %2884 = vmatpush.bf16.msrb.mxu0 %v7656_v24 }
 0x10f   : > { %2898 = vmatpush.bf16.msrb.mxu1 %v7664_v26  ;;  %v2623_v23 = vadd.f32 %v2622_v57, %v2609_v19 }
 0x110   : > { %2912 = vmatpush.bf16.msrb.mxu2 %v7672_v27  ;;  %v2638_v1 = vpop.f32.mrf.mxu2 }
 0x111   : > { %v2637_v59 = vadd.f32 %v2636_v58, %v2623_v23 }
 0x112   : > { %2885 = vmatpush.bf16.msrb.mxu0 %v7655_v28 }
 0x113   : > { %2899 = vmatpush.bf16.msrb.mxu1 %v7663_v29  ;;  %v2651_v28 = vadd.f32 %v2650_v60, %v2637_v59 }
 0x114   : > { %2913 = vmatpush.bf16.msrb.mxu2 %v7671_v30  ;;  %v2610_v61 = vpop.f32.mrf.mxu0 }
 0x115   : > { %v2624_v63 = vpop.f32.mrf.mxu1  ;;  %v2611_v24 = vadd.f32 %v2610_v61, %v2597_v21  ;;  %v7682_v61 = vld [vmem:[%s10847_s3 + $0x10] sm:$0xff] }
 0x116   : > { %2886 = vmatpush.bf16.msrb.mxu0 %v7654_v31  ;;  %v7687_v31 = vld [vmem:[%s10847_s3 + $0x38] sm:$0xff] }
 0x117   : > { %2900 = vmatpush.bf16.msrb.mxu1 %v7662_v32  ;;  %v2625_v27 = vadd.f32 %v2624_v63, %v2611_v24  ;;  %3006 = vmatpush.bf16.msra.mxu3 %v7687_v31 }
 0x118   : > { %2914 = vmatpush.bf16.msrb.mxu2 %v7670_v33  ;;  %v7686_v33 = vld [vmem:[%s10847_s3 + $0x30] sm:$0xff] }
 0x119   : > { %2887 = vmatmul.bf16.vlgmr.msrb.gmra.mxu0 %v469_v41  ;;  %v2639_v29 = vadd.f32 %v2638_v1, %v2625_v27 }
 0x11a   : > { %2901 = vmatmul.bf16.vlgmr.msrb.gmra.mxu1 %v470_v42  ;;  %3067 = vmatpush.bf16.msra.mxu0 %v7691_v37 }
 0x11b   : > { %2915 = vmatmul.bf16.vlgmr.msrb.gmra.mxu2 %v471_v43  ;;  %v2653_v35 = vadd.f32 %v2652_v2, %v2639_v29  ;;  %3007 = vmatpush.bf16.msra.mxu3 %v7686_v33 }
 0x11c   : > { %v2664_v3 = vpop.f32.mrf.mxu0 }
 0x11d   : > { %v2678_v5 = vpop.f32.mrf.mxu1  ;;  %v2665_v32 = vadd.f32 %v2664_v3, %v2651_v28 }
 0x11e   : > { %v2692_v8 = vpop.f32.mrf.mxu2 }
 0x11f   : > { %v2706_v9 = vpop.f32.mrf.mxu3  ;;  %v2679_v36 = vadd.f32 %v2678_v5, %v2665_v32  ;;  %3008 = vmatpush.bf16.msra.mxu3 %v7685_v45 }
 0x121   : > { %v2693_v41 = vadd.f32 %v2692_v8, %v2679_v36 }
 0x123   : > { %v2707_v46 = vadd.f32 %v2706_v9, %v2693_v41  ;;  %3009 = vmatpush.bf16.msra.mxu3 %v7684_v51  ;;  %v7680_v9 = vld [vmem:[%s10847_s3] sm:$0xff] }
 0x124   : > { %v2666_v12 = vpop.f32.mrf.mxu0  ;;  %v7294_v51 = vld [vmem:[%s10851_s7 + $0x700] sm:$0xf] }
 0x125   : > { %v2680_v14 = vpop.f32.mrf.mxu1  ;;  %v2667_v38 = vadd.f32 %v2666_v12, %v2653_v35 }
 0x126   : > { %v2694_v17 = vpop.f32.mrf.mxu2 }
 0x127   : > { %v2708_v18 = vpop.f32.mrf.mxu3  ;;  %v2681_v43 = vadd.f32 %v2680_v14, %v2667_v38  ;;  %3010 = vmatpush.bf16.msra.mxu3 %v7683_v56  ;;  %v7302_v56 = vld [vmem:[%s10851_s7 + $0x708] sm:$0xf] }
 0x129   : > { %v2695_v47 = vadd.f32 %v2694_v17, %v2681_v43 }
 0x12b   : > { %v2709_v52 = vadd.f32 %v2708_v18, %v2695_v47  ;;  %3011 = vmatpush.bf16.msra.mxu3 %v7682_v61  ;;  %v7917_v61 = vld [vmem:[%s10851_s7 + $0x70c] sm:$0xf] }
 0x12f   : > { %3012 = vmatpush.bf16.msra.mxu3 %v7681_v4 }
 0x133   : > { %3013 = vmatpush.bf16.msra.mxu3 %v7680_v9 }
 0x136   : > { %v2720_v20 = vpop.f32.mrf.mxu0 }
 0x137   : > { %v2734_v22 = vpop.f32.mrf.mxu1  ;;  %v2721_v48 = vadd.f32 %v2720_v20, %v2707_v46 }
 0x139   : > { %v2735_v53 = vadd.f32 %v2734_v22, %v2721_v48  ;;  %v7690_v48 = vld [vmem:[%s10849_s5 + $0x10] sm:$0xff] }
 0x13a   : > { %3068 = vmatpush.bf16.msra.mxu0 %v7690_v48  ;;  %v7772_v48 = vld [vmem:[%s10851_s7 + $0x27c] sm:$0xf0] }
 0x13e   : > { %v2748_v25 = vpop.f32.mrf.mxu2  ;;  %v2722_v30 = vpop.f32.mrf.mxu0 }
 0x13f   : > { %v2762_v26 = vpop.f32.mrf.mxu3  ;;  %v2736_v34 = vpop.f32.mrf.mxu1  ;;  %v2723_v54 = vadd.f32 %v2722_v30, %v2709_v52  ;;  %v2749_v57 = vadd.f32 %v2748_v25, %v2735_v53  ;;  %v7932_v52 = vld [vmem:[%s10851_s7 + $0x77c] sm:$0xf0]  ;;  %v7916_v53 = vld [vmem:[%s10851_s7 + $0x704] sm:$0xf] }
 0x141   : > { %v2737_v60 = vadd.f32 %v2736_v34, %v2723_v54  ;;  %v2763_v62 = vadd.f32 %v2762_v26, %v2749_v57  ;;  %v7295_v54 = vor.u32 %v7932_v52, %v7294_v51  ;;  %v7933_v57 = vld [vmem:[%s10851_s7 + $0x784] sm:$0xf0]  ;;  %v6656_v51 = vld [vmem:[%s10851_s7 + $0x280] sm:$0xf0] }
 0x142   : > { %v6662_v52 = vld [vmem:[%s10851_s7 + $0x208] sm:$0xf] }
 0x143   : > { %4688 = vmatpush.bf16.msra.mxu1 %v7295_v54  ;;  %v7757_v54 = vld [vmem:[%s10851_s7 + $0x20c] sm:$0xf] }
 0x146   : > { %v2750_v39 = vpop.f32.mrf.mxu2 }
 0x147   : > { %v2764_v40 = vpop.f32.mrf.mxu3  ;;  %v2751_v63 = vadd.f32 %v2750_v39, %v2737_v60  ;;  %v7303_v60 = vor.u32 %v7933_v57, %v7302_v56 }
 0x149   : > { %v2765_v5 = vadd.f32 %v2764_v40, %v2751_v63  ;;  %v7166_v63 = vld [vmem:[%s10851_s7 + $0x600] sm:$0xf] }
 0x156   : > { %v2776_v42 = vpop.f32.mrf.mxu0 }
 0x157   : > { %v2790_v44 = vpop.f32.mrf.mxu1  ;;  %v2777_v2 = vadd.f32 %v2776_v42, %v2763_v62  ;;  %v7304_v62 = vld [vmem:[%s10851_s7 + $0x788] sm:$0xf0] }
 0x159   : > { %v2791_v7 = vadd.f32 %v2790_v44, %v2777_v2  ;;  %v7884_v2 = vld [vmem:[%s10851_s7 + $0x604] sm:$0xf] }
 0x15e   : > { %v2804_v49 = vpop.f32.mrf.mxu2  ;;  %v2778_v55 = vpop.f32.mrf.mxu0 }
 0x15f   : > { %v2818_v50 = vpop.f32.mrf.mxu3  ;;  %v2792_v58 = vpop.f32.mrf.mxu1  ;;  %v2779_v8 = vadd.f32 %v2778_v55, %v2765_v5  ;;  %v2805_v10 = vadd.f32 %v2804_v49, %v2791_v7  ;;  %v7689_v49 = vld [vmem:[%s10849_s5 + $0x8] sm:$0xff]  ;;  %v7296_v55 = vld [vmem:[%s10851_s7 + $0x780] sm:$0xf0] }
 0x160   : > { %3069 = vmatpush.bf16.msra.mxu0 %v7689_v49  ;;  %v7901_v7 = vld [vmem:[%s10851_s7 + $0x684] sm:$0xf0]  ;;  %v7756_v49 = vld [vmem:[%s10851_s7 + $0x204] sm:$0xf] }
 0x161   : > { %v2793_v13 = vadd.f32 %v2792_v58, %v2779_v8  ;;  %v2819_v14 = vadd.f32 %v2818_v50, %v2805_v10  ;;  %v7688_v50 = vld [vmem:[%s10849_s5] sm:$0xff]  ;;  %v7299_v58 = vor.u32 %v7916_v53, %v7296_v55  ;;  %v7885_v8 = vld [vmem:[%s10851_s7 + $0x60c] sm:$0xf]  ;;  %v7773_v53 = vld [vmem:[%s10851_s7 + $0x284] sm:$0xf0] }
 0x162   : > { %v7176_v10 = vld [vmem:[%s10851_s7 + $0x688] sm:$0xf0] }
 0x163   : > { %4702 = vmatpush.bf16.msra.mxu2 %v7299_v58  ;;  %v6664_v55 = vld [vmem:[%s10851_s7 + $0x288] sm:$0xf0] }
 0x164   : > { %3070 = vmatpush.bf16.msra.mxu0 %v7688_v50 }
 0x166   : > { %v2806_v0 = vpop.f32.mrf.mxu2 }
 0x167   : > { %v2820_v1 = vpop.f32.mrf.mxu3  ;;  %v2807_v15 = vadd.f32 %v2806_v0, %v2793_v13  ;;  %v7307_v0 = vor.u32 %v7917_v61, %v7304_v62  ;;  %v7179_v13 = vor.u32 %v7885_v8, %v7176_v10  ;;  %v6663_v61 = vor.u32 %v7773_v53, %v6662_v52  ;;  %v6526_v62 = vld [vmem:[%s10851_s7 + $0x100] sm:$0xf]  ;;  %v7056_v52 = vld [vmem:[%s10851_s7 + $0x590] sm:$0xf0]  ;;  %v7062_v53 = vld [vmem:[%s10851_s7 + $0x518] sm:$0xf] }
 0x168   : > { %4716 = vmatpush.bf16.msrb.mxu0 %v7303_v60  ;;  %v6659_v60 = vor.u32 %v7756_v49, %v6656_v51  ;;  %v6398_v8 = vld [vmem:[%s10851_s7] sm:$0xf]  ;;  %v7854_v51 = vld [vmem:[%s10851_s7 + $0x514] sm:$0xf] }
 0x169   : > { %v2821_v19 = vadd.f32 %v2820_v1, %v2807_v15  ;;  %v7900_v1 = vld [vmem:[%s10851_s7 + $0x67c] sm:$0xf0]  ;;  %4730 = vmatpush.bf16.msrb.mxu3 %v7307_v0  ;;  %v7040_v15 = vld [vmem:[%s10851_s7 + $0x580] sm:$0xf0] }
 0x16a   : > { %v7167_v4 = vor.u32 %v7900_v1, %v7166_v63  ;;  %v7740_v63 = vld [vmem:[%s10851_s7 + $0x17c] sm:$0xf0]  ;;  %v7724_v0 = vld [vmem:[%s10851_s7 + $0x104] sm:$0xf]  ;;  %v6667_v1 = vor.u32 %v7757_v54, %v6664_v55  ;;  %v7871_v54 = vld [vmem:[%s10851_s7 + $0x594] sm:$0xf0] }
 0x16b   : > { %v7855_v55 = vld [vmem:[%s10851_s7 + $0x51c] sm:$0xf] }
 0x16c   : > { %4689 = vmatpush.bf16.msra.mxu1 %v7167_v4  ;;  %v7741_v4 = vld [vmem:[%s10851_s7 + $0x184] sm:$0xf0] }
 0x16d   : > { %4731 = vmatpush.bf16.msrb.mxu3 %v7179_v13  ;;  %v6400_v13 = vld [vmem:[%s10851_s7 + $0x80] sm:$0xf0] }
 0x176   : > { %v2832_v3 = vpop.f32.mrf.mxu0 }
 0x177   : > { %v2846_v6 = vpop.f32.mrf.mxu1  ;;  %v2833_v17 = vadd.f32 %v2832_v3, %v2819_v14  ;;  %v7168_v3 = vld [vmem:[%s10851_s7 + $0x680] sm:$0xf0] }
 0x178   : > { %v7171_v5 = vor.u32 %v7884_v2, %v7168_v3  ;;  %v7852_v14 = vld [vmem:[%s10851_s7 + $0x504] sm:$0xf]  ;;  %v6534_v3 = vld [vmem:[%s10851_s7 + $0x108] sm:$0xf] }
 0x179   : > { %v2847_v20 = vadd.f32 %v2846_v6, %v2833_v17  ;;  %v7174_v6 = vld [vmem:[%s10851_s7 + $0x608] sm:$0xf]  ;;  %v6528_v2 = vld [vmem:[%s10851_s7 + $0x180] sm:$0xf0]  ;;  %v6535_v10 = vor.u32 %v7741_v4, %v6534_v3  ;;  %v7839_v3 = vld [vmem:[%s10851_s7 + $0x494] sm:$0xf0] }
 0x17a   : > { %v7175_v9 = vor.u32 %v7901_v7, %v7174_v6  ;;  %v7869_v17 = vld [vmem:[%s10851_s7 + $0x584] sm:$0xf0]  ;;  %4703 = vmatpush.bf16.msra.mxu2 %v7171_v5  ;;  %v7725_v5 = vld [vmem:[%s10851_s7 + $0x10c] sm:$0xf]  ;;  %v6527_v7 = vor.u32 %v7740_v63, %v6526_v62  ;;  %v7063_v62 = vor.u32 %v7871_v54, %v7062_v53  ;;  %v7823_v4 = vld [vmem:[%s10851_s7 + $0x41c] sm:$0xf] }
 0x17b   : > { %v6536_v6 = vld [vmem:[%s10851_s7 + $0x188] sm:$0xf0]  ;;  %v7695_v54 = vld [vmem:[%s10851_s7 + $0x1c] sm:$0xf] }
 0x17c   : > { %4717 = vmatpush.bf16.msrb.mxu0 %v7175_v9  ;;  %v6531_v9 = vor.u32 %v7724_v0, %v6528_v2  ;;  %v7822_v0 = vld [vmem:[%s10851_s7 + $0x414] sm:$0xf]  ;;  %v6934_v2 = vld [vmem:[%s10851_s7 + $0x418] sm:$0xf] }
 0x17e   : > { %v2860_v11 = vpop.f32.mrf.mxu2  ;;  %v2834_v16 = vpop.f32.mrf.mxu0 }
 0x17f   : > { %v2874_v12 = vpop.f32.mrf.mxu3  ;;  %v2848_v18 = vpop.f32.mrf.mxu1  ;;  %v2835_v21 = vadd.f32 %v2834_v16, %v2821_v19  ;;  %v2861_v24 = vadd.f32 %v2860_v11, %v2847_v20  ;;  %v7038_v11 = vld [vmem:[%s10851_s7 + $0x500] sm:$0xf]  ;;  %v7046_v16 = vld [vmem:[%s10851_s7 + $0x508] sm:$0xf]  ;;  %v7048_v19 = vld [vmem:[%s10851_s7 + $0x588] sm:$0xf0]  ;;  %v7043_v20 = vor.u32 %v7852_v14, %v7040_v15  ;;  %v6539_v14 = vor.u32 %v7725_v5, %v6536_v6 }
 0x180   : > { %v6406_v15 = vld [vmem:[%s10851_s7 + $0x8] sm:$0xf]  ;;  %v6936_v5 = vld [vmem:[%s10851_s7 + $0x498] sm:$0xf0] }
 0x181   : > { %v2849_v25 = vadd.f32 %v2848_v18, %v2835_v21  ;;  %v2875_v27 = vadd.f32 %v2874_v12, %v2861_v24  ;;  %v7868_v12 = vld [vmem:[%s10851_s7 + $0x57c] sm:$0xf0]  ;;  %v7853_v18 = vld [vmem:[%s10851_s7 + $0x50c] sm:$0xf]  ;;  %v7047_v21 = vor.u32 %v7869_v17, %v7046_v16  ;;  %v7820_v24 = vld [vmem:[%s10851_s7 + $0x404] sm:$0xf]  ;;  %4704 = vmatpush.bf16.msra.mxu2 %v7043_v20 }
 0x182   : > { %v7039_v37 = vor.u32 %v7868_v12, %v7038_v11  ;;  %v7708_v11 = vld [vmem:[%s10851_s7 + $0x7c] sm:$0xf0]  ;;  %v7692_v12 = vld [vmem:[%s10851_s7 + $0x4] sm:$0xf]  ;;  %v7709_v16 = vld [vmem:[%s10851_s7 + $0x84] sm:$0xf0] }
 0x183   : > { %4718 = vmatpush.bf16.msrb.mxu0 %v7047_v21  ;;  %v6408_v17 = vld [vmem:[%s10851_s7 + $0x88] sm:$0xf0]  ;;  %v6399_v21 = vor.u32 %v7708_v11, %v6398_v8  ;;  %v6935_v8 = vor.u32 %v7839_v3, %v6934_v2  ;;  %v7806_v11 = vld [vmem:[%s10851_s7 + $0x38c] sm:$0xf0]  ;;  %v7328_v2 = vld [vmem:[%s10851_s7 + $0x7a0] sm:$0xf0] }
 0x184   : > { %4690 = vmatpush.bf16.msra.mxu1 %v7039_v37  ;;  %v7693_v37 = vld [vmem:[%s10851_s7 + $0xc] sm:$0xf]  ;;  %v7334_v3 = vld [vmem:[%s10851_s7 + $0x728] sm:$0xf] }
 0x186   : > { %v2862_v22 = vpop.f32.mrf.mxu2 }
 0x187   : > { %v2876_v23 = vpop.f32.mrf.mxu3  ;;  %v2863_v28 = vadd.f32 %v2862_v22, %v2849_v25  ;;  %v6910_v22 = vld [vmem:[%s10851_s7 + $0x400] sm:$0xf]  ;;  %v6912_v25 = vld [vmem:[%s10851_s7 + $0x480] sm:$0xf0] }
 0x189   : > { %v2877_v32 = vadd.f32 %v2876_v23, %v2863_v28  ;;  %v7836_v23 = vld [vmem:[%s10851_s7 + $0x47c] sm:$0xf0]  ;;  %v7821_v28 = vld [vmem:[%s10851_s7 + $0x40c] sm:$0xf] }
 0x18f   : > { %v2930_v30 = vpop.f32.mrf.mxu3 }
 0x196   : > { %v2888_v59 = vpop.f32.mrf.mxu0 }
 0x197   : > { %v2902_v26 = vpop.f32.mrf.mxu1  ;;  %v2889_v29 = vadd.f32 %v2888_v59, %v2875_v27  ;;  %v2932_v43 = vpop.f32.mrf.mxu3  ;;  %v7051_v59 = vor.u32 %v7853_v18, %v7048_v19  ;;  %v7837_v27 = vld [vmem:[%s10851_s7 + $0x484] sm:$0xf0]  ;;  %v7310_v18 = vld [vmem:[%s10851_s7 + $0x710] sm:$0xf] }
 0x198   : > { %v7934_v19 = vld [vmem:[%s10851_s7 + $0x78c] sm:$0xf0] }
 0x199   : > { %v2903_v34 = vadd.f32 %v2902_v26, %v2889_v29  ;;  %v6918_v26 = vld [vmem:[%s10851_s7 + $0x408] sm:$0xf]  ;;  %v6920_v29 = vld [vmem:[%s10851_s7 + $0x488] sm:$0xf0]  ;;  %4732 = vmatpush.bf16.msrb.mxu3 %v7051_v59 }
 0x19e   : > { %v2916_v31 = vpop.f32.mrf.mxu2  ;;  %v2890_v33 = vpop.f32.mrf.mxu0 }
 0x19f   : > { %v2891_v35 = vadd.f32 %v2890_v33, %v2877_v32  ;;  %v2917_v36 = vadd.f32 %v2916_v31, %v2903_v34  ;;  %v2904_v38 = vpop.f32.mrf.mxu1  ;;  %v6915_v31 = vor.u32 %v7820_v24, %v6912_v25  ;;  %v6919_v32 = vor.u32 %v7837_v27, %v6918_v26  ;;  %v6782_v33 = vld [vmem:[%s10851_s7 + $0x300] sm:$0xf]  ;;  %v7318_v24 = vld [vmem:[%s10851_s7 + $0x718] sm:$0xf]  ;;  %v7919_v27 = vld [vmem:[%s10851_s7 + $0x71c] sm:$0xf] }
 0x1a0   : > { %v7804_v34 = vld [vmem:[%s10851_s7 + $0x37c] sm:$0xf0]  ;;  %v6403_v25 = vor.u32 %v7692_v12, %v6400_v13  ;;  %v7935_v26 = vld [vmem:[%s10851_s7 + $0x794] sm:$0xf0]  ;;  %v7790_v12 = vld [vmem:[%s10851_s7 + $0x314] sm:$0xf] }
 0x1a1   : > { %v2905_v39 = vadd.f32 %v2904_v38, %v2891_v35  ;;  %v2931_v41 = vadd.f32 %v2930_v30, %v2917_v36  ;;  %v6911_v30 = vor.u32 %v7836_v23, %v6910_v22  ;;  %v7788_v35 = vld [vmem:[%s10851_s7 + $0x304] sm:$0xf]  ;;  %v6923_v36 = vor.u32 %v7821_v28, %v6920_v29  ;;  %4705 = vmatpush.bf16.msra.mxu2 %v6915_v31  ;;  %v7918_v22 = vld [vmem:[%s10851_s7 + $0x714] sm:$0xf]  ;;  %v7320_v28 = vld [vmem:[%s10851_s7 + $0x798] sm:$0xf0] }
 0x1a2   : > { %v6784_v38 = vld [vmem:[%s10851_s7 + $0x380] sm:$0xf0]  ;;  %4719 = vmatpush.bf16.msrb.mxu0 %v6919_v32  ;;  %v7312_v23 = vld [vmem:[%s10851_s7 + $0x790] sm:$0xf0]  ;;  %v6407_v29 = vor.u32 %v7709_v16, %v6406_v15  ;;  %v7311_v32 = vor.u32 %v7934_v19, %v7310_v18  ;;  %v6806_v15 = vld [vmem:[%s10851_s7 + $0x318] sm:$0xf] }
 0x1a3   : > { %v2935_v45 = vmax.f32 %v2931_v41, 0.0  ;;  %v7789_v41 = vld [vmem:[%s10851_s7 + $0x30c] sm:$0xf]  ;;  %4691 = vmatpush.bf16.msra.mxu1 %v6911_v30  ;;  %4733 = vmatpush.bf16.msrb.mxu3 %v6923_v36  ;;  %v6411_v30 = vor.u32 %v7693_v37, %v6408_v17  ;;  %v7319_v36 = vor.u32 %v7935_v26, %v7318_v24  ;;  %v7807_v16 = vld [vmem:[%s10851_s7 + $0x394] sm:$0xf0] }
 0x1a4   : > { %v6807_v17 = vor.u32 %v7807_v16, %v6806_v15  ;;  %v7791_v18 = vld [vmem:[%s10851_s7 + $0x31c] sm:$0xf]  ;;  %v7775_v26 = vld [vmem:[%s10851_s7 + $0x294] sm:$0xf0]  ;;  %v7888_v16 = vld [vmem:[%s10851_s7 + $0x624] sm:$0xf] }
 0x1a5   : > { %v6808_v19 = vld [vmem:[%s10851_s7 + $0x398] sm:$0xf0] }
 0x1a6   : > { %v2918_v40 = vpop.f32.mrf.mxu2 }
 0x1a7   : > { %v2919_v42 = vadd.f32 %v2918_v40, %v2905_v39  ;;  %v6790_v39 = vld [vmem:[%s10851_s7 + $0x308] sm:$0xf] }
 0x1a8   : > { %v7805_v40 = vld [vmem:[%s10851_s7 + $0x384] sm:$0xf0] }
 0x1a9   : > { %v2933_v44 = vadd.f32 %v2932_v43, %v2919_v42  ;;  %v6792_v42 = vld [vmem:[%s10851_s7 + $0x388] sm:$0xf0]  ;;  %v8000_v43 = vld [vmem:[%s10848_s4] ss:$0 sm:$0xff] }
 0x1aa   : > { %v6795_v50 = vor.u32 %v7789_v41, %v6792_v42  ;;  %v7190_v41 = vld [vmem:[%s10851_s7 + $0x618] sm:$0xf] }
 0x1ab   : > { %v2936_v46 = vmax.f32 %v2933_v44, 0.0  ;;  %v6783_v44 = vor.u32 %v7804_v34, %v6782_v33  ;;  %v7315_v33 = vor.u32 %v7918_v22, %v7312_v23  ;;  %v7182_v34 = vld [vmem:[%s10851_s7 + $0x610] sm:$0xf]  ;;  %v7903_v42 = vld [vmem:[%s10851_s7 + $0x694] sm:$0xf0] }
 0x1ac   : > { %4734 = vmatpush.bf16.msrb.mxu3 %v6795_v50  ;;  %v7191_v49 = vor.u32 %v7903_v42, %v7190_v41  ;;  %v7774_v22 = vld [vmem:[%s10851_s7 + $0x28c] sm:$0xf0]  ;;  %v7758_v23 = vld [vmem:[%s10851_s7 + $0x214] sm:$0xf]  ;;  %v7727_v42 = vld [vmem:[%s10851_s7 + $0x11c] sm:$0xf] }
 0x1ad   : > { %v2937_v47 = vpack.c.bf16 %v2936_v46, %v2935_v45  ;;  %v6787_v45 = vor.u32 %v7788_v35, %v6784_v38  ;;  %v6791_v46 = vor.u32 %v7805_v40, %v6790_v39  ;;  %4692 = vmatpush.bf16.msra.mxu1 %v6783_v44  ;;  %v7902_v35 = vld [vmem:[%s10851_s7 + $0x68c] sm:$0xf0]  ;;  %v7323_v38 = vor.u32 %v7919_v27, %v7320_v28  ;;  %v7886_v39 = vld [vmem:[%s10851_s7 + $0x614] sm:$0xf]  ;;  %v7192_v44 = vld [vmem:[%s10851_s7 + $0x698] sm:$0xf0] }
 0x1ae   : > { %v7184_v40 = vld [vmem:[%s10851_s7 + $0x690] sm:$0xf0] }
 0x1af   : > { %3014 = vmatmul.bf16.vlgmr.msra.gmra.mxu3 %v2937_v47  ;;  %v6654_v47 = vld [vmem:[%s10851_s7 + $0x200] sm:$0xf]  ;;  %4706 = vmatpush.bf16.msra.mxu2 %v6787_v45  ;;  %v7183_v45 = vor.u32 %v7902_v35, %v7182_v34  ;;  %v7726_v34 = vld [vmem:[%s10851_s7 + $0x114] sm:$0xf] }
 0x1b0   : > { %v6655_v57 = vor.u32 %v7772_v48, %v6654_v47  ;;  %4720 = vmatpush.bf16.msrb.mxu0 %v6791_v46  ;;  %4735 = vmatpush.bf16.msrb.mxu3 %v6667_v1  ;;  %v7187_v46 = vor.u32 %v7886_v39, %v7184_v40  ;;  %v7054_v47 = vld [vmem:[%s10851_s7 + $0x510] sm:$0xf]  ;;  %v6928_v1 = vld [vmem:[%s10851_s7 + $0x490] sm:$0xf0]  ;;  %v7743_v39 = vld [vmem:[%s10851_s7 + $0x194] sm:$0xf0] }
 0x1b1   : > { %v7870_v48 = vld [vmem:[%s10851_s7 + $0x58c] sm:$0xf0] }
 0x1b2   : > { %4693 = vmatpush.bf16.msra.mxu1 %v6655_v57  ;;  %v7055_v57 = vor.u32 %v7870_v48, %v7054_v47  ;;  %v7694_v47 = vld [vmem:[%s10851_s7 + $0x14] sm:$0xf] }
 0x1b3   : > { %4707 = vmatpush.bf16.msra.mxu2 %v6659_v60  ;;  %v6926_v60 = vld [vmem:[%s10851_s7 + $0x410] sm:$0xf] }
 0x1b4   : > { %4721 = vmatpush.bf16.msrb.mxu0 %v6663_v61  ;;  %4736 = vmatpush.bf16.msrb.mxu3 %v6539_v14  ;;  %v7838_v61 = vld [vmem:[%s10851_s7 + $0x48c] sm:$0xf0]  ;;  %v6800_v14 = vld [vmem:[%s10851_s7 + $0x390] sm:$0xf0] }
 0x1b5   : > { %v6927_v6 = vor.u32 %v7838_v61, %v6926_v60  ;;  %v6803_v37 = vor.u32 %v7790_v12, %v6800_v14  ;;  %v7198_v12 = vld [vmem:[%s10851_s7 + $0x620] sm:$0xf] }
 0x1b6   : > { %4694 = vmatpush.bf16.msra.mxu1 %v6527_v7  ;;  %v6931_v7 = vor.u32 %v7822_v0, %v6928_v1  ;;  %v7936_v0 = vld [vmem:[%s10851_s7 + $0x79c] sm:$0xf0]  ;;  %v7920_v1 = vld [vmem:[%s10851_s7 + $0x724] sm:$0xf] }
 0x1b7   : > { %4708 = vmatpush.bf16.msra.mxu2 %v6531_v9  ;;  %v6939_v9 = vor.u32 %v7823_v4, %v6936_v5  ;;  %v7937_v4 = vld [vmem:[%s10851_s7 + $0x7a4] sm:$0xf0] }
 0x1b8   : > { %4722 = vmatpush.bf16.msrb.mxu0 %v6535_v10  ;;  %4737 = vmatpush.bf16.msrb.mxu3 %v6411_v30  ;;  %v6798_v10 = vld [vmem:[%s10851_s7 + $0x310] sm:$0xf]  ;;  %v6680_v30 = vld [vmem:[%s10851_s7 + $0x298] sm:$0xf0]  ;;  %v7335_v14 = vor.u32 %v7937_v4, %v7334_v3  ;;  %v7777_v3 = vld [vmem:[%s10851_s7 + $0x2a4] sm:$0xf0] }
 0x1b9   : > { %v6799_v13 = vor.u32 %v7806_v11, %v6798_v10  ;;  %v7331_v11 = vor.u32 %v7920_v1, %v7328_v2  ;;  %v6688_v1 = vld [vmem:[%s10851_s7 + $0x2a0] sm:$0xf0]  ;;  %v6694_v2 = vld [vmem:[%s10851_s7 + $0x228] sm:$0xf]  ;;  %v7761_v4 = vld [vmem:[%s10851_s7 + $0x22c] sm:$0xf] }
 0x1ba   : > { %4695 = vmatpush.bf16.msra.mxu1 %v6399_v21  ;;  %v6670_v21 = vld [vmem:[%s10851_s7 + $0x210] sm:$0xf] }
 0x1bb   : > { %4709 = vmatpush.bf16.msra.mxu2 %v6403_v25  ;;  %v6671_v24 = vor.u32 %v7774_v22, %v6670_v21  ;;  %v6678_v25 = vld [vmem:[%s10851_s7 + $0x218] sm:$0xf] }
 0x1bc   : > { %4723 = vmatpush.bf16.msrb.mxu0 %v6407_v29  ;;  %4786 = vmatpush.bf16.msra.mxu3 %v7323_v38  ;;  %v6679_v28 = vor.u32 %v7775_v26, %v6678_v25  ;;  %v7759_v29 = vld [vmem:[%s10851_s7 + $0x21c] sm:$0xf]  ;;  %v6550_v38 = vld [vmem:[%s10851_s7 + $0x118] sm:$0xf]  ;;  %v7856_v26 = vld [vmem:[%s10851_s7 + $0x524] sm:$0xf] }
 0x1bd   : > { %v6551_v41 = vor.u32 %v7743_v39, %v6550_v38  ;;  %v7824_v39 = vld [vmem:[%s10851_s7 + $0x424] sm:$0xf] }
 0x1be   : > { %4744 = vmatpush.bf16.msrb.mxu1 %v7311_v32  ;;  %v6542_v32 = vld [vmem:[%s10851_s7 + $0x110] sm:$0xf] }
 0x1bf   : > { %4758 = vmatpush.bf16.msrb.mxu2 %v7315_v33  ;;  %v7742_v33 = vld [vmem:[%s10851_s7 + $0x18c] sm:$0xf0] }
 0x1c0   : > { %v6543_v35 = vor.u32 %v7742_v33, %v6542_v32 }
 0x1c2   : > { %4745 = vmatpush.bf16.msrb.mxu1 %v7183_v45  ;;  %v6414_v45 = vld [vmem:[%s10851_s7 + $0x10] sm:$0xf] }
 0x1c3   : > { %4759 = vmatpush.bf16.msrb.mxu2 %v7187_v46  ;;  %v7710_v46 = vld [vmem:[%s10851_s7 + $0x8c] sm:$0xf0] }
 0x1c4   : > { %v6415_v48 = vor.u32 %v7710_v46, %v6414_v45 }
 0x1c6   : > { %4746 = vmatpush.bf16.msrb.mxu1 %v7055_v57 }
 0x1ca   : > { %4747 = vmatpush.bf16.msrb.mxu1 %v6927_v6 }
 0x1ce   : > { %4748 = vmatpush.bf16.msrb.mxu1 %v6799_v13  ;;  %v7904_v13 = vld [vmem:[%s10851_s7 + $0x69c] sm:$0xf0] }
 0x1cf   : > { %v7199_v21 = vor.u32 %v7904_v13, %v7198_v12  ;;  %v7728_v13 = vld [vmem:[%s10851_s7 + $0x124] sm:$0xf] }
 0x1d2   : > { %4749 = vmatpush.bf16.msrb.mxu1 %v6671_v24  ;;  %v7872_v24 = vld [vmem:[%s10851_s7 + $0x59c] sm:$0xf0] }
 0x1d6   : > { %4750 = vmatpush.bf16.msrb.mxu1 %v6543_v35  ;;  %v7840_v35 = vld [vmem:[%s10851_s7 + $0x49c] sm:$0xf0] }
 0x1da   : > { %4751 = vmatpush.bf16.msrb.mxu1 %v6415_v48  ;;  %v7808_v48 = vld [vmem:[%s10851_s7 + $0x39c] sm:$0xf0] }
 0x232   : > { %v3015_v56 = vpop.f32.mrf.mxu3 }
 0x233   : > { %v9226_v58 = vadd.f32 %v8000_v43, %v3015_v56  ;;  %v7064_v56 = vld [vmem:[%s10851_s7 + $0x598] sm:$0xf0] }
 0x234   : > { %v7067_v63 = vor.u32 %v7855_v55, %v7064_v56  ;;  %v6424_v55 = vld [vmem:[%s10851_s7 + $0x98] sm:$0xf0] }
 0x235   : > { %3021 = vst.msk [vmem:[%s9248_s0] sm:$0xff] %vm3020_vm3, %v9226_v58  ;;  %v6427_v56 = vor.u32 %v7695_v54, %v6424_v55  ;;  %v7809_v54 = vld [vmem:[%s10851_s7 + $0x3a4] sm:$0xf0]  ;;  %v7793_v55 = vld [vmem:[%s10851_s7 + $0x32c] sm:$0xf] }
 0x23a   : > { %v3017_v20 = vpop.f32.mrf.mxu3 }
 0x23b   : > { %v3018_v59 = vadd.f32 %v8000_v43, %v3017_v20  ;;  %v7887_v43 = vld [vmem:[%s10851_s7 + $0x61c] sm:$0xf]  ;;  %v6811_v20 = vor.u32 %v7791_v18, %v6808_v19  ;;  %v7905_v18 = vld [vmem:[%s10851_s7 + $0x6a4] sm:$0xf0]  ;;  %v7889_v19 = vld [vmem:[%s10851_s7 + $0x62c] sm:$0xf] }
 0x23c   : > { %v7195_v50 = vor.u32 %v7887_v43, %v7192_v44  ;;  %v6552_v43 = vld [vmem:[%s10851_s7 + $0x198] sm:$0xf0] }
 0x23d   : > { %3022 = vst.msk [vmem:[%s9248_s0 + $0x8] sm:$0xff] %vm3020_vm3, %v3018_v59  ;;  %v3023_v31 = vpack.c.bf16 %v3018_v59, %v9226_v58  ;;  %v7059_v58 = vor.u32 %v7854_v51, %v7056_v52  ;;  %v6672_v59 = vld [vmem:[%s10851_s7 + $0x290] sm:$0xf0]  ;;  %v6555_v44 = vor.u32 %v7727_v42, %v6552_v43  ;;  %v7711_v51 = vld [vmem:[%s10851_s7 + $0x94] sm:$0xf0]  ;;  %s5209_s0 = scalar_lea.sflag [#allocation5], %s9172_s18 }
 0x23e   : > { %4787 = vmatpush.bf16.msra.mxu3 %v7195_v50  ;;  %v6675_v27 = vor.u32 %v7758_v23, %v6672_v59  ;;  %v6422_v50 = vld [vmem:[%s10851_s7 + $0x18] sm:$0xf]  ;;  %v7070_v23 = vld [vmem:[%s10851_s7 + $0x520] sm:$0xf]  ;;  %v7841_v42 = vld [vmem:[%s10851_s7 + $0x4a4] sm:$0xf0] }
 0x23f   : > { %6395 = vmatmul.msk.bf16.vlgmr.msra.gmra.mxu0 %vm3020_vm3, %v3023_v31  ;;  %4760 = vmatpush.bf16.msrb.mxu2 %v7059_v58  ;;  %v6683_v31 = vor.u32 %v7759_v29, %v6680_v30  ;;  %v6423_v53 = vor.u32 %v7711_v51, %v6422_v50  ;;  %v8001_v58 = vld [vmem:[%s10850_s6] ss:$0 sm:$0xff]  ;;  %v7873_v29 = vld [vmem:[%s10851_s7 + $0x5a4] sm:$0xf0]  ;;  %v7857_v30 = vld [vmem:[%s10851_s7 + $0x52c] sm:$0xf]  ;;  %v7071_v32 = vor.u32 %v7872_v24, %v7070_v23 }
 0x240   : > { %4772 = vmatpush.bf16.msra.mxu0 %v7319_v36  ;;  %v6544_v36 = vld [vmem:[%s10851_s7 + $0x190] sm:$0xf0]  ;;  %v7825_v43 = vld [vmem:[%s10851_s7 + $0x42c] sm:$0xf]  ;;  %v7792_v51 = vld [vmem:[%s10851_s7 + $0x324] sm:$0xf] }
 0x241   : > { %v6547_v40 = vor.u32 %v7726_v34, %v6544_v36  ;;  %v6942_v34 = vld [vmem:[%s10851_s7 + $0x420] sm:$0xf]  ;;  %v6432_v23 = vld [vmem:[%s10851_s7 + $0xa0] sm:$0xf0] }
 0x242   : > { %4788 = vmatpush.bf16.msra.mxu3 %v7067_v63  ;;  %v7326_v63 = vld [vmem:[%s10851_s7 + $0x720] sm:$0xf]  ;;  %v6943_v45 = vor.u32 %v7840_v35, %v6942_v34 }
 0x243   : > { %4761 = vmatpush.bf16.msrb.mxu2 %v6931_v7  ;;  %v7921_v7 = vld [vmem:[%s10851_s7 + $0x72c] sm:$0xf]  ;;  %v7327_v10 = vor.u32 %v7936_v0, %v7326_v63  ;;  %v7760_v0 = vld [vmem:[%s10851_s7 + $0x224] sm:$0xf] }
 0x244   : > { %4773 = vmatpush.bf16.msra.mxu0 %v7191_v49  ;;  %v6416_v49 = vld [vmem:[%s10851_s7 + $0x90] sm:$0xf0] }
 0x245   : > { %v6419_v52 = vor.u32 %v7694_v47, %v6416_v49  ;;  %v6814_v47 = vld [vmem:[%s10851_s7 + $0x320] sm:$0xf] }
 0x246   : > { %4789 = vmatpush.bf16.msra.mxu3 %v6939_v9 }
 0x247   : > { %4762 = vmatpush.bf16.msrb.mxu2 %v6803_v37  ;;  %v7200_v37 = vld [vmem:[%s10851_s7 + $0x6a0] sm:$0xf0] }
 0x248   : > { %4774 = vmatpush.bf16.msra.mxu0 %v7063_v62  ;;  %v7203_v22 = vor.u32 %v7888_v16, %v7200_v37  ;;  %v7745_v16 = vld [vmem:[%s10851_s7 + $0x1a4] sm:$0xf0]  ;;  %v7729_v37 = vld [vmem:[%s10851_s7 + $0x12c] sm:$0xf] }
 0x24a   : > { %4790 = vmatpush.bf16.msra.mxu3 %v6811_v20  ;;  %v7208_v20 = vld [vmem:[%s10851_s7 + $0x6a8] sm:$0xf0] }
 0x24b   : > { %4763 = vmatpush.bf16.msrb.mxu2 %v6675_v27  ;;  %v7211_v25 = vor.u32 %v7889_v19, %v7208_v20  ;;  %v7072_v27 = vld [vmem:[%s10851_s7 + $0x5a0] sm:$0xf0] }
 0x24c   : > { %4775 = vmatpush.bf16.msra.mxu0 %v6935_v8  ;;  %v7336_v8 = vld [vmem:[%s10851_s7 + $0x7a8] sm:$0xf0]  ;;  %v7075_v33 = vor.u32 %v7856_v26, %v7072_v27  ;;  %v7713_v26 = vld [vmem:[%s10851_s7 + $0xa4] sm:$0xf0] }
 0x24d   : > { %v7339_v15 = vor.u32 %v7921_v7, %v7336_v8  ;;  %v6691_v7 = vor.u32 %v7760_v0, %v6688_v1  ;;  %v6558_v8 = vld [vmem:[%s10851_s7 + $0x120] sm:$0xf]  ;;  %v7697_v27 = vld [vmem:[%s10851_s7 + $0x2c] sm:$0xf]  ;;  %v7875_v0 = vld [vmem:[%s10851_s7 + $0x5b4] sm:$0xf0] }
 0x24e   : > { %4791 = vmatpush.bf16.msra.mxu3 %v6683_v31  ;;  %v7080_v31 = vld [vmem:[%s10851_s7 + $0x5a8] sm:$0xf0]  ;;  %v7859_v1 = vld [vmem:[%s10851_s7 + $0x53c] sm:$0xf] }
 0x24f   : > { %4764 = vmatpush.bf16.msrb.mxu2 %v6547_v40  ;;  %v7083_v38 = vor.u32 %v7857_v30, %v7080_v31  ;;  %v6944_v40 = vld [vmem:[%s10851_s7 + $0x4a0] sm:$0xf0]  ;;  %v7938_v30 = vld [vmem:[%s10851_s7 + $0x7ac] sm:$0xf0]  ;;  %v7922_v31 = vld [vmem:[%s10851_s7 + $0x734] sm:$0xf] }
 0x250   : > { %4776 = vmatpush.bf16.msra.mxu0 %v6807_v17  ;;  %v7206_v17 = vld [vmem:[%s10851_s7 + $0x628] sm:$0xf]  ;;  %v6947_v46 = vor.u32 %v7824_v39, %v6944_v40  ;;  %v7352_v39 = vld [vmem:[%s10851_s7 + $0x7b8] sm:$0xf0] }
 0x251   : > { %v7207_v59 = vor.u32 %v7905_v18, %v7206_v17  ;;  %v6568_v17 = vld [vmem:[%s10851_s7 + $0x1a8] sm:$0xf0]  ;;  %v6430_v18 = vld [vmem:[%s10851_s7 + $0x20] sm:$0xf] }
 0x252   : > { %4792 = vmatpush.bf16.msra.mxu3 %v6555_v44  ;;  %v6952_v44 = vld [vmem:[%s10851_s7 + $0x4a8] sm:$0xf0] }
 0x253   : > { %4765 = vmatpush.bf16.msrb.mxu2 %v6419_v52  ;;  %v6955_v50 = vor.u32 %v7825_v43, %v6952_v44  ;;  %v6816_v52 = vld [vmem:[%s10851_s7 + $0x3a0] sm:$0xf0]  ;;  %v7214_v44 = vld [vmem:[%s10851_s7 + $0x630] sm:$0xf] }
 0x254   : > { %4777 = vmatpush.bf16.msra.mxu0 %v6679_v28  ;;  %v7078_v28 = vld [vmem:[%s10851_s7 + $0x528] sm:$0xf] }
 0x255   : > { %v7079_v36 = vor.u32 %v7873_v29, %v7078_v28  ;;  %v6440_v28 = vld [vmem:[%s10851_s7 + $0xa8] sm:$0xf0]  ;;  %v7342_v29 = vld [vmem:[%s10851_s7 + $0x730] sm:$0xf] }
 0x256   : > { %4793 = vmatpush.bf16.msra.mxu3 %v6427_v56  ;;  %v6824_v56 = vld [vmem:[%s10851_s7 + $0x3a8] sm:$0xf0] }
 0x257   : > { %v6827_v63 = vor.u32 %v7793_v55, %v6824_v56  ;;  %v7086_v56 = vld [vmem:[%s10851_s7 + $0x530] sm:$0xf] }
 0x258   : > { %4778 = vmatpush.bf16.msra.mxu0 %v6551_v41  ;;  %v6950_v41 = vld [vmem:[%s10851_s7 + $0x428] sm:$0xf] }
 0x259   : > { %v6951_v49 = vor.u32 %v7841_v42, %v6950_v41  ;;  %v6443_v41 = vor.u32 %v7697_v27, %v6440_v28  ;;  %v7343_v42 = vor.u32 %v7938_v30, %v7342_v29  ;;  %v6702_v28 = vld [vmem:[%s10851_s7 + $0x230] sm:$0xf] }
 0x25a   : > { %v7778_v29 = vld [vmem:[%s10851_s7 + $0x2ac] sm:$0xf0] }
 0x25c   : > { %4779 = vmatpush.bf16.msra.mxu0 %v6423_v53  ;;  %v6822_v53 = vld [vmem:[%s10851_s7 + $0x328] sm:$0xf] }
 0x2bc   : > { %v3072_v57 = vpop.f32.mrf.mxu0 }
 0x2bd   : > { %v3073_v60 = vadd.f32 %v8001_v58, %v3072_v57  ;;  %v6815_v57 = vor.u32 %v7808_v48, %v6814_v47  ;;  %v7890_v48 = vld [vmem:[%s10851_s7 + $0x634] sm:$0xf] }
 0x2bf   : > { %v3077_v5 = vmax.f32 %v3073_v60, 0.0  ;;  %v6686_v60 = vld [vmem:[%s10851_s7 + $0x220] sm:$0xf] }
 0x2c4   : > { %v3074_v61 = vpop.f32.mrf.mxu0 }
 0x2c5   : > { %v3075_v62 = vadd.f32 %v8001_v58, %v3074_v61  ;;  %v6819_v58 = vor.u32 %v7792_v51, %v6816_v52  ;;  %v7776_v61 = vld [vmem:[%s10851_s7 + $0x29c] sm:$0xf0]  ;;  %v7907_v51 = vld [vmem:[%s10851_s7 + $0x6b4] sm:$0xf0]  ;;  %v7891_v52 = vld [vmem:[%s10851_s7 + $0x63c] sm:$0xf] }
 0x2c7   : > { %v3078_v6 = vmax.f32 %v3075_v62, 0.0  ;;  %v6823_v62 = vor.u32 %v7809_v54, %v6822_v53  ;;  %v7224_v53 = vld [vmem:[%s10851_s7 + $0x6b8] sm:$0xf0] }
 0x2c9   : > { %v9506_v9 = vpack.c.bf16 %v3078_v6, %v3077_v5  ;;  %v6696_v5 = vld [vmem:[%s10851_s7 + $0x2a8] sm:$0xf0]  ;;  %v6687_v6 = vor.u32 %v7776_v61, %v6686_v60  ;;  %v7227_v60 = vor.u32 %v7891_v52, %v7224_v53  ;;  %v7858_v61 = vld [vmem:[%s10851_s7 + $0x534] sm:$0xf] }
 0x2ca   : > { %v6699_v12 = vor.u32 %v7761_v4, %v6696_v5  ;;  %v6958_v5 = vld [vmem:[%s10851_s7 + $0x430] sm:$0xf] }
 0x2cb   : > { %4696 = vmatmul.bf16.vlgmr.msra.gmra.mxu1 %v9506_v9  ;;  %4710 = vmatmul.bf16.vlgmr.msra.gmra.mxu2 %v9506_v9 }
 0x2cc   : > { %4724 = vmatmul.bf16.vlgmr.msrb.gmra.mxu0 %v9506_v9  ;;  %4738 = vmatmul.bf16.vlgmr.msrb.gmra.mxu3 %v9506_v9 }
 0x2cd   : > { %4800 = vmatpush.bf16.msra.mxu1 %v7327_v10  ;;  %4814 = vmatpush.bf16.msra.mxu2 %v7331_v11  ;;  %v7744_v10 = vld [vmem:[%s10851_s7 + $0x19c] sm:$0xf0]  ;;  %v6695_v11 = vor.u32 %v7777_v3, %v6694_v2  ;;  %v7096_v2 = vld [vmem:[%s10851_s7 + $0x5b8] sm:$0xf0] }
 0x2ce   : > { %4828 = vmatpush.bf16.msrb.mxu0 %v7335_v14  ;;  %4842 = vmatpush.bf16.msrb.mxu3 %v7339_v15  ;;  %v6560_v14 = vld [vmem:[%s10851_s7 + $0x1a0] sm:$0xf0]  ;;  %v6566_v15 = vld [vmem:[%s10851_s7 + $0x128] sm:$0xf]  ;;  %v6559_v19 = vor.u32 %v7744_v10, %v6558_v8  ;;  %v7099_v8 = vor.u32 %v7859_v1, %v7096_v2  ;;  %v7826_v10 = vld [vmem:[%s10851_s7 + $0x434] sm:$0xf] }
 0x2cf   : > { %v6563_v20 = vor.u32 %v7728_v13, %v6560_v14  ;;  %v6567_v24 = vor.u32 %v7745_v16, %v6566_v15  ;;  %v7843_v13 = vld [vmem:[%s10851_s7 + $0x4b4] sm:$0xf0]  ;;  %v7827_v14 = vld [vmem:[%s10851_s7 + $0x43c] sm:$0xf]  ;;  %v7940_v1 = vld [vmem:[%s10851_s7 + $0x7bc] sm:$0xf0] }
 0x2d0   : > { %v6968_v15 = vld [vmem:[%s10851_s7 + $0x4b8] sm:$0xf0]  ;;  %v7924_v2 = vld [vmem:[%s10851_s7 + $0x744] sm:$0xf] }
 0x2d1   : > { %4801 = vmatpush.bf16.msra.mxu1 %v7199_v21  ;;  %4815 = vmatpush.bf16.msra.mxu2 %v7203_v22  ;;  %v7712_v21 = vld [vmem:[%s10851_s7 + $0x9c] sm:$0xf0]  ;;  %v7696_v22 = vld [vmem:[%s10851_s7 + $0x24] sm:$0xf] }
 0x2d2   : > { %4829 = vmatpush.bf16.msrb.mxu0 %v7207_v59  ;;  %4843 = vmatpush.bf16.msrb.mxu3 %v7211_v25  ;;  %v6571_v59 = vor.u32 %v7729_v37, %v6568_v17  ;;  %v6438_v25 = vld [vmem:[%s10851_s7 + $0x28] sm:$0xf]  ;;  %v6431_v34 = vor.u32 %v7712_v21, %v6430_v18  ;;  %v6435_v35 = vor.u32 %v7696_v22, %v6432_v23  ;;  %v6830_v17 = vld [vmem:[%s10851_s7 + $0x330] sm:$0xf]  ;;  %v7794_v21 = vld [vmem:[%s10851_s7 + $0x334] sm:$0xf] }
 0x2d3   : > { %v6439_v40 = vor.u32 %v7713_v26, %v6438_v25  ;;  %v7810_v18 = vld [vmem:[%s10851_s7 + $0x3ac] sm:$0xf0]  ;;  %v6832_v22 = vld [vmem:[%s10851_s7 + $0x3b0] sm:$0xf0]  ;;  %v6838_v23 = vld [vmem:[%s10851_s7 + $0x338] sm:$0xf] }
 0x2d4   : > { %v6840_v25 = vld [vmem:[%s10851_s7 + $0x3b8] sm:$0xf0]  ;;  %v6831_v26 = vor.u32 %v7810_v18, %v6830_v17  ;;  %v6835_v27 = vor.u32 %v7794_v21, %v6832_v22  ;;  %v7892_v18 = vld [vmem:[%s10851_s7 + $0x644] sm:$0xf]  ;;  %v7909_v21 = vld [vmem:[%s10851_s7 + $0x6c4] sm:$0xf0] }
 0x2d5   : > { %4802 = vmatpush.bf16.msra.mxu1 %v7071_v32  ;;  %4816 = vmatpush.bf16.msra.mxu2 %v7075_v33  ;;  %v7344_v32 = vld [vmem:[%s10851_s7 + $0x7b0] sm:$0xf0]  ;;  %v7350_v33 = vld [vmem:[%s10851_s7 + $0x738] sm:$0xf]  ;;  %v7893_v22 = vld [vmem:[%s10851_s7 + $0x64c] sm:$0xf] }
 0x2d6   : > { %4830 = vmatpush.bf16.msrb.mxu0 %v7079_v36  ;;  %4844 = vmatpush.bf16.msrb.mxu3 %v7083_v38  ;;  %v7939_v36 = vld [vmem:[%s10851_s7 + $0x7b4] sm:$0xf0]  ;;  %v7923_v38 = vld [vmem:[%s10851_s7 + $0x73c] sm:$0xf]  ;;  %v7347_v43 = vor.u32 %v7922_v31, %v7344_v32  ;;  %v7762_v32 = vld [vmem:[%s10851_s7 + $0x234] sm:$0xf] }
 0x2d7   : > { %v7355_v47 = vor.u32 %v7923_v38, %v7352_v39  ;;  %v6712_v38 = vld [vmem:[%s10851_s7 + $0x2b8] sm:$0xf0]  ;;  %v6703_v39 = vor.u32 %v7778_v29, %v6702_v28  ;;  %v7860_v29 = vld [vmem:[%s10851_s7 + $0x544] sm:$0xf] }
 0x2d9   : > { %4803 = vmatpush.bf16.msra.mxu1 %v6943_v45  ;;  %4817 = vmatpush.bf16.msra.mxu2 %v6947_v46  ;;  %v7906_v45 = vld [vmem:[%s10851_s7 + $0x6ac] sm:$0xf0]  ;;  %v7351_v46 = vor.u32 %v7939_v36, %v7350_v33  ;;  %v6704_v33 = vld [vmem:[%s10851_s7 + $0x2b0] sm:$0xf0]  ;;  %v7763_v36 = vld [vmem:[%s10851_s7 + $0x23c] sm:$0xf] }
 0x2da   : > { %4831 = vmatpush.bf16.msrb.mxu0 %v6951_v49  ;;  %4845 = vmatpush.bf16.msrb.mxu3 %v6955_v50  ;;  %v7216_v49 = vld [vmem:[%s10851_s7 + $0x6b0] sm:$0xf0]  ;;  %v7222_v50 = vld [vmem:[%s10851_s7 + $0x638] sm:$0xf]  ;;  %v7215_v54 = vor.u32 %v7906_v45, %v7214_v44  ;;  %v6715_v44 = vor.u32 %v7763_v36, %v6712_v38  ;;  %v6974_v38 = vld [vmem:[%s10851_s7 + $0x440] sm:$0xf] }
 0x2db   : > { %4752 = vmatmul.bf16.vlgmr.msrb.gmra.mxu1 %v9506_v9  ;;  %4766 = vmatmul.bf16.vlgmr.msrb.gmra.mxu2 %v9506_v9  ;;  %v7219_v55 = vor.u32 %v7890_v48, %v7216_v49  ;;  %v7730_v45 = vld [vmem:[%s10851_s7 + $0x134] sm:$0xf]  ;;  %v7747_v48 = vld [vmem:[%s10851_s7 + $0x1b4] sm:$0xf0]  ;;  %v7731_v49 = vld [vmem:[%s10851_s7 + $0x13c] sm:$0xf] }
 0x2dc   : > { %4780 = vmatmul.bf16.vlgmr.msra.gmra.mxu0 %v9506_v9  ;;  %4794 = vmatmul.bf16.vlgmr.msra.gmra.mxu3 %v9506_v9 }
 0x2dd   : > { %4804 = vmatpush.bf16.msra.mxu1 %v6815_v57  ;;  %4818 = vmatpush.bf16.msra.mxu2 %v6819_v58  ;;  %v7874_v57 = vld [vmem:[%s10851_s7 + $0x5ac] sm:$0xf0]  ;;  %v7223_v58 = vor.u32 %v7907_v51, %v7222_v50  ;;  %v6584_v50 = vld [vmem:[%s10851_s7 + $0x1b8] sm:$0xf0] }
 0x2de   : > { %4832 = vmatpush.bf16.msrb.mxu0 %v6823_v62  ;;  %4846 = vmatpush.bf16.msrb.mxu3 %v6827_v63  ;;  %v7088_v62 = vld [vmem:[%s10851_s7 + $0x5b0] sm:$0xf0]  ;;  %v7094_v63 = vld [vmem:[%s10851_s7 + $0x538] sm:$0xf]  ;;  %v7087_v3 = vor.u32 %v7874_v57, %v7086_v56  ;;  %v6446_v51 = vld [vmem:[%s10851_s7 + $0x30] sm:$0xf] }
 0x2df   : > { %v7091_v4 = vor.u32 %v7858_v61, %v7088_v62  ;;  %v6448_v56 = vld [vmem:[%s10851_s7 + $0xb0] sm:$0xf0]  ;;  %v7715_v61 = vld [vmem:[%s10851_s7 + $0xb4] sm:$0xf0]  ;;  %v7699_v62 = vld [vmem:[%s10851_s7 + $0x3c] sm:$0xf] }
 0x2e1   : > { %4805 = vmatpush.bf16.msra.mxu1 %v6687_v6  ;;  %4819 = vmatpush.bf16.msra.mxu2 %v6691_v7  ;;  %v7842_v6 = vld [vmem:[%s10851_s7 + $0x4ac] sm:$0xf0]  ;;  %v7095_v7 = vor.u32 %v7875_v0, %v7094_v63  ;;  %v6456_v63 = vld [vmem:[%s10851_s7 + $0xb8] sm:$0xf0]  ;;  %v7358_v0 = vld [vmem:[%s10851_s7 + $0x740] sm:$0xf] }
 0x2e2   : > { %4833 = vmatpush.bf16.msrb.mxu0 %v6695_v11  ;;  %4847 = vmatpush.bf16.msrb.mxu3 %v6699_v12  ;;  %v6960_v11 = vld [vmem:[%s10851_s7 + $0x4b0] sm:$0xf0]  ;;  %v6966_v12 = vld [vmem:[%s10851_s7 + $0x438] sm:$0xf]  ;;  %v6959_v16 = vor.u32 %v7842_v6, %v6958_v5 }
 0x2e3   : > { %v6963_v37 = vor.u32 %v7826_v10, %v6960_v11  ;;  %v7368_v10 = vld [vmem:[%s10851_s7 + $0x7c8] sm:$0xf0] }
 0x2e5   : > { %4806 = vmatpush.bf16.msra.mxu1 %v6559_v19  ;;  %4820 = vmatpush.bf16.msra.mxu2 %v6563_v20  ;;  %v6967_v19 = vor.u32 %v7843_v13, %v6966_v12  ;;  %v6971_v20 = vor.u32 %v7827_v14, %v6968_v15  ;;  %v6459_v12 = vor.u32 %v7699_v62, %v6456_v63  ;;  %v7230_v15 = vld [vmem:[%s10851_s7 + $0x640] sm:$0xf] }
 0x2e6   : > { %4834 = vmatpush.bf16.msrb.mxu0 %v6567_v24  ;;  %4848 = vmatpush.bf16.msrb.mxu3 %v6571_v59  ;;  %v7811_v24 = vld [vmem:[%s10851_s7 + $0x3b4] sm:$0xf0]  ;;  %v7795_v59 = vld [vmem:[%s10851_s7 + $0x33c] sm:$0xf]  ;;  %v7359_v13 = vor.u32 %v7940_v1, %v7358_v0  ;;  %v6718_v63 = vld [vmem:[%s10851_s7 + $0x240] sm:$0xf] }
 0x2e7   : > { %v6839_v30 = vor.u32 %v7811_v24, %v6838_v23  ;;  %v6843_v31 = vor.u32 %v7795_v59, %v6840_v25  ;;  %v7240_v23 = vld [vmem:[%s10851_s7 + $0x6c8] sm:$0xf0]  ;;  %v7102_v25 = vld [vmem:[%s10851_s7 + $0x540] sm:$0xf] }
 0x2e8   : > { %v7243_v28 = vor.u32 %v7893_v22, %v7240_v23  ;;  %v7780_v0 = vld [vmem:[%s10851_s7 + $0x2bc] sm:$0xf0] }
 0x2e9   : > { %4807 = vmatpush.bf16.msra.mxu1 %v6431_v34  ;;  %4821 = vmatpush.bf16.msra.mxu2 %v6435_v35  ;;  %v6710_v34 = vld [vmem:[%s10851_s7 + $0x238] sm:$0xf] }
 0x2ea   : > { %4835 = vmatpush.bf16.msrb.mxu0 %v6439_v40  ;;  %4849 = vmatpush.bf16.msrb.mxu3 %v6443_v41  ;;  %v7779_v35 = vld [vmem:[%s10851_s7 + $0x2b4] sm:$0xf0]  ;;  %v6707_v40 = vor.u32 %v7762_v32, %v6704_v33  ;;  %v6574_v41 = vld [vmem:[%s10851_s7 + $0x130] sm:$0xf]  ;;  %v7877_v32 = vld [vmem:[%s10851_s7 + $0x5c4] sm:$0xf0] }
 0x2eb   : > { %v7861_v33 = vld [vmem:[%s10851_s7 + $0x54c] sm:$0xf] }
 0x2ec   : > { %4808 = vmatmul.bf16.vlgmr.msra.gmra.mxu1 %v9506_v9  ;;  %4822 = vmatmul.bf16.vlgmr.msra.gmra.mxu2 %v9506_v9 }
 0x2ed   : > { %4856 = vmatpush.bf16.msrb.mxu1 %v7343_v42  ;;  %4870 = vmatpush.bf16.msrb.mxu2 %v7347_v43  ;;  %v7746_v42 = vld [vmem:[%s10851_s7 + $0x1ac] sm:$0xf0]  ;;  %v6711_v43 = vor.u32 %v7779_v35, %v6710_v34  ;;  %v7112_v34 = vld [vmem:[%s10851_s7 + $0x5c8] sm:$0xf0] }
 0x2ee   : > { %4884 = vmatpush.bf16.msra.mxu0 %v7351_v46  ;;  %4898 = vmatpush.bf16.msra.mxu3 %v7355_v47  ;;  %v6576_v46 = vld [vmem:[%s10851_s7 + $0x1b0] sm:$0xf0]  ;;  %v6582_v47 = vld [vmem:[%s10851_s7 + $0x138] sm:$0xf]  ;;  %v6575_v52 = vor.u32 %v7746_v42, %v6574_v41  ;;  %v7115_v41 = vor.u32 %v7861_v33, %v7112_v34  ;;  %v7828_v42 = vld [vmem:[%s10851_s7 + $0x444] sm:$0xf] }
 0x2ef   : > { %4836 = vmatmul.bf16.vlgmr.msrb.gmra.mxu0 %v9506_v9  ;;  %4850 = vmatmul.bf16.vlgmr.msrb.gmra.mxu3 %v9506_v9  ;;  %v6579_v53 = vor.u32 %v7730_v45, %v6576_v46  ;;  %v6583_v57 = vor.u32 %v7747_v48, %v6582_v47  ;;  %v7845_v45 = vld [vmem:[%s10851_s7 + $0x4c4] sm:$0xf0]  ;;  %v7829_v46 = vld [vmem:[%s10851_s7 + $0x44c] sm:$0xf]  ;;  %v7942_v33 = vld [vmem:[%s10851_s7 + $0x7cc] sm:$0xf0] }
 0x2f0   : > { %v6984_v47 = vld [vmem:[%s10851_s7 + $0x4c8] sm:$0xf0]  ;;  %v7926_v34 = vld [vmem:[%s10851_s7 + $0x754] sm:$0xf] }
 0x2f1   : > { %4857 = vmatpush.bf16.msrb.mxu1 %v7215_v54  ;;  %4871 = vmatpush.bf16.msrb.mxu2 %v7219_v55  ;;  %v7714_v54 = vld [vmem:[%s10851_s7 + $0xac] sm:$0xf0]  ;;  %v7698_v55 = vld [vmem:[%s10851_s7 + $0x34] sm:$0xf] }
 0x2f2   : > { %4885 = vmatpush.bf16.msra.mxu0 %v7223_v58  ;;  %4899 = vmatpush.bf16.msra.mxu3 %v7227_v60  ;;  %v6587_v58 = vor.u32 %v7731_v49, %v6584_v50  ;;  %v6454_v60 = vld [vmem:[%s10851_s7 + $0x38] sm:$0xf]  ;;  %v6447_v5 = vor.u32 %v7714_v54, %v6446_v51  ;;  %v6451_v6 = vor.u32 %v7698_v55, %v6448_v56  ;;  %v6846_v50 = vld [vmem:[%s10851_s7 + $0x340] sm:$0xf]  ;;  %v7796_v54 = vld [vmem:[%s10851_s7 + $0x344] sm:$0xf] }
 0x2f3   : > { %v6455_v11 = vor.u32 %v7715_v61, %v6454_v60  ;;  %v7812_v51 = vld [vmem:[%s10851_s7 + $0x3bc] sm:$0xf0]  ;;  %v6848_v55 = vld [vmem:[%s10851_s7 + $0x3c0] sm:$0xf0]  ;;  %v6854_v56 = vld [vmem:[%s10851_s7 + $0x348] sm:$0xf] }
 0x2f4   : > { %v6856_v60 = vld [vmem:[%s10851_s7 + $0x3c8] sm:$0xf0]  ;;  %v6847_v61 = vor.u32 %v7812_v51, %v6846_v50  ;;  %v6851_v62 = vor.u32 %v7796_v54, %v6848_v55  ;;  %v7894_v51 = vld [vmem:[%s10851_s7 + $0x654] sm:$0xf]  ;;  %v7911_v54 = vld [vmem:[%s10851_s7 + $0x6d4] sm:$0xf0] }
 0x2f5   : > { %4858 = vmatpush.bf16.msrb.mxu1 %v7087_v3  ;;  %4872 = vmatpush.bf16.msrb.mxu2 %v7091_v4  ;;  %v7360_v3 = vld [vmem:[%s10851_s7 + $0x7c0] sm:$0xf0]  ;;  %v7366_v4 = vld [vmem:[%s10851_s7 + $0x748] sm:$0xf]  ;;  %v7895_v55 = vld [vmem:[%s10851_s7 + $0x65c] sm:$0xf] }
 0x2f6   : > { %4886 = vmatpush.bf16.msra.mxu0 %v7095_v7  ;;  %4900 = vmatpush.bf16.msra.mxu3 %v7099_v8  ;;  %v7941_v7 = vld [vmem:[%s10851_s7 + $0x7c4] sm:$0xf0]  ;;  %v7925_v8 = vld [vmem:[%s10851_s7 + $0x74c] sm:$0xf]  ;;  %v7363_v14 = vor.u32 %v7924_v2, %v7360_v3  ;;  %v7764_v3 = vld [vmem:[%s10851_s7 + $0x244] sm:$0xf] }
 0x2f7   : > { %v7371_v17 = vor.u32 %v7925_v8, %v7368_v10  ;;  %v6728_v8 = vld [vmem:[%s10851_s7 + $0x2c8] sm:$0xf0]  ;;  %v6719_v10 = vor.u32 %v7780_v0, %v6718_v63  ;;  %v7862_v0 = vld [vmem:[%s10851_s7 + $0x554] sm:$0xf] }
 0x2f9   : > { %4859 = vmatpush.bf16.msrb.mxu1 %v6959_v16  ;;  %4873 = vmatpush.bf16.msrb.mxu2 %v6963_v37  ;;  %v7908_v16 = vld [vmem:[%s10851_s7 + $0x6bc] sm:$0xf0]  ;;  %v7367_v37 = vor.u32 %v7941_v7, %v7366_v4  ;;  %v6720_v4 = vld [vmem:[%s10851_s7 + $0x2c0] sm:$0xf0]  ;;  %v7765_v7 = vld [vmem:[%s10851_s7 + $0x24c] sm:$0xf] }
 0x2fa   : > { %4887 = vmatpush.bf16.msra.mxu0 %v6967_v19  ;;  %4901 = vmatpush.bf16.msra.mxu3 %v6971_v20  ;;  %v7232_v19 = vld [vmem:[%s10851_s7 + $0x6c0] sm:$0xf0]  ;;  %v7238_v20 = vld [vmem:[%s10851_s7 + $0x648] sm:$0xf]  ;;  %v7231_v24 = vor.u32 %v7908_v16, %v7230_v15  ;;  %v6731_v15 = vor.u32 %v7765_v7, %v6728_v8  ;;  %v6990_v8 = vld [vmem:[%s10851_s7 + $0x450] sm:$0xf] }
 0x2fb   : > { %v7235_v59 = vor.u32 %v7892_v18, %v7232_v19  ;;  %v7732_v16 = vld [vmem:[%s10851_s7 + $0x144] sm:$0xf]  ;;  %v7749_v18 = vld [vmem:[%s10851_s7 + $0x1c4] sm:$0xf0]  ;;  %v7733_v19 = vld [vmem:[%s10851_s7 + $0x14c] sm:$0xf] }
 0x2fd   : > { %4860 = vmatpush.bf16.msrb.mxu1 %v6831_v26  ;;  %4874 = vmatpush.bf16.msrb.mxu2 %v6835_v27  ;;  %v7876_v26 = vld [vmem:[%s10851_s7 + $0x5bc] sm:$0xf0]  ;;  %v7239_v27 = vor.u32 %v7909_v21, %v7238_v20  ;;  %v6600_v20 = vld [vmem:[%s10851_s7 + $0x1c8] sm:$0xf0] }
 0x2fe   : > { %4888 = vmatpush.bf16.msra.mxu0 %v6839_v30  ;;  %4902 = vmatpush.bf16.msra.mxu3 %v6843_v31  ;;  %v7104_v30 = vld [vmem:[%s10851_s7 + $0x5c0] sm:$0xf0]  ;;  %v7110_v31 = vld [vmem:[%s10851_s7 + $0x548] sm:$0xf]  ;;  %v7103_v35 = vor.u32 %v7876_v26, %v7102_v25  ;;  %v6462_v21 = vld [vmem:[%s10851_s7 + $0x40] sm:$0xf] }
 0x2ff   : > { %v7107_v36 = vor.u32 %v7860_v29, %v7104_v30  ;;  %v6464_v25 = vld [vmem:[%s10851_s7 + $0xc0] sm:$0xf0]  ;;  %v7717_v29 = vld [vmem:[%s10851_s7 + $0xc4] sm:$0xf0]  ;;  %v7701_v30 = vld [vmem:[%s10851_s7 + $0x4c] sm:$0xf] }
 0x301   : > { %4861 = vmatpush.bf16.msrb.mxu1 %v6703_v39  ;;  %4875 = vmatpush.bf16.msrb.mxu2 %v6707_v40  ;;  %v7844_v39 = vld [vmem:[%s10851_s7 + $0x4bc] sm:$0xf0]  ;;  %v7111_v40 = vor.u32 %v7877_v32, %v7110_v31  ;;  %v6472_v31 = vld [vmem:[%s10851_s7 + $0xc8] sm:$0xf0]  ;;  %v7374_v32 = vld [vmem:[%s10851_s7 + $0x750] sm:$0xf] }
 0x302   : > { %4889 = vmatpush.bf16.msra.mxu0 %v6711_v43  ;;  %4903 = vmatpush.bf16.msra.mxu3 %v6715_v44  ;;  %v6976_v43 = vld [vmem:[%s10851_s7 + $0x4c0] sm:$0xf0]  ;;  %v6982_v44 = vld [vmem:[%s10851_s7 + $0x448] sm:$0xf]  ;;  %v6975_v48 = vor.u32 %v7844_v39, %v6974_v38 }
 0x303   : > { %v6979_v49 = vor.u32 %v7828_v42, %v6976_v43  ;;  %v7384_v42 = vld [vmem:[%s10851_s7 + $0x7d8] sm:$0xf0] }
 0x305   : > { %4862 = vmatpush.bf16.msrb.mxu1 %v6575_v52  ;;  %4876 = vmatpush.bf16.msrb.mxu2 %v6579_v53  ;;  %v6983_v52 = vor.u32 %v7845_v45, %v6982_v44  ;;  %v6987_v53 = vor.u32 %v7829_v46, %v6984_v47  ;;  %v6475_v44 = vor.u32 %v7701_v30, %v6472_v31  ;;  %v7246_v47 = vld [vmem:[%s10851_s7 + $0x650] sm:$0xf] }
 0x306   : > { %4890 = vmatpush.bf16.msra.mxu0 %v6583_v57  ;;  %4904 = vmatpush.bf16.msra.mxu3 %v6587_v58  ;;  %v7813_v57 = vld [vmem:[%s10851_s7 + $0x3c4] sm:$0xf0]  ;;  %v7797_v58 = vld [vmem:[%s10851_s7 + $0x34c] sm:$0xf]  ;;  %v7375_v45 = vor.u32 %v7942_v33, %v7374_v32  ;;  %v6734_v31 = vld [vmem:[%s10851_s7 + $0x250] sm:$0xf] }
 0x307   : > { %v6855_v1 = vor.u32 %v7813_v57, %v6854_v56  ;;  %v6859_v2 = vor.u32 %v7797_v58, %v6856_v60  ;;  %v7256_v56 = vld [vmem:[%s10851_s7 + $0x6d8] sm:$0xf0]  ;;  %v7118_v60 = vld [vmem:[%s10851_s7 + $0x550] sm:$0xf] }
 0x308   : > { %v7259_v63 = vor.u32 %v7895_v55, %v7256_v56  ;;  %v7782_v32 = vld [vmem:[%s10851_s7 + $0x2cc] sm:$0xf0] }
 0x309   : > { %4863 = vmatpush.bf16.msrb.mxu1 %v6447_v5  ;;  %4877 = vmatpush.bf16.msrb.mxu2 %v6451_v6  ;;  %v6726_v5 = vld [vmem:[%s10851_s7 + $0x248] sm:$0xf] }
 0x30a   : > { %4891 = vmatpush.bf16.msra.mxu0 %v6455_v11  ;;  %4905 = vmatpush.bf16.msra.mxu3 %v6459_v12  ;;  %v7781_v6 = vld [vmem:[%s10851_s7 + $0x2c4] sm:$0xf0]  ;;  %v6723_v11 = vor.u32 %v7764_v3, %v6720_v4  ;;  %v6590_v12 = vld [vmem:[%s10851_s7 + $0x140] sm:$0xf]  ;;  %v7879_v3 = vld [vmem:[%s10851_s7 + $0x5d4] sm:$0xf0] }
 0x30b   : > { %v7863_v4 = vld [vmem:[%s10851_s7 + $0x55c] sm:$0xf] }
 0x30c   : > { %4864 = vmatmul.bf16.vlgmr.msrb.gmra.mxu1 %v9506_v9  ;;  %4878 = vmatmul.bf16.vlgmr.msrb.gmra.mxu2 %v9506_v9 }
 0x30d   : > { %4912 = vmatpush.bf16.msra.mxu1 %v7359_v13  ;;  %4926 = vmatpush.bf16.msra.mxu2 %v7363_v14  ;;  %v7748_v13 = vld [vmem:[%s10851_s7 + $0x1bc] sm:$0xf0]  ;;  %v6727_v14 = vor.u32 %v7781_v6, %v6726_v5  ;;  %v7128_v5 = vld [vmem:[%s10851_s7 + $0x5d8] sm:$0xf0] }
 0x30e   : > { %4940 = vmatpush.bf16.msrb.mxu0 %v7367_v37  ;;  %4954 = vmatpush.bf16.msrb.mxu3 %v7371_v17  ;;  %v6592_v37 = vld [vmem:[%s10851_s7 + $0x1c0] sm:$0xf0]  ;;  %v6598_v17 = vld [vmem:[%s10851_s7 + $0x148] sm:$0xf]  ;;  %v6591_v22 = vor.u32 %v7748_v13, %v6590_v12  ;;  %v7131_v12 = vor.u32 %v7863_v4, %v7128_v5  ;;  %v7830_v13 = vld [vmem:[%s10851_s7 + $0x454] sm:$0xf] }
 0x30f   : > { %4892 = vmatmul.bf16.vlgmr.msra.gmra.mxu0 %v9506_v9  ;;  %4906 = vmatmul.bf16.vlgmr.msra.gmra.mxu3 %v9506_v9  ;;  %v6595_v23 = vor.u32 %v7732_v16, %v6592_v37  ;;  %v6599_v26 = vor.u32 %v7749_v18, %v6598_v17  ;;  %v7847_v16 = vld [vmem:[%s10851_s7 + $0x4d4] sm:$0xf0]  ;;  %v7831_v37 = vld [vmem:[%s10851_s7 + $0x45c] sm:$0xf]  ;;  %v7944_v4 = vld [vmem:[%s10851_s7 + $0x7dc] sm:$0xf0] }
 0x310   : > { %v7000_v17 = vld [vmem:[%s10851_s7 + $0x4d8] sm:$0xf0]  ;;  %v7928_v5 = vld [vmem:[%s10851_s7 + $0x764] sm:$0xf] }
 0x311   : > { %4913 = vmatpush.bf16.msra.mxu1 %v7231_v24  ;;  %4927 = vmatpush.bf16.msra.mxu2 %v7235_v59  ;;  %v7716_v24 = vld [vmem:[%s10851_s7 + $0xbc] sm:$0xf0]  ;;  %v7700_v59 = vld [vmem:[%s10851_s7 + $0x44] sm:$0xf] }
 0x312   : > { %4941 = vmatpush.bf16.msrb.mxu0 %v7239_v27  ;;  %4955 = vmatpush.bf16.msrb.mxu3 %v7243_v28  ;;  %v6603_v27 = vor.u32 %v7733_v19, %v6600_v20  ;;  %v6470_v28 = vld [vmem:[%s10851_s7 + $0x48] sm:$0xf]  ;;  %v6463_v38 = vor.u32 %v7716_v24, %v6462_v21  ;;  %v6467_v39 = vor.u32 %v7700_v59, %v6464_v25  ;;  %v6862_v20 = vld [vmem:[%s10851_s7 + $0x350] sm:$0xf]  ;;  %v7798_v24 = vld [vmem:[%s10851_s7 + $0x354] sm:$0xf] }
 0x313   : > { %v6471_v43 = vor.u32 %v7717_v29, %v6470_v28  ;;  %v7814_v21 = vld [vmem:[%s10851_s7 + $0x3cc] sm:$0xf0]  ;;  %v6864_v59 = vld [vmem:[%s10851_s7 + $0x3d0] sm:$0xf0]  ;;  %v6870_v25 = vld [vmem:[%s10851_s7 + $0x358] sm:$0xf] }
 0x314   : > { %v6872_v28 = vld [vmem:[%s10851_s7 + $0x3d8] sm:$0xf0]  ;;  %v6863_v29 = vor.u32 %v7814_v21, %v6862_v20  ;;  %v6867_v30 = vor.u32 %v7798_v24, %v6864_v59  ;;  %v7896_v21 = vld [vmem:[%s10851_s7 + $0x664] sm:$0xf]  ;;  %v7913_v24 = vld [vmem:[%s10851_s7 + $0x6e4] sm:$0xf0] }
 0x315   : > { %4914 = vmatpush.bf16.msra.mxu1 %v7103_v35  ;;  %4928 = vmatpush.bf16.msra.mxu2 %v7107_v36  ;;  %v7376_v35 = vld [vmem:[%s10851_s7 + $0x7d0] sm:$0xf0]  ;;  %v7382_v36 = vld [vmem:[%s10851_s7 + $0x758] sm:$0xf]  ;;  %v7897_v59 = vld [vmem:[%s10851_s7 + $0x66c] sm:$0xf] }
 0x316   : > { %4942 = vmatpush.bf16.msrb.mxu0 %v7111_v40  ;;  %4956 = vmatpush.bf16.msrb.mxu3 %v7115_v41  ;;  %v7943_v40 = vld [vmem:[%s10851_s7 + $0x7d4] sm:$0xf0]  ;;  %v7927_v41 = vld [vmem:[%s10851_s7 + $0x75c] sm:$0xf]  ;;  %v7379_v46 = vor.u32 %v7926_v34, %v7376_v35  ;;  %v7766_v35 = vld [vmem:[%s10851_s7 + $0x254] sm:$0xf] }
 0x317   : > { %v7387_v50 = vor.u32 %v7927_v41, %v7384_v42  ;;  %v6744_v41 = vld [vmem:[%s10851_s7 + $0x2d8] sm:$0xf0]  ;;  %v6735_v42 = vor.u32 %v7782_v32, %v6734_v31  ;;  %v7864_v32 = vld [vmem:[%s10851_s7 + $0x564] sm:$0xf] }
 0x319   : > { %4915 = vmatpush.bf16.msra.mxu1 %v6975_v48  ;;  %4929 = vmatpush.bf16.msra.mxu2 %v6979_v49  ;;  %v7910_v48 = vld [vmem:[%s10851_s7 + $0x6cc] sm:$0xf0]  ;;  %v7383_v49 = vor.u32 %v7943_v40, %v7382_v36  ;;  %v6736_v36 = vld [vmem:[%s10851_s7 + $0x2d0] sm:$0xf0]  ;;  %v7767_v40 = vld [vmem:[%s10851_s7 + $0x25c] sm:$0xf] }
 0x31a   : > { %4943 = vmatpush.bf16.msrb.mxu0 %v6983_v52  ;;  %4957 = vmatpush.bf16.msrb.mxu3 %v6987_v53  ;;  %v7248_v52 = vld [vmem:[%s10851_s7 + $0x6d0] sm:$0xf0]  ;;  %v7254_v53 = vld [vmem:[%s10851_s7 + $0x658] sm:$0xf]  ;;  %v7247_v57 = vor.u32 %v7910_v48, %v7246_v47  ;;  %v6747_v47 = vor.u32 %v7767_v40, %v6744_v41 }
 0x31b   : > { %v7251_v58 = vor.u32 %v7894_v51, %v7248_v52  ;;  %v7734_v48 = vld [vmem:[%s10851_s7 + $0x154] sm:$0xf]  ;;  %v7751_v51 = vld [vmem:[%s10851_s7 + $0x1d4] sm:$0xf0]  ;;  %v7735_v52 = vld [vmem:[%s10851_s7 + $0x15c] sm:$0xf] }
 0x31d   : > { %4916 = vmatpush.bf16.msra.mxu1 %v6847_v61  ;;  %4930 = vmatpush.bf16.msra.mxu2 %v6851_v62  ;;  %v7878_v61 = vld [vmem:[%s10851_s7 + $0x5cc] sm:$0xf0]  ;;  %v7255_v62 = vor.u32 %v7911_v54, %v7254_v53  ;;  %v6616_v53 = vld [vmem:[%s10851_s7 + $0x1d8] sm:$0xf0] }
 0x31e   : > { %4944 = vmatpush.bf16.msrb.mxu0 %v6855_v1  ;;  %4958 = vmatpush.bf16.msrb.mxu3 %v6859_v2  ;;  %v7120_v1 = vld [vmem:[%s10851_s7 + $0x5d0] sm:$0xf0]  ;;  %v7126_v2 = vld [vmem:[%s10851_s7 + $0x558] sm:$0xf]  ;;  %v7119_v6 = vor.u32 %v7878_v61, %v7118_v60  ;;  %v6478_v54 = vld [vmem:[%s10851_s7 + $0x50] sm:$0xf] }
 0x31f   : > { %v7123_v7 = vor.u32 %v7862_v0, %v7120_v1  ;;  %v6480_v60 = vld [vmem:[%s10851_s7 + $0xd0] sm:$0xf0]  ;;  %v7719_v0 = vld [vmem:[%s10851_s7 + $0xd4] sm:$0xf0]  ;;  %v7703_v1 = vld [vmem:[%s10851_s7 + $0x5c] sm:$0xf] }
 0x321   : > { %4917 = vmatpush.bf16.msra.mxu1 %v6719_v10  ;;  %4931 = vmatpush.bf16.msra.mxu2 %v6723_v11  ;;  %v7846_v10 = vld [vmem:[%s10851_s7 + $0x4cc] sm:$0xf0]  ;;  %v7127_v11 = vor.u32 %v7879_v3, %v7126_v2  ;;  %v6488_v2 = vld [vmem:[%s10851_s7 + $0xd8] sm:$0xf0]  ;;  %v7390_v3 = vld [vmem:[%s10851_s7 + $0x760] sm:$0xf] }
 0x322   : > { %4945 = vmatpush.bf16.msrb.mxu0 %v6727_v14  ;;  %4959 = vmatpush.bf16.msrb.mxu3 %v6731_v15  ;;  %v6992_v14 = vld [vmem:[%s10851_s7 + $0x4d0] sm:$0xf0]  ;;  %v6998_v15 = vld [vmem:[%s10851_s7 + $0x458] sm:$0xf]  ;;  %v6991_v18 = vor.u32 %v7846_v10, %v6990_v8 }
 0x323   : > { %v6995_v19 = vor.u32 %v7830_v13, %v6992_v14  ;;  %v7400_v13 = vld [vmem:[%s10851_s7 + $0x7e8] sm:$0xf0] }
 0x325   : > { %4918 = vmatpush.bf16.msra.mxu1 %v6591_v22  ;;  %4932 = vmatpush.bf16.msra.mxu2 %v6595_v23  ;;  %v6999_v22 = vor.u32 %v7847_v16, %v6998_v15  ;;  %v7003_v23 = vor.u32 %v7831_v37, %v7000_v17  ;;  %v6491_v15 = vor.u32 %v7703_v1, %v6488_v2  ;;  %v7262_v17 = vld [vmem:[%s10851_s7 + $0x660] sm:$0xf]  ;;  %v7800_v2 = vld [vmem:[%s10851_s7 + $0x364] sm:$0xf] }
 0x326   : > { %4946 = vmatpush.bf16.msrb.mxu0 %v6599_v26  ;;  %4960 = vmatpush.bf16.msrb.mxu3 %v6603_v27  ;;  %v7815_v26 = vld [vmem:[%s10851_s7 + $0x3d4] sm:$0xf0]  ;;  %v7799_v27 = vld [vmem:[%s10851_s7 + $0x35c] sm:$0xf]  ;;  %v7391_v16 = vor.u32 %v7944_v4, %v7390_v3  ;;  %v6880_v3 = vld [vmem:[%s10851_s7 + $0x3e0] sm:$0xf0] }
 0x327   : > { %v6871_v33 = vor.u32 %v7815_v26, %v6870_v25  ;;  %v6875_v34 = vor.u32 %v7799_v27, %v6872_v28  ;;  %v7272_v25 = vld [vmem:[%s10851_s7 + $0x6e8] sm:$0xf0]  ;;  %v7134_v28 = vld [vmem:[%s10851_s7 + $0x560] sm:$0xf]  ;;  %v6886_v4 = vld [vmem:[%s10851_s7 + $0x368] sm:$0xf] }
 0x328   : > { %v7275_v31 = vor.u32 %v7897_v59, %v7272_v25  ;;  %v6758_v59 = vld [vmem:[%s10851_s7 + $0x268] sm:$0xf] }
 0x329   : > { %4919 = vmatpush.bf16.msra.mxu1 %v6463_v38  ;;  %4933 = vmatpush.bf16.msra.mxu2 %v6467_v39  ;;  %v6742_v38 = vld [vmem:[%s10851_s7 + $0x258] sm:$0xf]  ;;  %v7785_v25 = vld [vmem:[%s10851_s7 + $0x2e4] sm:$0xf0] }
 0x32a   : > { %4947 = vmatpush.bf16.msrb.mxu0 %v6471_v43  ;;  %4961 = vmatpush.bf16.msrb.mxu3 %v6475_v44  ;;  %v7783_v39 = vld [vmem:[%s10851_s7 + $0x2d4] sm:$0xf0]  ;;  %v6739_v43 = vor.u32 %v7766_v35, %v6736_v36  ;;  %v6606_v44 = vld [vmem:[%s10851_s7 + $0x150] sm:$0xf]  ;;  %v7881_v35 = vld [vmem:[%s10851_s7 + $0x5e4] sm:$0xf0] }
 0x32b   : > { %v7865_v36 = vld [vmem:[%s10851_s7 + $0x56c] sm:$0xf] }
 0x32c   : > { %4920 = vmatmul.bf16.vlgmr.msra.gmra.mxu1 %v9506_v9  ;;  %4934 = vmatmul.bf16.vlgmr.msra.gmra.mxu2 %v9506_v9 }
 0x32d   : > { %4968 = vmatpush.bf16.msrb.mxu1 %v7375_v45  ;;  %4982 = vmatpush.bf16.msrb.mxu2 %v7379_v46  ;;  %v7750_v45 = vld [vmem:[%s10851_s7 + $0x1cc] sm:$0xf0]  ;;  %v6743_v46 = vor.u32 %v7783_v39, %v6742_v38  ;;  %v7144_v38 = vld [vmem:[%s10851_s7 + $0x5e8] sm:$0xf0]  ;;  %v10351_v39 = vld [vmem:[%s10852_s8] sm:$0xff] }
 0x32e   : > { %4996 = vmatpush.bf16.msra.mxu0 %v7383_v49  ;;  %5010 = vmatpush.bf16.msra.mxu3 %v7387_v50  ;;  %v6608_v49 = vld [vmem:[%s10851_s7 + $0x1d0] sm:$0xf0]  ;;  %v6614_v50 = vld [vmem:[%s10851_s7 + $0x158] sm:$0xf]  ;;  %v6607_v55 = vor.u32 %v7750_v45, %v6606_v44  ;;  %v7006_v44 = vld [vmem:[%s10851_s7 + $0x460] sm:$0xf] }
 0x32f   : > { %4948 = vmatmul.bf16.vlgmr.msrb.gmra.mxu0 %v9506_v9  ;;  %4962 = vmatmul.bf16.vlgmr.msrb.gmra.mxu3 %v9506_v9  ;;  %v6611_v56 = vor.u32 %v7734_v48, %v6608_v49  ;;  %v6615_v61 = vor.u32 %v7751_v51, %v6614_v50  ;;  %v7848_v45 = vld [vmem:[%s10851_s7 + $0x4dc] sm:$0xf0]  ;;  %v7147_v48 = vor.u32 %v7865_v36, %v7144_v38  ;;  %v7008_v49 = vld [vmem:[%s10851_s7 + $0x4e0] sm:$0xf0]  ;;  %v7014_v50 = vld [vmem:[%s10851_s7 + $0x468] sm:$0xf] }
 0x330   : > { %v7849_v51 = vld [vmem:[%s10851_s7 + $0x4e4] sm:$0xf0]  ;;  %v6624_v36 = vld [vmem:[%s10851_s7 + $0x1e0] sm:$0xf0] }
 0x331   : > { %4969 = vmatpush.bf16.msrb.mxu1 %v7247_v57  ;;  %4983 = vmatpush.bf16.msrb.mxu2 %v7251_v58  ;;  %v7718_v57 = vld [vmem:[%s10851_s7 + $0xcc] sm:$0xf0]  ;;  %v7702_v58 = vld [vmem:[%s10851_s7 + $0x54] sm:$0xf]  ;;  %v6630_v38 = vld [vmem:[%s10851_s7 + $0x168] sm:$0xf] }
 0x332   : > { %4997 = vmatpush.bf16.msra.mxu0 %v7255_v62  ;;  %5011 = vmatpush.bf16.msra.mxu3 %v7259_v63  ;;  %v6619_v62 = vor.u32 %v7735_v52, %v6616_v53  ;;  %v6486_v63 = vld [vmem:[%s10851_s7 + $0x58] sm:$0xf]  ;;  %v6479_v8 = vor.u32 %v7718_v57, %v6478_v54  ;;  %v6483_v10 = vor.u32 %v7702_v58, %v6480_v60  ;;  %v3344_v52 = vperm.slane %v10351_v39, 0  ;;  %v7833_v53 = vld [vmem:[%s10851_s7 + $0x46c] sm:$0xf] }
 0x333   : > { %v6487_v14 = vor.u32 %v7719_v0, %v6486_v63  ;;  %v7016_v54 = vld [vmem:[%s10851_s7 + $0x4e8] sm:$0xf0]  ;;  %v3347_v57 = vperm.slane %v10351_v39, 3  ;;  %v7007_v58 = vor.u32 %v7848_v45, %v7006_v44  ;;  %v7015_v63 = vor.u32 %v7849_v51, %v7014_v50  ;;  %v6494_v51 = vld [vmem:[%s10851_s7 + $0x60] sm:$0xf] }
 0x334   : > { %v7019_v0 = vor.u32 %v7833_v53, %v7016_v54  ;;  %v7737_v44 = vld [vmem:[%s10851_s7 + $0x16c] sm:$0xf]  ;;  %v7704_v53 = vld [vmem:[%s10851_s7 + $0x64] sm:$0xf] }
 0x335   : > { %4970 = vmatpush.bf16.msrb.mxu1 %v7119_v6  ;;  %4984 = vmatpush.bf16.msrb.mxu2 %v7123_v7  ;;  %v7392_v6 = vld [vmem:[%s10851_s7 + $0x7e0] sm:$0xf0]  ;;  %v7398_v7 = vld [vmem:[%s10851_s7 + $0x768] sm:$0xf]  ;;  %v6632_v45 = vld [vmem:[%s10851_s7 + $0x1e8] sm:$0xf0] }
 0x336   : > { %4998 = vmatpush.bf16.msra.mxu0 %v7127_v11  ;;  %5012 = vmatpush.bf16.msra.mxu3 %v7131_v12  ;;  %v7945_v11 = vld [vmem:[%s10851_s7 + $0x7e4] sm:$0xf0]  ;;  %v7929_v12 = vld [vmem:[%s10851_s7 + $0x76c] sm:$0xf]  ;;  %v7395_v37 = vor.u32 %v7928_v5, %v7392_v6 }
 0x337   : > { %v7403_v20 = vor.u32 %v7929_v12, %v7400_v13 }
 0x339   : > { %4971 = vmatpush.bf16.msrb.mxu1 %v6991_v18  ;;  %4985 = vmatpush.bf16.msrb.mxu2 %v6995_v19  ;;  %v7912_v18 = vld [vmem:[%s10851_s7 + $0x6dc] sm:$0xf0]  ;;  %v7399_v19 = vor.u32 %v7945_v11, %v7398_v7  ;;  %v6888_v11 = vld [vmem:[%s10851_s7 + $0x3e8] sm:$0xf0] }
 0x33a   : > { %4999 = vmatpush.bf16.msra.mxu0 %v6999_v22  ;;  %5013 = vmatpush.bf16.msra.mxu3 %v7003_v23  ;;  %v7264_v22 = vld [vmem:[%s10851_s7 + $0x6e0] sm:$0xf0]  ;;  %v7270_v23 = vld [vmem:[%s10851_s7 + $0x668] sm:$0xf]  ;;  %v7263_v26 = vor.u32 %v7912_v18, %v7262_v17  ;;  %v6750_v18 = vld [vmem:[%s10851_s7 + $0x260] sm:$0xf] }
 0x33b   : > { %v7267_v27 = vor.u32 %v7896_v21, %v7264_v22 }
 0x33d   : > { %4972 = vmatpush.bf16.msrb.mxu1 %v6863_v29  ;;  %4986 = vmatpush.bf16.msrb.mxu2 %v6867_v30  ;;  %v7880_v29 = vld [vmem:[%s10851_s7 + $0x5dc] sm:$0xf0]  ;;  %v7271_v30 = vor.u32 %v7913_v24, %v7270_v23  ;;  %v7768_v23 = vld [vmem:[%s10851_s7 + $0x264] sm:$0xf] }
 0x33e   : > { %5000 = vmatpush.bf16.msra.mxu0 %v6871_v33  ;;  %5014 = vmatpush.bf16.msra.mxu3 %v6875_v34  ;;  %v7136_v33 = vld [vmem:[%s10851_s7 + $0x5e0] sm:$0xf0]  ;;  %v7142_v34 = vld [vmem:[%s10851_s7 + $0x568] sm:$0xf]  ;;  %v7135_v41 = vor.u32 %v7880_v29, %v7134_v28 }
 0x33f   : > { %v6752_v24 = vld [vmem:[%s10851_s7 + $0x2e0] sm:$0xf0] }
 0x340   : > { %v6755_v29 = vor.u32 %v7768_v23, %v6752_v24  ;;  %v7278_v23 = vld [vmem:[%s10851_s7 + $0x670] sm:$0xf] }
 0x341   : > { %4973 = vmatpush.bf16.msrb.mxu1 %v6735_v42  ;;  %4987 = vmatpush.bf16.msrb.mxu2 %v6739_v43  ;;  %v7139_v42 = vor.u32 %v7864_v32, %v7136_v33  ;;  %v7736_v32 = vld [vmem:[%s10851_s7 + $0x164] sm:$0xf]  ;;  %v6759_v33 = vor.u32 %v7785_v25, %v6758_v59  ;;  %v7914_v24 = vld [vmem:[%s10851_s7 + $0x6ec] sm:$0xf0] }
 0x342   : > { %5001 = vmatpush.bf16.msra.mxu0 %v6743_v46  ;;  %5015 = vmatpush.bf16.msra.mxu3 %v6747_v47  ;;  %v7832_v46 = vld [vmem:[%s10851_s7 + $0x464] sm:$0xf]  ;;  %v7143_v47 = vor.u32 %v7881_v35, %v7142_v34 }
 0x343   : > { %v7011_v60 = vor.u32 %v7832_v46, %v7008_v49  ;;  %v3348_v46 = vperm.slane %v10351_v39, 4 }
 0x345   : > { %4974 = vmatpush.bf16.msrb.mxu1 %v6607_v55  ;;  %4988 = vmatpush.bf16.msrb.mxu2 %v6611_v56  ;;  %v3345_v55 = vperm.slane %v10351_v39, 1  ;;  %v3346_v56 = vperm.slane %v10351_v39, 2 }
 0x346   : > { %5002 = vmatpush.bf16.msra.mxu0 %v6615_v61  ;;  %5016 = vmatpush.bf16.msra.mxu3 %v6619_v62  ;;  %v6878_v61 = vld [vmem:[%s10851_s7 + $0x360] sm:$0xf] }
 0x347   : > { %v7816_v62 = vld [vmem:[%s10851_s7 + $0x3dc] sm:$0xf0] }
 0x348   : > { %v4697_v40 = vpop.f32.mrf.mxu1 }
 0x349   : > { %4975 = vmatpush.bf16.msrb.mxu1 %v6479_v8  ;;  %4989 = vmatpush.bf16.msrb.mxu2 %v6483_v10  ;;  %v4725_v43 = vpop.f32.mrf.mxu0  ;;  %v4698_v5 = vadd.f32 %v4697_v40, %v3344_v52  ;;  %v7817_v8 = vld [vmem:[%s10851_s7 + $0x3e4] sm:$0xf0]  ;;  %v7801_v10 = vld [vmem:[%s10851_s7 + $0x36c] sm:$0xf] }
 0x34a   : > { %5003 = vmatpush.bf16.msra.mxu0 %v6487_v14  ;;  %5017 = vmatpush.bf16.msra.mxu3 %v6491_v15  ;;  %v4726_v12 = vadd.f32 %v4725_v43, %v3346_v56  ;;  %v6887_v21 = vor.u32 %v7817_v8, %v6886_v4  ;;  %v6891_v22 = vor.u32 %v7801_v10, %v6888_v11  ;;  %v7753_v40 = vld [vmem:[%s10851_s7 + $0x1e4] sm:$0xf0]  ;;  %v7946_v4 = vld [vmem:[%s10851_s7 + $0x7ec] sm:$0xf0]  ;;  %v7414_v8 = vld [vmem:[%s10851_s7 + $0x778] sm:$0xf] }
 0x34b   : > { %v3351_v10 = vperm.slane %v10351_v39, 7 }
 0x34c   : > { %4976 = vmatmul.bf16.vlgmr.msrb.gmra.mxu1 %v9506_v9  ;;  %4990 = vmatmul.bf16.vlgmr.msrb.gmra.mxu2 %v9506_v9 }
 0x34d   : > { %5024 = vmatpush.bf16.msra.mxu1 %v7391_v16  ;;  %5038 = vmatpush.bf16.msra.mxu2 %v7395_v37  ;;  %v6879_v16 = vor.u32 %v7816_v62, %v6878_v61  ;;  %v6883_v37 = vor.u32 %v7800_v2, %v6880_v3  ;;  %v7721_v61 = vld [vmem:[%s10851_s7 + $0xe4] sm:$0xf0]  ;;  %v6504_v2 = vld [vmem:[%s10851_s7 + $0xe8] sm:$0xf0]  ;;  %v7406_v3 = vld [vmem:[%s10851_s7 + $0x770] sm:$0xf] }
 0x34e   : > { %5052 = vmatpush.bf16.msrb.mxu0 %v7399_v19  ;;  %5066 = vmatpush.bf16.msrb.mxu3 %v7403_v20  ;;  %v4711_v1 = vpop.f32.mrf.mxu2  ;;  %v7784_v19 = vld [vmem:[%s10851_s7 + $0x2dc] sm:$0xf0] }
 0x34f   : > { %5004 = vmatmul.bf16.vlgmr.msra.gmra.mxu0 %v9506_v9  ;;  %5018 = vmatmul.bf16.vlgmr.msra.gmra.mxu3 %v9506_v9  ;;  %v4712_v6 = vadd.f32 %v4711_v1, %v3345_v55  ;;  %v4739_v7 = vpop.f32.mrf.mxu3  ;;  %v6751_v28 = vor.u32 %v7784_v19, %v6750_v18  ;;  %v7705_v1 = vld [vmem:[%s10851_s7 + $0x6c] sm:$0xf]  ;;  %v7407_v19 = vor.u32 %v7946_v4, %v7406_v3  ;;  %v7024_v3 = vld [vmem:[%s10851_s7 + $0x4f0] sm:$0xf0]  ;;  %v7030_v4 = vld [vmem:[%s10851_s7 + $0x478] sm:$0xf] }
 0x350   : > { %v4740_v13 = vadd.f32 %v4739_v7, %v3347_v57  ;;  %v4699_v14 = vpop.f32.mrf.mxu1  ;;  %v7408_v7 = vld [vmem:[%s10851_s7 + $0x7f0] sm:$0xf0] }
 0x351   : > { %5025 = vmatpush.bf16.msra.mxu1 %v7263_v26  ;;  %5039 = vmatpush.bf16.msra.mxu2 %v7267_v27  ;;  %v5136_v15 = vpack.c.bf16 %v4712_v6, %v4698_v5  ;;  %v4727_v17 = vpop.f32.mrf.mxu0  ;;  %v7769_v26 = vld [vmem:[%s10851_s7 + $0x26c] sm:$0xf]  ;;  %v7930_v5 = vld [vmem:[%s10851_s7 + $0x774] sm:$0xf]  ;;  %v3349_v6 = vperm.slane %v10351_v39, 5 }
 0x352   : > { %5053 = vmatpush.bf16.msrb.mxu0 %v7271_v30  ;;  %5067 = vmatpush.bf16.msrb.mxu3 %v7275_v31  ;;  %v5137_v20 = vpack.c.bf16 %v4740_v13, %v4726_v12  ;;  %v6760_v27 = vld [vmem:[%s10851_s7 + $0x2e8] sm:$0xf0]  ;;  %v6622_v30 = vld [vmem:[%s10851_s7 + $0x160] sm:$0xf]  ;;  %v7947_v13 = vld [vmem:[%s10851_s7 + $0x7f4] sm:$0xf0] }
 0x353   : > { %5168 = vst [vmem:[%s10431_s28] sm:$0xff] %v5136_v15  ;;  %v7752_v31 = vld [vmem:[%s10851_s7 + $0x1dc] sm:$0xf0]  ;;  %v6763_v34 = vor.u32 %v7769_v26, %v6760_v27  ;;  %v7416_v15 = vld [vmem:[%s10851_s7 + $0x7f8] sm:$0xf0]  ;;  %v7415_v25 = vor.u32 %v7947_v13, %v7414_v8  ;;  %v10627_v8 = vld [vmem:[%s10852_s8 + $0x8] sm:$0xff] }
 0x354   : > { %5169 = vst [vmem:[%s10431_s28 + $0x8] sm:$0xff] %v5137_v20  ;;  %v7411_v20 = vor.u32 %v7930_v5, %v7408_v7  ;;  %v7851_v5 = vld [vmem:[%s10851_s7 + $0x4f4] sm:$0xf0] }
 0x355   : > { %5026 = vmatpush.bf16.msra.mxu1 %v7135_v41  ;;  %5040 = vmatpush.bf16.msra.mxu2 %v7139_v42  ;;  %v4700_v41 = vadd.f32 %v4699_v14, %v3344_v52  ;;  %v7720_v52 = vld [vmem:[%s10851_s7 + $0xdc] sm:$0xf0]  ;;  %v7931_v14 = vld [vmem:[%s10851_s7 + $0x77c] sm:$0xf] }
 0x356   : > { %5054 = vmatpush.bf16.msrb.mxu0 %v7143_v47  ;;  %5068 = vmatpush.bf16.msrb.mxu3 %v7147_v48  ;;  %v4713_v35 = vpop.f32.mrf.mxu2  ;;  %v3350_v47 = vperm.slane %v10351_v39, 6  ;;  %v4728_v48 = vadd.f32 %v4727_v17, %v3346_v56  ;;  %v6627_v56 = vor.u32 %v7736_v32, %v6624_v36  ;;  %v6495_v11 = vor.u32 %v7720_v52, %v6494_v51  ;;  %v7915_v32 = vld [vmem:[%s10851_s7 + $0x6f4] sm:$0xf0]  ;;  %v7867_v52 = vld [vmem:[%s10851_s7 + $0x57c] sm:$0xf] }
 0x357   : > { %v4714_v42 = vadd.f32 %v4713_v35, %v3345_v55  ;;  %v4741_v43 = vpop.f32.mrf.mxu3  ;;  %v6623_v55 = vor.u32 %v7752_v31, %v6622_v30  ;;  %v7419_v26 = vor.u32 %v7931_v14, %v7416_v15  ;;  %v7286_v30 = vld [vmem:[%s10851_s7 + $0x678] sm:$0xf]  ;;  %v7835_v39 = vld [vmem:[%s10851_s7 + $0x47c] sm:$0xf]  ;;  %v7802_v14 = vld [vmem:[%s10851_s7 + $0x374] sm:$0xf] }
 0x358   : > { %v4742_v49 = vadd.f32 %v4741_v43, %v3347_v57  ;;  %v4753_v50 = vpop.f32.mrf.mxu1  ;;  %v7883_v51 = vld [vmem:[%s10851_s7 + $0x5f4] sm:$0xf0]  ;;  %v6896_v15 = vld [vmem:[%s10851_s7 + $0x3f0] sm:$0xf0] }
 0x359   : > { %5027 = vmatpush.bf16.msra.mxu1 %v7007_v58  ;;  %5041 = vmatpush.bf16.msra.mxu2 %v7011_v60  ;;  %v5152_v54 = vpack.c.bf16 %v4714_v42, %v4700_v41  ;;  %v4781_v57 = vpop.f32.mrf.mxu0  ;;  %v6496_v58 = vld [vmem:[%s10851_s7 + $0xe0] sm:$0xf0]  ;;  %v6502_v60 = vld [vmem:[%s10851_s7 + $0x68] sm:$0xf]  ;;  %v4754_v18 = vadd.f32 %v4753_v50, %v3348_v46  ;;  %v7279_v42 = vor.u32 %v7914_v24, %v7278_v23  ;;  %v7158_v50 = vld [vmem:[%s10851_s7 + $0x578] sm:$0xf] }
 0x35a   : > { %5055 = vmatpush.bf16.msrb.mxu0 %v7015_v63  ;;  %5069 = vmatpush.bf16.msrb.mxu3 %v7019_v0  ;;  %v5153_v62 = vpack.c.bf16 %v4742_v49, %v4728_v48  ;;  %v6631_v63 = vor.u32 %v7753_v40, %v6630_v38  ;;  %v6635_v0 = vor.u32 %v7737_v44, %v6632_v45  ;;  %v7150_v38 = vld [vmem:[%s10851_s7 + $0x570] sm:$0xf]  ;;  %v7866_v44 = vld [vmem:[%s10851_s7 + $0x574] sm:$0xf]  ;;  %v6904_v23 = vld [vmem:[%s10851_s7 + $0x3f8] sm:$0xf0] }
 0x35b   : > { %5187 = vst [vmem:[%s10431_s28 + $0x80] sm:$0xff] %v5152_v54  ;;  %v6499_v12 = vor.u32 %v7704_v53, %v6496_v58  ;;  %v4782_v59 = vadd.f32 %v4781_v57, %v3350_v47  ;;  %v7882_v40 = vld [vmem:[%s10851_s7 + $0x5ec] sm:$0xf0]  ;;  %v7152_v45 = vld [vmem:[%s10851_s7 + $0x5f0] sm:$0xf0]  ;;  %v7287_v48 = vor.u32 %v7915_v32, %v7286_v30  ;;  %v7159_v58 = vor.u32 %v7883_v51, %v7158_v50 }
 0x35c   : > { %5188 = vst [vmem:[%s10431_s28 + $0x88] sm:$0xff] %v5153_v62  ;;  %v7160_v53 = vld [vmem:[%s10851_s7 + $0x5f8] sm:$0xf0]  ;;  %v7151_v54 = vor.u32 %v7882_v40, %v7150_v38  ;;  %v7022_v62 = vld [vmem:[%s10851_s7 + $0x470] sm:$0xf]  ;;  %v3353_v24 = vperm.slane %v10627_v8, 1 }
 0x35d   : > { %5028 = vmatpush.bf16.msra.mxu1 %v6879_v16  ;;  %5042 = vmatpush.bf16.msra.mxu2 %v6883_v37  ;;  %v6503_v16 = vor.u32 %v7721_v61, %v6502_v60  ;;  %v6507_v37 = vor.u32 %v7705_v1, %v6504_v2  ;;  %v7834_v2 = vld [vmem:[%s10851_s7 + $0x474] sm:$0xf]  ;;  %v6638_v51 = vld [vmem:[%s10851_s7 + $0x170] sm:$0xf] }
 0x35e   : > { %5056 = vmatpush.bf16.msrb.mxu0 %v6887_v21  ;;  %5070 = vmatpush.bf16.msrb.mxu3 %v6891_v22  ;;  %v4767_v17 = vpop.f32.mrf.mxu2  ;;  %v7027_v13 = vor.u32 %v7834_v2, %v7024_v3  ;;  %v6510_v2 = vld [vmem:[%s10851_s7 + $0x70] sm:$0xf] }
 0x35f   : > { %v4768_v21 = vadd.f32 %v4767_v17, %v3349_v6  ;;  %v4795_v22 = vpop.f32.mrf.mxu3  ;;  %v7722_v3 = vld [vmem:[%s10851_s7 + $0xec] sm:$0xf0] }
 0x360   : > { %v4796_v27 = vadd.f32 %v4795_v22, %v3351_v10  ;;  %v4755_v36 = vpop.f32.mrf.mxu1  ;;  %v7803_v22 = vld [vmem:[%s10851_s7 + $0x37c] sm:$0xf] }
 0x361   : > { %5029 = vmatpush.bf16.msra.mxu1 %v6751_v28  ;;  %5043 = vmatpush.bf16.msra.mxu2 %v6755_v29  ;;  %v7898_v28 = vld [vmem:[%s10851_s7 + $0x674] sm:$0xf]  ;;  %v5138_v31 = vpack.c.bf16 %v4768_v21, %v4754_v18  ;;  %v4783_v41 = vpop.f32.mrf.mxu0  ;;  %v4756_v57 = vadd.f32 %v4755_v36, %v3348_v46  ;;  %v7163_v46 = vor.u32 %v7867_v52, %v7160_v53  ;;  %v6902_v18 = vld [vmem:[%s10851_s7 + $0x378] sm:$0xf]  ;;  %v7754_v52 = vld [vmem:[%s10851_s7 + $0x1ec] sm:$0xf0] }
 0x362   : > { %5057 = vmatpush.bf16.msrb.mxu0 %v6759_v33  ;;  %5071 = vmatpush.bf16.msrb.mxu3 %v6763_v34  ;;  %v7280_v29 = vld [vmem:[%s10851_s7 + $0x6f0] sm:$0xf0]  ;;  %v7899_v33 = vld [vmem:[%s10851_s7 + $0x67c] sm:$0xf]  ;;  %v5139_v35 = vpack.c.bf16 %v4796_v27, %v4782_v59  ;;  %v3354_v59 = vperm.slane %v10627_v8, 2  ;;  %v6899_v27 = vor.u32 %v7802_v14, %v6896_v15 }
 0x363   : > { %v7288_v34 = vld [vmem:[%s10851_s7 + $0x6f8] sm:$0xf0]  ;;  %5170 = vst [vmem:[%s10431_s28 + $0x10] sm:$0xff] %v5138_v31  ;;  %v7283_v43 = vor.u32 %v7898_v28, %v7280_v29  ;;  %v6766_v28 = vld [vmem:[%s10851_s7 + $0x270] sm:$0xf]  ;;  %v6907_v31 = vor.u32 %v7803_v22, %v6904_v23 }
 0x364   : > { %5171 = vst [vmem:[%s10431_s28 + $0x18] sm:$0xff] %v5139_v35  ;;  %v7291_v49 = vor.u32 %v7899_v33, %v7288_v34  ;;  %v7786_v29 = vld [vmem:[%s10851_s7 + $0x2ec] sm:$0xf0]  ;;  %v7770_v33 = vld [vmem:[%s10851_s7 + $0x274] sm:$0xf] }
 0x365   : > { %5030 = vmatpush.bf16.msra.mxu1 %v6623_v55  ;;  %5044 = vmatpush.bf16.msra.mxu2 %v6627_v56  ;;  %v7155_v55 = vor.u32 %v7866_v44, %v7152_v45  ;;  %v6768_v34 = vld [vmem:[%s10851_s7 + $0x2f0] sm:$0xf0]  ;;  %v6774_v35 = vld [vmem:[%s10851_s7 + $0x278] sm:$0xf]  ;;  %v7707_v14 = vld [vmem:[%s10851_s7 + $0x7c] sm:$0xf] }
 0x366   : > { %5058 = vmatpush.bf16.msrb.mxu0 %v6631_v63  ;;  %5072 = vmatpush.bf16.msrb.mxu3 %v6635_v0  ;;  %v4769_v56 = vpop.f32.mrf.mxu2  ;;  %v7850_v63 = vld [vmem:[%s10851_s7 + $0x4ec] sm:$0xf0]  ;;  %v4784_v0 = vadd.f32 %v4783_v41, %v3350_v47  ;;  %v7787_v41 = vld [vmem:[%s10851_s7 + $0x2f4] sm:$0xf0]  ;;  %v6771_v50 = vor.u32 %v7770_v33, %v6768_v34  ;;  %v7738_v53 = vld [vmem:[%s10851_s7 + $0x174] sm:$0xf] }
 0x367   : > { %v4770_v60 = vadd.f32 %v4769_v56, %v3349_v6  ;;  %v4797_v61 = vpop.f32.mrf.mxu3  ;;  %v7032_v6 = vld [vmem:[%s10851_s7 + $0x4f8] sm:$0xf0] }
 0x368   : > { %v4798_v1 = vadd.f32 %v4797_v61, %v3351_v10  ;;  %v6894_v10 = vld [vmem:[%s10851_s7 + $0x370] sm:$0xf]  ;;  %v7035_v17 = vor.u32 %v7835_v39, %v7032_v6  ;;  %v7739_v61 = vld [vmem:[%s10851_s7 + $0x17c] sm:$0xf]  ;;  %v7706_v39 = vld [vmem:[%s10851_s7 + $0x74] sm:$0xf] }
 0x369   : > { %5031 = vmatpush.bf16.msra.mxu1 %v6495_v11  ;;  %5045 = vmatpush.bf16.msra.mxu2 %v6499_v12  ;;  %v5154_v47 = vpack.c.bf16 %v4770_v60, %v4756_v57  ;;  %v7818_v11 = vld [vmem:[%s10851_s7 + $0x3ec] sm:$0xf0]  ;;  %v7023_v12 = vor.u32 %v7850_v63, %v7022_v62  ;;  %v6640_v57 = vld [vmem:[%s10851_s7 + $0x1f0] sm:$0xf0]  ;;  %v7755_v60 = vld [vmem:[%s10851_s7 + $0x1f4] sm:$0xf0] }
 0x36a   : > { %5059 = vmatpush.bf16.msrb.mxu0 %v6503_v16  ;;  %5073 = vmatpush.bf16.msrb.mxu3 %v6507_v37  ;;  %v5155_v7 = vpack.c.bf16 %v4798_v1, %v4784_v0  ;;  %v4809_v16 = vpop.f32.mrf.mxu1  ;;  %v7031_v37 = vor.u32 %v7851_v5, %v7030_v4  ;;  %v6648_v62 = vld [vmem:[%s10851_s7 + $0x1f8] sm:$0xf0]  ;;  %v6643_v1 = vor.u32 %v7738_v53, %v6640_v57  ;;  %v6512_v6 = vld [vmem:[%s10851_s7 + $0xf0] sm:$0xf0] }
 0x36b   : > { %5189 = vst [vmem:[%s10431_s28 + $0x90] sm:$0xff] %v5154_v47  ;;  %v6651_v47 = vor.u32 %v7739_v61, %v6648_v62  ;;  %v6520_v15 = vld [vmem:[%s10851_s7 + $0xf8] sm:$0xf0] }
 0x36c   : > { %5032 = vmatmul.bf16.vlgmr.msra.gmra.mxu1 %v9506_v9  ;;  %5046 = vmatmul.bf16.vlgmr.msra.gmra.mxu2 %v9506_v9  ;;  %5190 = vst [vmem:[%s10431_s28 + $0x98] sm:$0xff] %v5155_v7  ;;  %v4837_v21 = vpop.f32.mrf.mxu0  ;;  %v6518_v7 = vld [vmem:[%s10851_s7 + $0x78] sm:$0xf]  ;;  %v6523_v22 = vor.u32 %v7707_v14, %v6520_v15 }
 0x36d   : > { %5080 = vmatpush.bf16.msrb.mxu1 %v7407_v19  ;;  %5094 = vmatpush.bf16.msrb.mxu2 %v7411_v20  ;;  %v7819_v19 = vld [vmem:[%s10851_s7 + $0x3f4] sm:$0xf0]  ;;  %v3352_v20 = vperm.slane %v10627_v8, 0  ;;  %v4838_v44 = vadd.f32 %v4837_v21, %v3354_v59 }
 0x36e   : > { %5108 = vmatpush.bf16.msra.mxu0 %v7415_v25  ;;  %5122 = vmatpush.bf16.msra.mxu3 %v7419_v26  ;;  %v3355_v25 = vperm.slane %v10627_v8, 3  ;;  %v6895_v26 = vor.u32 %v7818_v11, %v6894_v10  ;;  %v6903_v30 = vor.u32 %v7819_v19, %v6902_v18  ;;  %v6511_v18 = vor.u32 %v7722_v3, %v6510_v2 }
 0x36f   : > { %5060 = vmatmul.bf16.vlgmr.msrb.gmra.mxu0 %v9506_v9  ;;  %5074 = vmatmul.bf16.vlgmr.msrb.gmra.mxu3 %v9506_v9  ;;  %v4823_v32 = vpop.f32.mrf.mxu2  ;;  %v4810_v36 = vadd.f32 %v4809_v16, %v3352_v20  ;;  %v6515_v19 = vor.u32 %v7706_v39, %v6512_v6 }
 0x370   : > { %v4824_v38 = vadd.f32 %v4823_v32, %v3353_v24 }
 0x371   : > { %5081 = vmatpush.bf16.msrb.mxu1 %v7279_v42  ;;  %5095 = vmatpush.bf16.msrb.mxu2 %v7283_v43  ;;  %v7771_v42 = vld [vmem:[%s10851_s7 + $0x27c] sm:$0xf] }
 0x372   : > { %5109 = vmatpush.bf16.msra.mxu0 %v7287_v48  ;;  %5123 = vmatpush.bf16.msra.mxu3 %v7291_v49  ;;  %v4851_v40 = vpop.f32.mrf.mxu3  ;;  %v6776_v43 = vld [vmem:[%s10851_s7 + $0x2f8] sm:$0xf0]  ;;  %v5140_v48 = vpack.c.bf16 %v4824_v38, %v4810_v36  ;;  %v6767_v49 = vor.u32 %v7786_v29, %v6766_v28  ;;  %v4811_v63 = vpop.f32.mrf.mxu1 }
 0x373   : > { %v4852_v45 = vadd.f32 %v4851_v40, %v3355_v25  ;;  %v6779_v56 = vor.u32 %v7771_v42, %v6776_v43  ;;  %v4812_v10 = vadd.f32 %v4811_v63, %v3352_v20 }
 0x374   : > { %5172 = vst [vmem:[%s10431_s28 + $0x20] sm:$0xff] %v5140_v48  ;;  %v4839_v0 = vpop.f32.mrf.mxu0 }
 0x375   : > { %5082 = vmatpush.bf16.msrb.mxu1 %v7151_v54  ;;  %5096 = vmatpush.bf16.msrb.mxu2 %v7155_v55  ;;  %v5141_v54 = vpack.c.bf16 %v4852_v45, %v4838_v44  ;;  %v6775_v55 = vor.u32 %v7787_v41, %v6774_v35  ;;  %v4840_v16 = vadd.f32 %v4839_v0, %v3354_v59 }
 0x376   : > { %5110 = vmatpush.bf16.msra.mxu0 %v7159_v58  ;;  %5124 = vmatpush.bf16.msra.mxu3 %v7163_v46  ;;  %v6646_v58 = vld [vmem:[%s10851_s7 + $0x178] sm:$0xf]  ;;  %v6639_v46 = vor.u32 %v7754_v52, %v6638_v51 }
 0x377   : > { %5173 = vst [vmem:[%s10431_s28 + $0x28] sm:$0xff] %v5141_v54  ;;  %v6647_v4 = vor.u32 %v7755_v60, %v6646_v58  ;;  %v4825_v5 = vpop.f32.mrf.mxu2 }
 0x378   : > { %v4826_v11 = vadd.f32 %v4825_v5, %v3353_v24  ;;  %v3356_v24 = vperm.slane %v10627_v8, 4 }
 0x379   : > { %5083 = vmatpush.bf16.msrb.mxu1 %v7023_v12  ;;  %5097 = vmatpush.bf16.msrb.mxu2 %v7027_v13  ;;  %v7723_v13 = vld [vmem:[%s10851_s7 + $0xf4] sm:$0xf0] }
 0x37a   : > { %5111 = vmatpush.bf16.msra.mxu0 %v7031_v37  ;;  %5125 = vmatpush.bf16.msra.mxu3 %v7035_v17  ;;  %v4853_v12 = vpop.f32.mrf.mxu3  ;;  %v5156_v17 = vpack.c.bf16 %v4826_v11, %v4812_v10  ;;  %v6519_v21 = vor.u32 %v7723_v13, %v6518_v7 }
 0x37b   : > { %v4854_v37 = vadd.f32 %v4853_v12, %v3355_v25  ;;  %v3357_v25 = vperm.slane %v10627_v8, 5 }
 0x37c   : > { %5191 = vst [vmem:[%s10431_s28 + $0xa0] sm:$0xff] %v5156_v17 }
 0x37d   : > { %5084 = vmatpush.bf16.msrb.mxu1 %v6895_v26  ;;  %5098 = vmatpush.bf16.msrb.mxu2 %v6899_v27  ;;  %v5157_v20 = vpack.c.bf16 %v4854_v37, %v4840_v16  ;;  %v3358_v26 = vperm.slane %v10627_v8, 6  ;;  %v3359_v27 = vperm.slane %v10627_v8, 7 }
 0x37e   : > { %5112 = vmatpush.bf16.msra.mxu0 %v6903_v30  ;;  %5126 = vmatpush.bf16.msra.mxu3 %v6907_v31 }
 0x37f   : > { %5192 = vst [vmem:[%s10431_s28 + $0xa8] sm:$0xff] %v5157_v20 }
 0x381   : > { %5085 = vmatpush.bf16.msrb.mxu1 %v6767_v49  ;;  %5099 = vmatpush.bf16.msrb.mxu2 %v6771_v50 }
 0x382   : > { %5113 = vmatpush.bf16.msra.mxu0 %v6775_v55  ;;  %5127 = vmatpush.bf16.msra.mxu3 %v6779_v56 }
 0x385   : > { %5086 = vmatpush.bf16.msrb.mxu1 %v6639_v46  ;;  %5100 = vmatpush.bf16.msrb.mxu2 %v6643_v1 }
 0x386   : > { %5114 = vmatpush.bf16.msra.mxu0 %v6647_v4  ;;  %5128 = vmatpush.bf16.msra.mxu3 %v6651_v47 }
 0x389   : > { %5087 = vmatpush.bf16.msrb.mxu1 %v6511_v18  ;;  %5101 = vmatpush.bf16.msrb.mxu2 %v6515_v19  ;;  %v4865_v23 = vpop.f32.mrf.mxu1 }
 0x38a   : > { %5115 = vmatpush.bf16.msra.mxu0 %v6519_v21  ;;  %5129 = vmatpush.bf16.msra.mxu3 %v6523_v22  ;;  %v4866_v29 = vadd.f32 %v4865_v23, %v3356_v24 }
 0x38c   : > { %5088 = vmatmul.bf16.vlgmr.msrb.gmra.mxu1 %v9506_v9  ;;  %5102 = vmatmul.bf16.vlgmr.msrb.gmra.mxu2 %v9506_v9  ;;  %v4893_v59 = vpop.f32.mrf.mxu0 }
 0x38d   : > { %5116 = vmatmul.bf16.vlgmr.msra.gmra.mxu0 %v9506_v9  ;;  %5130 = vmatmul.bf16.vlgmr.msra.gmra.mxu3 %v9506_v9  ;;  %v4894_v32 = vadd.f32 %v4893_v59, %v3358_v26 }
 0x38f   : > { %v4879_v28 = vpop.f32.mrf.mxu2 }
 0x390   : > { %v4880_v30 = vadd.f32 %v4879_v28, %v3357_v25 }
 0x391   : > { %v4867_v8 = vpop.f32.mrf.mxu1 }
 0x392   : > { %v4907_v31 = vpop.f32.mrf.mxu3  ;;  %v5142_v9 = vpack.c.bf16 %v4880_v30, %v4866_v29  ;;  %v4868_v38 = vadd.f32 %v4867_v8, %v3356_v24 }
 0x393   : > { %v4908_v33 = vadd.f32 %v4907_v31, %v3359_v27 }
 0x394   : > { %5174 = vst [vmem:[%s10431_s28 + $0x30] sm:$0xff] %v5142_v9  ;;  %v4895_v35 = vpop.f32.mrf.mxu0 }
 0x395   : > { %v5143_v34 = vpack.c.bf16 %v4908_v33, %v4894_v32 }
 0x397   : > { %5175 = vst [vmem:[%s10431_s28 + $0x38] sm:$0xff] %v5143_v34  ;;  %v4881_v36 = vpop.f32.mrf.mxu2 }
 0x398   : > { %v4882_v40 = vadd.f32 %v4881_v36, %v3357_v25 }
 0x39a   : > { %v4909_v41 = vpop.f32.mrf.mxu3 }
 0x39b   : > { %8029 = shalt.err (!%p8026_p3)
}
 0x39c   : > { %s8099_s11 = smov 128   ;;  %s8100_s20 = smov 8   ;;  %v4896_v42 = vadd.f32 %v4895_v35, %v3358_v26  ;;  %v4910_v43 = vadd.f32 %v4909_v41, %v3359_v27  ;;  %v5158_v44 = vpack.c.bf16 %v4882_v40, %v4868_v38  ;;  %v3338_v48 = vld [vmem:[%s10852_s8 + $0x10] sm:$0xff]  ;;  %v3339_v31 = vld [vmem:[%s10852_s8 + $0x18] sm:$0xff]  ;;  %vm5183_vm4 = vcmask 1043456  }
 0x39d   : > { %7952 = dma.vmem_to_hbm [thread:$0]  (%p8195_p5), %s10761_s1, 256, %s5242_s21, %s5209_s0, %s8099_s11, %s8099_s11, %s8100_s20   ;;  %v3360_v50 = vperm.slane %v3338_v48, 0  ;;  %v3361_v52 = vperm.slane %v3338_v48, 1  ;;  %v3362_v53 = vperm.slane %v3338_v48, 2  ;;  %v3363_v54 = vperm.slane %v3338_v48, 3 }
 0x39e   : > { %v5159_v45 = vpack.c.bf16 %v4910_v43, %v4896_v42  ;;  %5193 = vst [vmem:[%s10431_s28 + $0xb0] sm:$0xff] %v5158_v44  ;;  %v3364_v10 = vperm.slane %v3338_v48, 4  ;;  %v3365_v12 = vperm.slane %v3338_v48, 5  ;;  %v3366_v13 = vperm.slane %v3338_v48, 6  ;;  %s7949_s0 = sshll.u32 %s8178_s17, 8  ;;  %s5222_s12 = sshll.u32 %s10431_s28, 4  ;;  %s5223_s12 = int_to_ptr.vmem [resolvable:$true] %s5222_s12 }
 0x39f   : > { %v3367_v14 = vperm.slane %v3338_v48, 7  ;;  %v3368_v33 = vperm.slane %v3339_v31, 0  ;;  %v3369_v34 = vperm.slane %v3339_v31, 1  ;;  %v3370_v8 = vperm.slane %v3339_v31, 2  ;;  %s5221_s30 = scalar_lea.hbm %s10853_s9, %s7949_s0  ;;  %s5204_s27 = scalar_lea.sflag [#allocation3], %s9172_s18 }
 0x3a0   : > { %5194 = vst [vmem:[%s10431_s28 + $0xb8] sm:$0xff] %v5159_v45  ;;  %v3371_v35 = vperm.slane %v3339_v31, 3  ;;  %vm5184_vm5 = vcmask 220164   ;;  %s5224_s17 = sshll.u32 %s5221_s30, 4  ;;  %s8050_s21 = scalar_lea.hbm %s10853_s9, 512  ;;  %s5225_s17 = int_to_ptr.hbm [resolvable:$true] %s5224_s17 }
 0x3a1   : > { %vm10798_vm6 = vmor %vm5184_vm5, %vm5183_vm4  ;;  %s8044_s20 = sshra.s32 %s5225_s17, 4  ;;  %s8045_s20 = int_to_ptr.hbm [resolvable:$true] %s8044_s20 }
 0x3a2   : > { %s8046_s25 = scalar_lea.hbm %s8045_s20, 256  ;;  %p8051_p9 = scmp.lt.s32.totalorder %s8045_s20, %s10853_s9 }
 0x3a3   : > { %p8047_p4 = scmp.ne.s32.totalorder %s8045_s20, %s8046_s25  ;;  %p8052_p10 = scmp.lt.s32.totalorder %s8050_s21, %s8046_s25 }
 0x3a5   : > { %p8048_p7 = pnand %p8047_p4, %p8195_p5  ;;  %p8053_p11 = por %p8052_p10, %p8051_p9 }
 0x3a7   : > { %p8049_p8 = pneg %p8048_p7 }
 0x3a9   : > { %v4921_v49 = vpop.f32.mrf.mxu1  ;;  %p8054_p12 = pnand %p8053_p11, %p8049_p8 }
 0x3aa   : > { %v4922_v56 = vadd.f32 %v4921_v49, %v3360_v50 }
 0x3ac   : > { %v4949_v51 = vpop.f32.mrf.mxu0 }
 0x3ad   : > { %v4950_v60 = vadd.f32 %v4949_v51, %v3362_v53 }
 0x3af   : > { %v4935_v55 = vpop.f32.mrf.mxu2 }
 0x3b0   : > { %v4936_v57 = vadd.f32 %v4935_v55, %v3361_v52 }
 0x3b1   : > { %v4923_v0 = vpop.f32.mrf.mxu1 }
 0x3b2   : > { %v4963_v58 = vpop.f32.mrf.mxu3  ;;  %v5144_v62 = vpack.c.bf16 %v4936_v57, %v4922_v56  ;;  %v4924_v2 = vadd.f32 %v4923_v0, %v3360_v50  ;;  %v3375_v0 = vperm.slane %v3339_v31, 7 }
 0x3b3   : > { %v4964_v61 = vadd.f32 %v4963_v58, %v3363_v54 }
 0x3b4   : > { %5176 = vst [vmem:[%s10431_s28 + $0x40] sm:$0xff] %v5144_v62  ;;  %v4951_v46 = vpop.f32.mrf.mxu0  ;;  %v3373_v62 = vperm.slane %v3339_v31, 5 }
 0x3b5   : > { %v5145_v63 = vpack.c.bf16 %v4964_v61, %v4950_v60  ;;  %v4952_v47 = vadd.f32 %v4951_v46, %v3362_v53  ;;  %v3372_v60 = vperm.slane %v3339_v31, 4 }
 0x3b7   : > { %5177 = vst [vmem:[%s10431_s28 + $0x48] sm:$0xff] %v5145_v63  ;;  %v4937_v1 = vpop.f32.mrf.mxu2  ;;  %v3374_v63 = vperm.slane %v3339_v31, 6 }
 0x3b8   : > { %v4938_v3 = vadd.f32 %v4937_v1, %v3361_v52 }
 0x3ba   : > { %v4965_v4 = vpop.f32.mrf.mxu3  ;;  %v5160_v39 = vpack.c.bf16 %v4938_v3, %v4924_v2 }
 0x3bb   : > { %v4966_v5 = vadd.f32 %v4965_v4, %v3363_v54 }
 0x3bc   : > { %5195 = vst [vmem:[%s10431_s28 + $0xc0] sm:$0xff] %v5160_v39 }
 0x3bd   : > { %v5161_v6 = vpack.c.bf16 %v4966_v5, %v4952_v47 }
 0x3bf   : > { %5196 = vst [vmem:[%s10431_s28 + $0xc8] sm:$0xff] %v5161_v6 }
 0x3c9   : > { %v4977_v7 = vpop.f32.mrf.mxu1 }
 0x3ca   : > { %v4978_v16 = vadd.f32 %v4977_v7, %v3364_v10 }
 0x3cc   : > { %v5005_v11 = vpop.f32.mrf.mxu0 }
 0x3cd   : > { %v5006_v18 = vadd.f32 %v5005_v11, %v3366_v13 }
 0x3cf   : > { %v4991_v15 = vpop.f32.mrf.mxu2 }
 0x3d0   : > { %v4992_v37 = vadd.f32 %v4991_v15, %v3365_v12 }
 0x3d1   : > { %v4979_v22 = vpop.f32.mrf.mxu1 }
 0x3d2   : > { %v5019_v17 = vpop.f32.mrf.mxu3  ;;  %v5146_v20 = vpack.c.bf16 %v4992_v37, %v4978_v16  ;;  %v4980_v59 = vadd.f32 %v4979_v22, %v3364_v10 }
 0x3d3   : > { %v5020_v19 = vadd.f32 %v5019_v17, %v3367_v14 }
 0x3d4   : > { %5178 = vst [vmem:[%s10431_s28 + $0x50] sm:$0xff] %v5146_v20  ;;  %v5007_v23 = vpop.f32.mrf.mxu0 }
 0x3d5   : > { %v5147_v21 = vpack.c.bf16 %v5020_v19, %v5006_v18  ;;  %v5008_v27 = vadd.f32 %v5007_v23, %v3366_v13 }
 0x3d7   : > { %5179 = vst [vmem:[%s10431_s28 + $0x58] sm:$0xff] %v5147_v21  ;;  %v4993_v24 = vpop.f32.mrf.mxu2 }
 0x3d8   : > { %v4994_v25 = vadd.f32 %v4993_v24, %v3365_v12 }
 0x3da   : > { %v5021_v26 = vpop.f32.mrf.mxu3  ;;  %v5162_v29 = vpack.c.bf16 %v4994_v25, %v4980_v59 }
 0x3db   : > { %v5022_v28 = vadd.f32 %v5021_v26, %v3367_v14 }
 0x3dc   : > { %5197 = vst [vmem:[%s10431_s28 + $0xd0] sm:$0xff] %v5162_v29 }
 0x3dd   : > { %v5163_v30 = vpack.c.bf16 %v5022_v28, %v5008_v27 }
 0x3df   : > { %5198 = vst [vmem:[%s10431_s28 + $0xd8] sm:$0xff] %v5163_v30 }
 0x3e9   : > { %v5033_v32 = vpop.f32.mrf.mxu1 }
 0x3ea   : > { %v5034_v38 = vadd.f32 %v5033_v32, %v3368_v33 }
 0x3ec   : > { %v5061_v9 = vpop.f32.mrf.mxu0 }
 0x3ed   : > { %v5062_v42 = vadd.f32 %v5061_v9, %v3370_v8 }
 0x3ef   : > { %v5047_v36 = vpop.f32.mrf.mxu2 }
 0x3f0   : > { %v5048_v40 = vadd.f32 %v5047_v36, %v3369_v34 }
 0x3f1   : > { %v5035_v48 = vpop.f32.mrf.mxu1 }
 0x3f2   : > { %v5075_v41 = vpop.f32.mrf.mxu3  ;;  %v5148_v44 = vpack.c.bf16 %v5048_v40, %v5034_v38  ;;  %v5036_v51 = vadd.f32 %v5035_v48, %v3368_v33 }
 0x3f3   : > { %v5076_v43 = vadd.f32 %v5075_v41, %v3371_v35 }
 0x3f4   : > { %5180 = vst [vmem:[%s10431_s28 + $0x60] sm:$0xff] %v5148_v44  ;;  %v5063_v49 = vpop.f32.mrf.mxu0 }
 0x3f5   : > { %v5149_v45 = vpack.c.bf16 %v5076_v43, %v5062_v42  ;;  %v5064_v54 = vadd.f32 %v5063_v49, %v3370_v8 }
 0x3f7   : > { %5181 = vst [vmem:[%s10431_s28 + $0x68] sm:$0xff] %v5149_v45  ;;  %v5049_v50 = vpop.f32.mrf.mxu2 }
 0x3f8   : > { %v5050_v52 = vadd.f32 %v5049_v50, %v3369_v34 }
 0x3fa   : > { %v5077_v53 = vpop.f32.mrf.mxu3  ;;  %v5164_v56 = vpack.c.bf16 %v5050_v52, %v5036_v51 }
 0x3fb   : > { %v5078_v55 = vadd.f32 %v5077_v53, %v3371_v35 }
 0x3fc   : > { %5199 = vst [vmem:[%s10431_s28 + $0xe0] sm:$0xff] %v5164_v56 }
 0x3fd   : > { %v5165_v57 = vpack.c.bf16 %v5078_v55, %v5064_v54 }
 0x3ff   : > { %5200 = vst [vmem:[%s10431_s28 + $0xe8] sm:$0xff] %v5165_v57 }
 0x409   : > { %v5089_v58 = vpop.f32.mrf.mxu1 }
 0x40a   : > { %v5117_v61 = vpop.f32.mrf.mxu0  ;;  %v5090_v1 = vadd.f32 %v5089_v58, %v3372_v60 }
 0x40b   : > { %v5118_v4 = vadd.f32 %v5117_v61, %v3374_v63 }
 0x40f   : > { %v5103_v46 = vpop.f32.mrf.mxu2 }
 0x410   : > { %v5104_v2 = vadd.f32 %v5103_v46, %v3373_v62  ;;  %v5131_v3 = vpop.f32.mrf.mxu3 }
 0x411   : > { %v5132_v47 = vadd.f32 %v5131_v3, %v3375_v0  ;;  %v5091_v7 = vpop.f32.mrf.mxu1 }
 0x412   : > { %v5150_v5 = vpack.c.bf16 %v5104_v2, %v5090_v1  ;;  %v5119_v10 = vpop.f32.mrf.mxu0  ;;  %v5092_v12 = vadd.f32 %v5091_v7, %v3372_v60 }
 0x413   : > { %v5151_v6 = vpack.c.bf16 %v5132_v47, %v5118_v4  ;;  %v5120_v15 = vadd.f32 %v5119_v10, %v3374_v63 }
 0x414   : > { %5182 = vst [vmem:[%s10431_s28 + $0x70] sm:$0xff] %v5150_v5 }
 0x415   : > { %5186 = vst.msk [vmem:[%s10431_s28 + $0x78] sm:$0xff] %vm10798_vm6, %v5151_v6 }
 0x417   : > { %v5105_v11 = vpop.f32.mrf.mxu2 }
 0x418   : > { %v5106_v13 = vadd.f32 %v5105_v11, %v3373_v62  ;;  %v5133_v14 = vpop.f32.mrf.mxu3 }
 0x419   : > { %v5134_v16 = vadd.f32 %v5133_v14, %v3375_v0 }
 0x41a   : > { %v5166_v37 = vpack.c.bf16 %v5106_v13, %v5092_v12 }
 0x41b   : > { %v5167_v17 = vpack.c.bf16 %v5134_v16, %v5120_v15 }
 0x41c   : > { %5201 = vst [vmem:[%s10431_s28 + $0xf0] sm:$0xff] %v5166_v37 }
 0x41d   : > { %5202 = vst.msk [vmem:[%s10431_s28 + $0xf8] sm:$0xff] %vm10798_vm6, %v5167_v17 }
 0x41e   : > { %8057 = shalt.err (!%p8054_p12)
}
 0x41f   : > { %s8101_s18 = smov 2048  }
 0x420   : > { %7951 = dma.vmem_to_hbm [thread:$0]  (%p8195_p5), %s5223_s12, 4096, %s5225_s17, %s5204_s27, %s8101_s18, %s8101_s18, %s8099_s11  }
 0x421 PF: > { %p7962_p13 = scmp.ge.s32.totalorder %s8096_s16, 2  ;;  %s5256_s28 = sand.u32 1, %s8084_s13  }
 0x422   : > { %s5257_s22 = scalar_lea.sflag [#allocation3], %s5256_s28 }
 0x423   : > { %p7956_p0 = pnand %p7962_p13, %p8199_p6 }
 0x425   : > { %p7957_p1 = pneg %p7956_p0 }
 0x427   : > { %8075 = dma.done.wait (%p7957_p1), %s5257_s22, 4096  }
 0x428   : > { %8077 = vsyncadd (%p7957_p1), %s5257_s22, 4294963200  ;;  %s5267_s30 = scalar_lea.sflag [#allocation5], %s5256_s28 }
 0x429   : > { %8079 = dma.done.wait (%p7957_p1), %s5267_s30, 256  }
 0x42a   : > { %8081 = vsyncadd (%p7957_p1), %s5267_s30, 4294967040  ;;  %s10864_s23 = sld [smem:[#allocation8_spill]]  ;;  %p24_p5 = scmp.ge.s32.totalorder %s8182_s19, 4  }
 0x42b   : > { %s10865_s13 = smov %s8088_s14  ;;  %s10866_s14 = smov %s8092_s15 }
 0x42c   : > { %s10868_s16 = smov %s8182_s19  ;;  %26 = sbr.rel (!%p24_p5) target bundleno = 8 (0x8), region = 108 }
 0x430   : > { %s10867_s15 = smov %s10864_s23 }
 0x431   :  { %5273 = vsyncpa [#allocation3], 1 }
 0x432   :  { %5275 = vsyncpa [#allocation3 + $0x1], 1 }
 0x433   :  { %5276 = vsyncpa [#allocation5], 1 }
 0x434   :  { %5278 = vsyncpa [#allocation5 + $0x1], 1 }

</bundles_post_ra>
